<compile_context>
chip_gen: v7x
topology: tpu7x:2x2x1
jax: 0.10.0
libtpu: 0.0.40
codegen_flags: <defaults>
</compile_context>

<pallas_src>
import math
import functools

import numpy as np
import jax
import jax.numpy as jnp
from jax.experimental import pallas as pl
from jax.experimental.pallas import tpu as pltpu

HIDDEN = 32            # hidden_size (shrunk from 128 for the demo)
NUM_MODES = 6
FUTURE_STEPS = 30
N_ORDER = 7            # bezier order
NHEAD = 4
RPE_DIM = 5 * 2 * 2
LN_EPS = 1e-5

F5 = FUTURE_STEPS * 5            # 150 trajectory lanes (t*5 + channel)
P5 = (N_ORDER + 1) * 5           # 40  bezier-parameter lanes
OUT_W = 384                      # merged output width [traj | dtraj | param | pad] = 3*128
SLAB_W = 384                     # packed parameter-slab width (>= widest matrix)


# ---------------------------------------------------------------------------
# fused kernel: B scenes per grid step
# ---------------------------------------------------------------------------
def fused_scene_kernel(cfg, ctx_ref, act_ref, tgtf_ref, rpe_ref, p_ref,
                       cls_ref, out_ref, xscr, escr):
    B = cfg['B']
    na_pad = cfg['na_pad']
    offs = cfg['offs']
    H = HIDDEN
    M = NUM_MODES
    S6 = M * B                      # mode tokens per grid step, rows ordered (mode, scene)
    dh = H // NHEAD
    scale = 1.0 / math.sqrt(dh)

    def wmat(name):                 # (rows, cols) static slice of the parameter slab
        o, r, c = offs[name]
        return p_ref[o:o + r, 0:c]

    def vrow(name):                 # (1, cols) row vector
        o, r, c = offs[name]
        return p_ref[o:o + 1, 0:c]

    def layer_norm(y, gname, bname):
        mu = jnp.mean(y, axis=-1, keepdims=True)
        var = jnp.mean(jnp.square(y - mu), axis=-1, keepdims=True)
        return (y - mu) * jax.lax.rsqrt(var + LN_EPS) * vrow(gname) + vrow(bname)

    def lin_ln_relu(x, name):       # nn.Sequential(Linear, LayerNorm, ReLU)
        y = jnp.dot(x, wmat(name + '_w'), preferred_element_type=jnp.float32) + vrow(name + '_b')
        return jnp.maximum(layer_norm(y, name + '_g', name + '_beta'), 0.0)

    def encoder_layer(x, L, bias):  # post-norm TransformerEncoderLayer, eval mode
        qkv = (jnp.dot(x, wmat(f'enc{L}_qkv_w'), preferred_element_type=jnp.float32)
               + vrow(f'enc{L}_qkv_b'))                                       # (S6, 3H) fused QKV
        heads = []
        for h in range(NHEAD):
            q = qkv[:, h * dh:(h + 1) * dh]
            k = qkv[:, H + h * dh:H + (h + 1) * dh]
            v = qkv[:, 2 * H + h * dh:2 * H + (h + 1) * dh]
            s = jnp.dot(q, k.T, preferred_element_type=jnp.float32) * scale + bias
            s = s - jnp.max(s, axis=-1, keepdims=True)
            p = jnp.exp(s)
            p = p * pl.reciprocal(jnp.sum(p, axis=-1, keepdims=True), approx=True)
            heads.append(jnp.dot(p, v, preferred_element_type=jnp.float32))
        attn = (jnp.dot(jnp.concatenate(heads, axis=-1), wmat(f'enc{L}_out_w'),
                        preferred_element_type=jnp.float32) + vrow(f'enc{L}_out_b'))
        x = layer_norm(x + attn, f'enc{L}_g1', f'enc{L}_be1')
        ff = jnp.maximum(jnp.dot(x, wmat(f'enc{L}_ff1_w'), preferred_element_type=jnp.float32)
                         + vrow(f'enc{L}_ff1_b'), 0.0)
        ff = jnp.dot(ff, wmat(f'enc{L}_ff2_w'), preferred_element_type=jnp.float32) + vrow(f'enc{L}_ff2_b')
        return layer_norm(x + ff, f'enc{L}_g2', f'enc{L}_be2')

    # ---------------------------------------------------------------- inputs
    ctx = ctx_ref[...]            # (B, H)
    actors = act_ref[...]         # (B*na_pad, H), zero-padded rows sliced away in wrapper
    tgtf = tgtf_ref[...]          # (B, H)
    rpes = rpe_ref[...]           # (B, RPE_DIM)

    # --------------------------------------------------- target / rpe path
    rpe = lin_ln_relu(rpes, 'rpe0')                                            # (B, H)
    tgt = lin_ln_relu(jnp.concatenate([tgtf, rpe], axis=-1), 'tgt0')
    tgt = lin_ln_relu(tgt, 'tgt1')                                             # (B, H)

    # ------------------------------------------- ctx / actor mode projections
    cmm = lin_ln_relu(lin_ln_relu(ctx, 'ctx0'), 'ctx1')                        # (B, M*H)
    amm = lin_ln_relu(lin_ln_relu(actors, 'act0'), 'act1')                     # (B*na_pad, M*H)

    # --------- mode tokens (mode, scene): per-mode writes into VMEM scratch
    for m in range(M):
        xscr[m * B:(m + 1) * B, :] = cmm[:, m * H:(m + 1) * H]
    x = xscr[...]                                                              # (S6, H)

    # --------------- mode self-attention, block-diagonal over batched scenes
    bias = wmat('attn_bias')                                                   # (S6, S6): 0 / -1e9
    x = encoder_layer(x, 0, bias)
    x = encoder_layer(x, 1, bias)

    # ------------------- classification logits (exact softmax in the wrapper)
    hcls = lin_ln_relu(lin_ln_relu(x, 'cls0'), 'cls1')
    cls_ref[...] = (jnp.dot(hcls, wmat('clsf_w'), preferred_element_type=jnp.float32)
                    + vrow('clsf_b'))                                          # (S6, 1)

    # -------- embed rows ordered (mode, scene, actor) = actor + ctx + tgt(m=0)
    for m in range(M):
        escr[m * B * na_pad:(m + 1) * B * na_pad, :] = amm[:, m * H:(m + 1) * H]
    # tgt is injected into mode-0 only (first B rows of the (mode, scene) token stack)
    x_plus = x + jnp.concatenate([tgt, jnp.zeros((S6 - B, H), jnp.float32)], axis=0)
    embed = escr[...] + jnp.dot(wmat('sel'), x_plus, preferred_element_type=jnp.float32)

    # ----------------------------------------------- regression head + bezier
    r1 = lin_ln_relu(lin_ln_relu(embed, 'reg0'), 'reg1')
    param = (jnp.dot(r1, wmat('regf_w'), preferred_element_type=jnp.float32)
             + vrow('regf_b'))                                                 # (rows, 40)

    # one lane-dense (rows, 384) write: [traj | d(traj)/dt | raw params | zero pad]
    full = jnp.dot(param, wmat('wall'), preferred_element_type=jnp.float32)
    emask = vrow('expmask')                                                    # exp() only on cov lanes
    out_ref[...] = jnp.where(emask > 0.5, jnp.exp(full), full)


# ---------------------------------------------------------------------------
# host-side constants: bezier / derivative / pass-through folded into (40, 384)
# ---------------------------------------------------------------------------
def build_output_matrix():
    ts = np.linspace(0.0, 1.0, FUTURE_STEPS, endpoint=True)
    T = np.stack([math.comb(N_ORDER, i) * (1.0 - ts) ** (N_ORDER - i) * ts ** i
                  for i in range(N_ORDER + 1)], axis=1)          # (F, N_ORDER+1)
    Tp = np.stack([N_ORDER * math.comb(N_ORDER - 1, i) * (1.0 - ts) ** (N_ORDER - 1 - i) * ts ** i
                   for i in range(N_ORDER)], axis=1)             # (F, N_ORDER)
    inv_dt = 1.0 / (FUTURE_STEPS * 0.1)
    nc = 5
    W_all = np.zeros((P5, OUT_W), np.float32)
    for o in range(N_ORDER + 1):
        for c in range(nc):
            row = o * nc + c
            W_all[row, c:F5:nc] = T[:, o]                        # mat_T @ param  (pos + cov)
            coeff = np.zeros(FUTURE_STEPS)
            if o >= 1:
                coeff = coeff + Tp[:, o - 1]
            if o <= N_ORDER - 1:
                coeff = coeff - Tp[:, o]
            W_all[row, F5 + c:2 * F5:nc] = coeff * inv_dt        # mat_Tp @ diff(param) / dt
            W_all[row, 2 * F5 + row] = 1.0                       # raw bezier params pass-through
    emask = np.zeros((1, OUT_W), np.float32)
    emask[0, :F5] = np.tile((np.arange(nc) >= 2).astype(np.float32), FUTURE_STEPS)
    return W_all, emask


def build_selectors(B, na_pad):
    """Selector matmul (embed row -> its (mode, scene) token) and cross-scene attn bias."""
    S6 = NUM_MODES * B
    R = S6 * na_pad
    r = np.arange(R)
    m = r // (B * na_pad)
    b = (r % (B * na_pad)) // na_pad
    sel = np.zeros((R, S6), np.float32)
    sel[r, m * B + b] = 1.0
    idx = np.arange(S6)
    same = (idx[:, None] % B) == (idx[None, :] % B)              # token ordering is (mode, scene)
    bias = np.where(same, 0.0, -1e9).astype(np.float32)
    return sel, bias


# ---------------------------------------------------------------------------
# deterministic synthetic parameters
# ---------------------------------------------------------------------------
def init_params(key):
    dim_mm = HIDDEN * NUM_MODES
    dim_inter = dim_mm // 2
    keys = iter(jax.random.split(key, 40))

    def lin(din, dout):
        kw, kb = jax.random.split(next(keys))
        return dict(w=0.1 * jax.random.normal(kw, (din, dout), jnp.float32),
                    b=0.02 * jax.random.normal(kb, (1, dout), jnp.float32))

    def lin_ln(din, dout):
        d = lin(din, dout)
        d['g'] = jnp.ones((1, dout), jnp.float32)
        d['beta'] = jnp.zeros((1, dout), jnp.float32)
        return d

    p = {}
    p['rpe0'] = lin_ln(RPE_DIM, HIDDEN)
    p['tgt0'] = lin_ln(2 * HIDDEN, HIDDEN)
    p['tgt1'] = lin_ln(HIDDEN, HIDDEN)
    p['ctx0'] = lin_ln(HIDDEN, dim_inter)
    p['ctx1'] = lin_ln(dim_inter, dim_mm)
    p['act0'] = lin_ln(HIDDEN, dim_inter)
    p['act1'] = lin_ln(dim_inter, dim_mm)
    for L in range(2):
        p[f'enc{L}'] = dict(qkv=lin(HIDDEN, 3 * HIDDEN),
                            out=lin(HIDDEN, HIDDEN),
                            ff1=lin(HIDDEN, 12 * HIDDEN),
                            ff2=lin(12 * HIDDEN, HIDDEN),
                            g1=jnp.ones((1, HIDDEN), jnp.float32),
                            be1=jnp.zeros((1, HIDDEN), jnp.float32),
                            g2=jnp.ones((1, HIDDEN), jnp.float32),
                            be2=jnp.zeros((1, HIDDEN), jnp.float32))
    p['cls0'] = lin_ln(HIDDEN, HIDDEN)
    p['cls1'] = lin_ln(HIDDEN, HIDDEN)
    p['clsf'] = lin(HIDDEN, 1)
    p['reg0'] = lin_ln(HIDDEN, HIDDEN)
    p['reg1'] = lin_ln(HIDDEN, HIDDEN)
    p['regf'] = lin(HIDDEN, P5)
    return p


LIN_LN_NAMES = ('rpe0', 'tgt0', 'tgt1', 'ctx0', 'ctx1', 'act0', 'act1',
                'cls0', 'cls1', 'reg0', 'reg1')


def pack_params(params, B, na_pad):
    """Pack every weight/bias/LN/constant into one (rows, SLAB_W) f32 slab.

    Matrices get 8-aligned row offsets (sublane-aligned slices for the MXU);
    row vectors are packed densely.  Returns (slab, {name: (row, nrows, ncols)}).
    """
    W_all, emask = build_output_matrix()
    sel, attn_bias = build_selectors(B, na_pad)

    entries = []   # (name, 2-D np.ndarray, row_alignment)

    def mat(name, a):
        entries.append((name, np.asarray(a, np.float32), 8))

    def vec(name, a):
        entries.append((name, np.asarray(a, np.float32).reshape(1, -1), 1))

    for nm in LIN_LN_NAMES:
        blk = params[nm]
        mat(nm + '_w', blk['w']); vec(nm + '_b', blk['b'])
        vec(nm + '_g', blk['g']); vec(nm + '_beta', blk['beta'])
    for L in range(2):
        e = params[f'enc{L}']
        mat(f'enc{L}_qkv_w', e['qkv']['w']); vec(f'enc{L}_qkv_b', e['qkv']['b'])
        mat(f'enc{L}_out_w', e['out']['w']); vec(f'enc{L}_out_b', e['out']['b'])
        mat(f'enc{L}_ff1_w', e['ff1']['w']); vec(f'enc{L}_ff1_b', e['ff1']['b'])
        mat(f'enc{L}_ff2_w', e['ff2']['w']); vec(f'enc{L}_ff2_b', e['ff2']['b'])
        vec(f'enc{L}_g1', e['g1']); vec(f'enc{L}_be1', e['be1'])
        vec(f'enc{L}_g2', e['g2']); vec(f'enc{L}_be2', e['be2'])
    mat('clsf_w', params['clsf']['w']); vec('clsf_b', params['clsf']['b'])
    mat('regf_w', params['regf']['w']); vec('regf_b', params['regf']['b'])
    mat('wall', W_all); vec('expmask', emask)
    mat('sel', sel); mat('attn_bias', attn_bias)

    offs, chunks, cur = {}, [], 0
    for name, arr, align in entries:
        r, c = arr.shape
        assert c <= SLAB_W, (name, arr.shape)
        start = ((cur + align - 1) // align) * align
        if start > cur:
            chunks.append(np.zeros((start - cur, SLAB_W), np.float32))
        buf = np.zeros((r, SLAB_W), np.float32)
        buf[:, :c] = arr
        chunks.append(buf)
        offs[name] = (start, r, c)
        cur = start + r
    if cur % 8:
        pad = 8 - cur % 8
        chunks.append(np.zeros((pad, SLAB_W), np.float32))
        cur += pad
    slab = jnp.asarray(np.concatenate(chunks, axis=0))
    return slab, offs


# ---------------------------------------------------------------------------
# fused forward pass (mirrors SceneDecoder.forward, param_out='bezier')
# ---------------------------------------------------------------------------
def scene_decoder_forward(params, ctx, actors, actor_idcs, tgt_feat, tgt_rpes):
    if tgt_feat.ndim == 1:
        tgt_feat = tgt_feat[None, :]
    n_scenes = ctx.shape[0]
    max_na = max(int(idcs.shape[0]) for idcs in actor_idcs)
    na_pad = max(8, ((max_na + 7) // 8) * 8)

    # scenes per grid step: fold enough scenes into the matmul rows to fill MXU
    # sublanes, bounded so the per-step activations / output block stay small.
    max_rows = 4096                                       # embed rows per step cap (~6 MB out block)
    b_cap = max(1, max_rows // (NUM_MODES * na_pad))
    if n_scenes <= b_cap:
        B, n_blocks = n_scenes, 1
    else:
        B = max(8, (b_cap // 8) * 8)                      # 8-aligned block rows when n_blocks > 1
        n_blocks = (n_scenes + B - 1) // B
    s_pad = B * n_blocks
    S6 = NUM_MODES * B
    R = S6 * na_pad                                       # embed / output rows per grid step

    # ---- pad actors per scene to na_pad rows, scenes to s_pad -----------------
    padded = []
    for idcs in actor_idcs:
        a = actors[idcs]
        if a.shape[0] < na_pad:
            a = jnp.concatenate(
                [a, jnp.zeros((na_pad - a.shape[0], a.shape[1]), a.dtype)], axis=0)
        padded.append(a)
    for _ in range(s_pad - n_scenes):
        padded.append(jnp.zeros((na_pad, actors.shape[1]), actors.dtype))
    actors_flat = jnp.concatenate(padded, axis=0)                     # (s_pad*na_pad, H)

    def pad_scenes(x):
        if s_pad == n_scenes:
            return x
        return jnp.concatenate(
            [x, jnp.zeros((s_pad - n_scenes,) + x.shape[1:], x.dtype)], axis=0)

    ctx_p = pad_scenes(ctx)
    tgtf_p = pad_scenes(tgt_feat)
    rpes_p = pad_scenes(tgt_rpes)

    slab, offs = pack_params(params, B, na_pad)
    cfg = dict(B=B, na_pad=na_pad, offs=offs)

    grid_spec = pltpu.PrefetchScalarGridSpec(
        num_scalar_prefetch=0,
        grid=(n_blocks,),
        in_specs=[
            pl.BlockSpec((B, HIDDEN), lambda i: (i, 0)),              # ctx
            pl.BlockSpec((B * na_pad, HIDDEN), lambda i: (i, 0)),     # actors (padded per scene)
            pl.BlockSpec((B, HIDDEN), lambda i: (i, 0)),              # tgt_feat
            pl.BlockSpec((B, RPE_DIM), lambda i: (i, 0)),             # tgt_rpes
            # one resident parameter slab (constant block index across the whole grid)
            pl.BlockSpec(tuple(slab.shape), lambda i: (0, 0)),
        ],
        out_specs=[
            pl.BlockSpec((S6, 1), lambda i: (i, 0)),                  # cls logits
            pl.BlockSpec((R, OUT_W), lambda i: (i, 0)),               # merged traj/dtraj/param
        ],
        scratch_shapes=[
            pltpu.VMEM((S6, HIDDEN), jnp.float32),                    # mode tokens
            pltpu.VMEM((R, HIDDEN), jnp.float32),                     # embed rows
        ],
    )

    call = pl.pallas_call(
        functools.partial(fused_scene_kernel, cfg),
        out_shape=(
            jax.ShapeDtypeStruct((n_blocks * S6, 1), jnp.float32),
            jax.ShapeDtypeStruct((n_blocks * R, OUT_W), jnp.float32),
        ),
        grid_spec=grid_spec,
        compiler_params=pltpu.CompilerParams(
            dimension_semantics=("parallel",)),       # v7x: scene blocks across both TCs
    )

    cls_o, out_o = call(ctx_p, actors_flat, tgtf_p, rpes_p, slab)

    # ---- tiny JAX epilogue: exact cls softmax + unpad / reorder ----------------
    cls_logits = cls_o.reshape(n_blocks, NUM_MODES, B).transpose(0, 2, 1).reshape(s_pad, NUM_MODES)
    cls_all = jax.nn.softmax(cls_logits, axis=-1)

    out = out_o.reshape(n_blocks, NUM_MODES, B, na_pad, OUT_W)
    out = out.transpose(0, 2, 1, 3, 4).reshape(s_pad, NUM_MODES, na_pad, OUT_W)

    res_cls, res_reg, res_aux = [], [], []
    for i, idcs in enumerate(actor_idcs):
        na = int(idcs.shape[0])
        sc = out[i, :, :na]                                                    # (M, na, OUT_W)
        reg = sc[..., :F5].reshape(NUM_MODES, na, FUTURE_STEPS, 5).transpose(1, 0, 2, 3)
        dtr = sc[..., F5:2 * F5].reshape(NUM_MODES, na, FUTURE_STEPS, 5).transpose(1, 0, 2, 3)
        param = sc[..., 2 * F5:2 * F5 + P5].reshape(NUM_MODES, na, N_ORDER + 1, 5)
        res_cls.append(cls_all[i:i + 1])                                       # (1, M)
        res_reg.append(reg)                                                    # (na, M, F, 5) [pos, exp(cov)]
        res_aux.append((dtr[..., :2], dtr[..., 2:], param))                    # (vel, cov_vel, bezier params)
    return res_cls, res_reg, res_aux


if __name__ == "__main__":
    key = jax.random.PRNGKey(0)
    k_param, k_ctx, k_act, k_tgt, k_rpe = jax.random.split(key, 5)

    params = init_params(k_param)

    n_scenes = 2
    n_actors_total = 8
    ctx = jax.random.normal(k_ctx, (n_scenes, HIDDEN), jnp.float32)
    actors = jax.random.normal(k_act, (n_actors_total, HIDDEN), jnp.float32)
    actor_idcs = [jnp.array([0, 1, 2], jnp.int32),
                  jnp.array([3, 4, 5, 6, 7], jnp.int32)]
    tgt_feat = jax.random.normal(k_tgt, (n_scenes, HIDDEN), jnp.float32)
    tgt_rpes = jax.random.normal(k_rpe, (n_scenes, RPE_DIM), jnp.float32)

    res_cls, res_reg, res_aux = scene_decoder_forward(
        params, ctx, actors, actor_idcs, tgt_feat, tgt_rpes)
    jax.block_until_ready((res_cls, res_reg, res_aux))

    assert res_cls[0].shape == (1, NUM_MODES)
    assert res_cls[1].shape == (1, NUM_MODES)
    assert res_reg[0].shape == (3, NUM_MODES, FUTURE_STEPS, 5)
    assert res_reg[1].shape == (5, NUM_MODES, FUTURE_STEPS, 5)
    assert res_aux[0][0].shape == (3, NUM_MODES, FUTURE_STEPS, 2)
    assert res_aux[0][1].shape == (3, NUM_MODES, FUTURE_STEPS, 3)
    assert res_aux[1][2].shape == (NUM_MODES, 5, N_ORDER + 1, 5)
    # exact (wrapper-side) softmax -> probabilities sum to 1
    assert abs(float(jnp.sum(res_cls[0])) - 1.0) < 1e-4
    assert abs(float(jnp.sum(res_cls[1])) - 1.0) < 1e-4
    assert bool(jnp.isfinite(res_reg[0]).all()) and bool(jnp.isfinite(res_reg[1]).all())
    print("KERNEL_OK")
</pallas_src>

<mosaic_0001>
module attributes {stable_mosaic.version = 11 : i64} {
  func.func @fused_scene_kernel(%arg0: i32, %arg1: memref<2x32xf32, #tpu.memory_space<vmem>>, %arg2: memref<16x32xf32, #tpu.memory_space<vmem>>, %arg3: memref<2x32xf32, #tpu.memory_space<vmem>>, %arg4: memref<2x20xf32, #tpu.memory_space<vmem>>, %arg5: memref<1848x384xf32, #tpu.memory_space<vmem>>, %arg6: memref<12x1xf32, #tpu.memory_space<vmem>>, %arg7: memref<96x384xf32, #tpu.memory_space<vmem>>, %arg8: memref<12x32xf32, #tpu.memory_space<vmem>>, %arg9: memref<96x32xf32, #tpu.memory_space<vmem>>) attributes {dimension_semantics = [#tpu.dimension_semantics<parallel>], iteration_bounds = array<i64: 1>, scalar_prefetch = 0 : i64, scratch_operands = 2 : i64, tpu.core_type = #tpu.core_type<tc>, window_params = [{transform_indices = @transform_0, window_bounds = array<i64: 2, 32>}, {transform_indices = @transform_1, window_bounds = array<i64: 16, 32>}, {transform_indices = @transform_2, window_bounds = array<i64: 2, 32>}, {transform_indices = @transform_3, window_bounds = array<i64: 2, 20>}, {pipeline_mode = #tpu.pipeline_mode<synchronous>, transform_indices = @transform_4, window_bounds = array<i64: 1848, 384>}, {transform_indices = @transform_5, window_bounds = array<i64: 12, 1>}, {transform_indices = @transform_6, window_bounds = array<i64: 96, 384>}]} {
    %c0 = arith.constant 0 : index
    %c0_0 = arith.constant 0 : index
    %0 = vector.load %arg1[%c0, %c0_0] : memref<2x32xf32, #tpu.memory_space<vmem>>, vector<2x32xf32>
    %c0_1 = arith.constant 0 : index
    %c0_2 = arith.constant 0 : index
    %1 = vector.load %arg2[%c0_1, %c0_2] : memref<16x32xf32, #tpu.memory_space<vmem>>, vector<16x32xf32>
    %c0_3 = arith.constant 0 : index
    %c0_4 = arith.constant 0 : index
    %2 = vector.load %arg3[%c0_3, %c0_4] : memref<2x32xf32, #tpu.memory_space<vmem>>, vector<2x32xf32>
    %c0_5 = arith.constant 0 : index
    %c0_6 = arith.constant 0 : index
    %3 = vector.load %arg4[%c0_5, %c0_6] : memref<2x20xf32, #tpu.memory_space<vmem>>, vector<2x20xf32>
    %c0_7 = arith.constant 0 : index
    %c0_8 = arith.constant 0 : index
    %4 = vector.load %arg5[%c0_7, %c0_8] : memref<1848x384xf32, #tpu.memory_space<vmem>>, vector<20x32xf32>
    %cst = arith.constant dense<0.000000e+00> : vector<2x32xf32>
    %5 = tpu.matmul %3, %4, %cst {dimension_numbers = #tpu.dot_dimension_numbers<[1], [0], [0], [1], [0, 0, 1, 1], [], []>} : vector<2x20xf32>, vector<20x32xf32>, vector<2x32xf32> -> vector<2x32xf32>
    %c20 = arith.constant 20 : index
    %c0_9 = arith.constant 0 : index
    %6 = vector.load %arg5[%c20, %c0_9] : memref<1848x384xf32, #tpu.memory_space<vmem>>, vector<1x32xf32>
    %7 = vector.broadcast %6 : vector<1x32xf32> to vector<2x32xf32>
    %8 = arith.addf %5, %7 : vector<2x32xf32>
    %cst_10 = arith.constant dense<0.000000e+00> : vector<2xf32>
    %9 = vector.multi_reduction <add>, %8, %cst_10 [1] : vector<2x32xf32> to vector<2xf32>
    %10 = vector.shape_cast %9 : vector<2xf32> to vector<2x1xf32>
    %cst_11 = arith.constant 3.200000e+01 : f32
    %11 = vector.broadcast %cst_11 : f32 to vector<2x1xf32>
    %12 = arith.divf %10, %11 : vector<2x1xf32>
    %13 = vector.broadcast %12 : vector<2x1xf32> to vector<2x32xf32>
    %14 = arith.subf %8, %13 : vector<2x32xf32>
    %15 = arith.mulf %14, %14 : vector<2x32xf32>
    %cst_12 = arith.constant dense<0.000000e+00> : vector<2xf32>
    %16 = vector.multi_reduction <add>, %15, %cst_12 [1] : vector<2x32xf32> to vector<2xf32>
    %17 = vector.shape_cast %16 : vector<2xf32> to vector<2x1xf32>
    %cst_13 = arith.constant 3.200000e+01 : f32
    %18 = vector.broadcast %cst_13 : f32 to vector<2x1xf32>
    %19 = arith.divf %17, %18 : vector<2x1xf32>
    %20 = vector.broadcast %12 : vector<2x1xf32> to vector<2x32xf32>
    %21 = arith.subf %8, %20 : vector<2x32xf32>
    %cst_14 = arith.constant 9.99999974E-6 : f32
    %22 = vector.broadcast %cst_14 : f32 to vector<2x1xf32>
    %23 = arith.addf %19, %22 : vector<2x1xf32>
    %24 = math.rsqrt %23 : vector<2x1xf32>
    %25 = vector.broadcast %24 : vector<2x1xf32> to vector<2x32xf32>
    %26 = arith.mulf %21, %25 : vector<2x32xf32>
    %c21 = arith.constant 21 : index
    %c0_15 = arith.constant 0 : index
    %27 = vector.load %arg5[%c21, %c0_15] : memref<1848x384xf32, #tpu.memory_space<vmem>>, vector<1x32xf32>
    %28 = vector.broadcast %27 : vector<1x32xf32> to vector<2x32xf32>
    %29 = arith.mulf %26, %28 : vector<2x32xf32>
    %c22 = arith.constant 22 : index
    %c0_16 = arith.constant 0 : index
    %30 = vector.load %arg5[%c22, %c0_16] : memref<1848x384xf32, #tpu.memory_space<vmem>>, vector<1x32xf32>
    %31 = vector.broadcast %30 : vector<1x32xf32> to vector<2x32xf32>
    %32 = arith.addf %29, %31 : vector<2x32xf32>
    %cst_17 = arith.constant 0.000000e+00 : f32
    %33 = vector.broadcast %cst_17 : f32 to vector<2x32xf32>
    %34 = arith.maximumf %32, %33 : vector<2x32xf32>
    %35 = tpu.concatenate %2, %34 in 1 : vector<2x32xf32>, vector<2x32xf32> -> vector<2x64xf32>
    %c24 = arith.constant 24 : index
    %c0_18 = arith.constant 0 : index
    %36 = vector.load %arg5[%c24, %c0_18] : memref<1848x384xf32, #tpu.memory_space<vmem>>, vector<64x32xf32>
    %cst_19 = arith.constant dense<0.000000e+00> : vector<2x32xf32>
    %37 = tpu.matmul %35, %36, %cst_19 {dimension_numbers = #tpu.dot_dimension_numbers<[1], [0], [0], [1], [0, 0, 1, 1], [], []>} : vector<2x64xf32>, vector<64x32xf32>, vector<2x32xf32> -> vector<2x32xf32>
    %c88 = arith.constant 88 : index
    %c0_20 = arith.constant 0 : index
    %38 = vector.load %arg5[%c88, %c0_20] : memref<1848x384xf32, #tpu.memory_space<vmem>>, vector<1x32xf32>
    %39 = vector.broadcast %38 : vector<1x32xf32> to vector<2x32xf32>
    %40 = arith.addf %37, %39 : vector<2x32xf32>
    %cst_21 = arith.constant dense<0.000000e+00> : vector<2xf32>
    %41 = vector.multi_reduction <add>, %40, %cst_21 [1] : vector<2x32xf32> to vector<2xf32>
    %42 = vector.shape_cast %41 : vector<2xf32> to vector<2x1xf32>
    %cst_22 = arith.constant 3.200000e+01 : f32
    %43 = vector.broadcast %cst_22 : f32 to vector<2x1xf32>
    %44 = arith.divf %42, %43 : vector<2x1xf32>
    %45 = vector.broadcast %44 : vector<2x1xf32> to vector<2x32xf32>
    %46 = arith.subf %40, %45 : vector<2x32xf32>
    %47 = arith.mulf %46, %46 : vector<2x32xf32>
    %cst_23 = arith.constant dense<0.000000e+00> : vector<2xf32>
    %48 = vector.multi_reduction <add>, %47, %cst_23 [1] : vector<2x32xf32> to vector<2xf32>
    %49 = vector.shape_cast %48 : vector<2xf32> to vector<2x1xf32>
    %cst_24 = arith.constant 3.200000e+01 : f32
    %50 = vector.broadcast %cst_24 : f32 to vector<2x1xf32>
    %51 = arith.divf %49, %50 : vector<2x1xf32>
    %52 = vector.broadcast %44 : vector<2x1xf32> to vector<2x32xf32>
    %53 = arith.subf %40, %52 : vector<2x32xf32>
    %cst_25 = arith.constant 9.99999974E-6 : f32
    %54 = vector.broadcast %cst_25 : f32 to vector<2x1xf32>
    %55 = arith.addf %51, %54 : vector<2x1xf32>
    %56 = math.rsqrt %55 : vector<2x1xf32>
    %57 = vector.broadcast %56 : vector<2x1xf32> to vector<2x32xf32>
    %58 = arith.mulf %53, %57 : vector<2x32xf32>
    %c89 = arith.constant 89 : index
    %c0_26 = arith.constant 0 : index
    %59 = vector.load %arg5[%c89, %c0_26] : memref<1848x384xf32, #tpu.memory_space<vmem>>, vector<1x32xf32>
    %60 = vector.broadcast %59 : vector<1x32xf32> to vector<2x32xf32>
    %61 = arith.mulf %58, %60 : vector<2x32xf32>
    %c90 = arith.constant 90 : index
    %c0_27 = arith.constant 0 : index
    %62 = vector.load %arg5[%c90, %c0_27] : memref<1848x384xf32, #tpu.memory_space<vmem>>, vector<1x32xf32>
    %63 = vector.broadcast %62 : vector<1x32xf32> to vector<2x32xf32>
    %64 = arith.addf %61, %63 : vector<2x32xf32>
    %cst_28 = arith.constant 0.000000e+00 : f32
    %65 = vector.broadcast %cst_28 : f32 to vector<2x32xf32>
    %66 = arith.maximumf %64, %65 : vector<2x32xf32>
    %c96 = arith.constant 96 : index
    %c0_29 = arith.constant 0 : index
    %67 = vector.load %arg5[%c96, %c0_29] : memref<1848x384xf32, #tpu.memory_space<vmem>>, vector<32x32xf32>
    %cst_30 = arith.constant dense<0.000000e+00> : vector<2x32xf32>
    %68 = tpu.matmul %66, %67, %cst_30 {dimension_numbers = #tpu.dot_dimension_numbers<[1], [0], [0], [1], [0, 0, 1, 1], [], []>} : vector<2x32xf32>, vector<32x32xf32>, vector<2x32xf32> -> vector<2x32xf32>
    %c128 = arith.constant 128 : index
    %c0_31 = arith.constant 0 : index
    %69 = vector.load %arg5[%c128, %c0_31] : memref<1848x384xf32, #tpu.memory_space<vmem>>, vector<1x32xf32>
    %70 = vector.broadcast %69 : vector<1x32xf32> to vector<2x32xf32>
    %71 = arith.addf %68, %70 : vector<2x32xf32>
    %cst_32 = arith.constant dense<0.000000e+00> : vector<2xf32>
    %72 = vector.multi_reduction <add>, %71, %cst_32 [1] : vector<2x32xf32> to vector<2xf32>
    %73 = vector.shape_cast %72 : vector<2xf32> to vector<2x1xf32>
    %cst_33 = arith.constant 3.200000e+01 : f32
    %74 = vector.broadcast %cst_33 : f32 to vector<2x1xf32>
    %75 = arith.divf %73, %74 : vector<2x1xf32>
    %76 = vector.broadcast %75 : vector<2x1xf32> to vector<2x32xf32>
    %77 = arith.subf %71, %76 : vector<2x32xf32>
    %78 = arith.mulf %77, %77 : vector<2x32xf32>
    %cst_34 = arith.constant dense<0.000000e+00> : vector<2xf32>
    %79 = vector.multi_reduction <add>, %78, %cst_34 [1] : vector<2x32xf32> to vector<2xf32>
    %80 = vector.shape_cast %79 : vector<2xf32> to vector<2x1xf32>
    %cst_35 = arith.constant 3.200000e+01 : f32
    %81 = vector.broadcast %cst_35 : f32 to vector<2x1xf32>
    %82 = arith.divf %80, %81 : vector<2x1xf32>
    %83 = vector.broadcast %75 : vector<2x1xf32> to vector<2x32xf32>
    %84 = arith.subf %71, %83 : vector<2x32xf32>
    %cst_36 = arith.constant 9.99999974E-6 : f32
    %85 = vector.broadcast %cst_36 : f32 to vector<2x1xf32>
    %86 = arith.addf %82, %85 : vector<2x1xf32>
    %87 = math.rsqrt %86 : vector<2x1xf32>
    %88 = vector.broadcast %87 : vector<2x1xf32> to vector<2x32xf32>
    %89 = arith.mulf %84, %88 : vector<2x32xf32>
    %c129 = arith.constant 129 : index
    %c0_37 = arith.constant 0 : index
    %90 = vector.load %arg5[%c129, %c0_37] : memref<1848x384xf32, #tpu.memory_space<vmem>>, vector<1x32xf32>
    %91 = vector.broadcast %90 : vector<1x32xf32> to vector<2x32xf32>
    %92 = arith.mulf %89, %91 : vector<2x32xf32>
    %c130 = arith.constant 130 : index
    %c0_38 = arith.constant 0 : index
    %93 = vector.load %arg5[%c130, %c0_38] : memref<1848x384xf32, #tpu.memory_space<vmem>>, vector<1x32xf32>
    %94 = vector.broadcast %93 : vector<1x32xf32> to vector<2x32xf32>
    %95 = arith.addf %92, %94 : vector<2x32xf32>
    %cst_39 = arith.constant 0.000000e+00 : f32
    %96 = vector.broadcast %cst_39 : f32 to vector<2x32xf32>
    %97 = arith.maximumf %95, %96 : vector<2x32xf32>
    %c136 = arith.constant 136 : index
    %c0_40 = arith.constant 0 : index
    %98 = vector.load %arg5[%c136, %c0_40] : memref<1848x384xf32, #tpu.memory_space<vmem>>, vector<32x96xf32>
    %cst_41 = arith.constant dense<0.000000e+00> : vector<2x96xf32>
    %99 = tpu.matmul %0, %98, %cst_41 {dimension_numbers = #tpu.dot_dimension_numbers<[1], [0], [0], [1], [0, 0, 1, 1], [], []>} : vector<2x32xf32>, vector<32x96xf32>, vector<2x96xf32> -> vector<2x96xf32>
    %c168 = arith.constant 168 : index
    %c0_42 = arith.constant 0 : index
    %100 = vector.load %arg5[%c168, %c0_42] : memref<1848x384xf32, #tpu.memory_space<vmem>>, vector<1x96xf32>
    %101 = vector.broadcast %100 : vector<1x96xf32> to vector<2x96xf32>
    %102 = arith.addf %99, %101 : vector<2x96xf32>
    %cst_43 = arith.constant dense<0.000000e+00> : vector<2xf32>
    %103 = vector.multi_reduction <add>, %102, %cst_43 [1] : vector<2x96xf32> to vector<2xf32>
    %104 = vector.shape_cast %103 : vector<2xf32> to vector<2x1xf32>
    %cst_44 = arith.constant 9.600000e+01 : f32
    %105 = vector.broadcast %cst_44 : f32 to vector<2x1xf32>
    %106 = arith.divf %104, %105 : vector<2x1xf32>
    %107 = vector.broadcast %106 : vector<2x1xf32> to vector<2x96xf32>
    %108 = arith.subf %102, %107 : vector<2x96xf32>
    %109 = arith.mulf %108, %108 : vector<2x96xf32>
    %cst_45 = arith.constant dense<0.000000e+00> : vector<2xf32>
    %110 = vector.multi_reduction <add>, %109, %cst_45 [1] : vector<2x96xf32> to vector<2xf32>
    %111 = vector.shape_cast %110 : vector<2xf32> to vector<2x1xf32>
    %cst_46 = arith.constant 9.600000e+01 : f32
    %112 = vector.broadcast %cst_46 : f32 to vector<2x1xf32>
    %113 = arith.divf %111, %112 : vector<2x1xf32>
    %114 = vector.broadcast %106 : vector<2x1xf32> to vector<2x96xf32>
    %115 = arith.subf %102, %114 : vector<2x96xf32>
    %cst_47 = arith.constant 9.99999974E-6 : f32
    %116 = vector.broadcast %cst_47 : f32 to vector<2x1xf32>
    %117 = arith.addf %113, %116 : vector<2x1xf32>
    %118 = math.rsqrt %117 : vector<2x1xf32>
    %119 = vector.broadcast %118 : vector<2x1xf32> to vector<2x96xf32>
    %120 = arith.mulf %115, %119 : vector<2x96xf32>
    %c169 = arith.constant 169 : index
    %c0_48 = arith.constant 0 : index
    %121 = vector.load %arg5[%c169, %c0_48] : memref<1848x384xf32, #tpu.memory_space<vmem>>, vector<1x96xf32>
    %122 = vector.broadcast %121 : vector<1x96xf32> to vector<2x96xf32>
    %123 = arith.mulf %120, %122 : vector<2x96xf32>
    %c170 = arith.constant 170 : index
    %c0_49 = arith.constant 0 : index
    %124 = vector.load %arg5[%c170, %c0_49] : memref<1848x384xf32, #tpu.memory_space<vmem>>, vector<1x96xf32>
    %125 = vector.broadcast %124 : vector<1x96xf32> to vector<2x96xf32>
    %126 = arith.addf %123, %125 : vector<2x96xf32>
    %cst_50 = arith.constant 0.000000e+00 : f32
    %127 = vector.broadcast %cst_50 : f32 to vector<2x96xf32>
    %128 = arith.maximumf %126, %127 : vector<2x96xf32>
    %c176 = arith.constant 176 : index
    %c0_51 = arith.constant 0 : index
    %129 = vector.load %arg5[%c176, %c0_51] : memref<1848x384xf32, #tpu.memory_space<vmem>>, vector<96x192xf32>
    %cst_52 = arith.constant dense<0.000000e+00> : vector<2x192xf32>
    %130 = tpu.matmul %128, %129, %cst_52 {dimension_numbers = #tpu.dot_dimension_numbers<[1], [0], [0], [1], [0, 0, 1, 1], [], []>} : vector<2x96xf32>, vector<96x192xf32>, vector<2x192xf32> -> vector<2x192xf32>
    %c272 = arith.constant 272 : index
    %c0_53 = arith.constant 0 : index
    %131 = vector.load %arg5[%c272, %c0_53] : memref<1848x384xf32, #tpu.memory_space<vmem>>, vector<1x192xf32>
    %132 = vector.broadcast %131 : vector<1x192xf32> to vector<2x192xf32>
    %133 = arith.addf %130, %132 : vector<2x192xf32>
    %cst_54 = arith.constant dense<0.000000e+00> : vector<2xf32>
    %134 = vector.multi_reduction <add>, %133, %cst_54 [1] : vector<2x192xf32> to vector<2xf32>
    %135 = vector.shape_cast %134 : vector<2xf32> to vector<2x1xf32>
    %cst_55 = arith.constant 1.920000e+02 : f32
    %136 = vector.broadcast %cst_55 : f32 to vector<2x1xf32>
    %137 = arith.divf %135, %136 : vector<2x1xf32>
    %138 = vector.broadcast %137 : vector<2x1xf32> to vector<2x192xf32>
    %139 = arith.subf %133, %138 : vector<2x192xf32>
    %140 = arith.mulf %139, %139 : vector<2x192xf32>
    %cst_56 = arith.constant dense<0.000000e+00> : vector<2xf32>
    %141 = vector.multi_reduction <add>, %140, %cst_56 [1] : vector<2x192xf32> to vector<2xf32>
    %142 = vector.shape_cast %141 : vector<2xf32> to vector<2x1xf32>
    %cst_57 = arith.constant 1.920000e+02 : f32
    %143 = vector.broadcast %cst_57 : f32 to vector<2x1xf32>
    %144 = arith.divf %142, %143 : vector<2x1xf32>
    %145 = vector.broadcast %137 : vector<2x1xf32> to vector<2x192xf32>
    %146 = arith.subf %133, %145 : vector<2x192xf32>
    %cst_58 = arith.constant 9.99999974E-6 : f32
    %147 = vector.broadcast %cst_58 : f32 to vector<2x1xf32>
    %148 = arith.addf %144, %147 : vector<2x1xf32>
    %149 = math.rsqrt %148 : vector<2x1xf32>
    %150 = vector.broadcast %149 : vector<2x1xf32> to vector<2x192xf32>
    %151 = arith.mulf %146, %150 : vector<2x192xf32>
    %c273 = arith.constant 273 : index
    %c0_59 = arith.constant 0 : index
    %152 = vector.load %arg5[%c273, %c0_59] : memref<1848x384xf32, #tpu.memory_space<vmem>>, vector<1x192xf32>
    %153 = vector.broadcast %152 : vector<1x192xf32> to vector<2x192xf32>
    %154 = arith.mulf %151, %153 : vector<2x192xf32>
    %c274 = arith.constant 274 : index
    %c0_60 = arith.constant 0 : index
    %155 = vector.load %arg5[%c274, %c0_60] : memref<1848x384xf32, #tpu.memory_space<vmem>>, vector<1x192xf32>
    %156 = vector.broadcast %155 : vector<1x192xf32> to vector<2x192xf32>
    %157 = arith.addf %154, %156 : vector<2x192xf32>
    %cst_61 = arith.constant 0.000000e+00 : f32
    %158 = vector.broadcast %cst_61 : f32 to vector<2x192xf32>
    %159 = arith.maximumf %157, %158 : vector<2x192xf32>
    %c280 = arith.constant 280 : index
    %c0_62 = arith.constant 0 : index
    %160 = vector.load %arg5[%c280, %c0_62] : memref<1848x384xf32, #tpu.memory_space<vmem>>, vector<32x96xf32>
    %cst_63 = arith.constant dense<0.000000e+00> : vector<16x96xf32>
    %161 = tpu.matmul %1, %160, %cst_63 {dimension_numbers = #tpu.dot_dimension_numbers<[1], [0], [0], [1], [0, 0, 1, 1], [], []>} : vector<16x32xf32>, vector<32x96xf32>, vector<16x96xf32> -> vector<16x96xf32>
    %c312 = arith.constant 312 : index
    %c0_64 = arith.constant 0 : index
    %162 = vector.load %arg5[%c312, %c0_64] : memref<1848x384xf32, #tpu.memory_space<vmem>>, vector<1x96xf32>
    %163 = vector.broadcast %162 : vector<1x96xf32> to vector<16x96xf32>
    %164 = arith.addf %161, %163 : vector<16x96xf32>
    %cst_65 = arith.constant dense<0.000000e+00> : vector<16xf32>
    %165 = vector.multi_reduction <add>, %164, %cst_65 [1] : vector<16x96xf32> to vector<16xf32>
    %166 = vector.shape_cast %165 : vector<16xf32> to vector<16x1xf32>
    %cst_66 = arith.constant 9.600000e+01 : f32
    %167 = vector.broadcast %cst_66 : f32 to vector<16x1xf32>
    %168 = arith.divf %166, %167 : vector<16x1xf32>
    %169 = vector.broadcast %168 : vector<16x1xf32> to vector<16x96xf32>
    %170 = arith.subf %164, %169 : vector<16x96xf32>
    %171 = arith.mulf %170, %170 : vector<16x96xf32>
    %cst_67 = arith.constant dense<0.000000e+00> : vector<16xf32>
    %172 = vector.multi_reduction <add>, %171, %cst_67 [1] : vector<16x96xf32> to vector<16xf32>
    %173 = vector.shape_cast %172 : vector<16xf32> to vector<16x1xf32>
    %cst_68 = arith.constant 9.600000e+01 : f32
    %174 = vector.broadcast %cst_68 : f32 to vector<16x1xf32>
    %175 = arith.divf %173, %174 : vector<16x1xf32>
    %176 = vector.broadcast %168 : vector<16x1xf32> to vector<16x96xf32>
    %177 = arith.subf %164, %176 : vector<16x96xf32>
    %cst_69 = arith.constant 9.99999974E-6 : f32
    %178 = vector.broadcast %cst_69 : f32 to vector<16x1xf32>
    %179 = arith.addf %175, %178 : vector<16x1xf32>
    %180 = math.rsqrt %179 : vector<16x1xf32>
    %181 = vector.broadcast %180 : vector<16x1xf32> to vector<16x96xf32>
    %182 = arith.mulf %177, %181 : vector<16x96xf32>
    %c313 = arith.constant 313 : index
    %c0_70 = arith.constant 0 : index
    %183 = vector.load %arg5[%c313, %c0_70] : memref<1848x384xf32, #tpu.memory_space<vmem>>, vector<1x96xf32>
    %184 = vector.broadcast %183 : vector<1x96xf32> to vector<16x96xf32>
    %185 = arith.mulf %182, %184 : vector<16x96xf32>
    %c314 = arith.constant 314 : index
    %c0_71 = arith.constant 0 : index
    %186 = vector.load %arg5[%c314, %c0_71] : memref<1848x384xf32, #tpu.memory_space<vmem>>, vector<1x96xf32>
    %187 = vector.broadcast %186 : vector<1x96xf32> to vector<16x96xf32>
    %188 = arith.addf %185, %187 : vector<16x96xf32>
    %cst_72 = arith.constant 0.000000e+00 : f32
    %189 = vector.broadcast %cst_72 : f32 to vector<16x96xf32>
    %190 = arith.maximumf %188, %189 : vector<16x96xf32>
    %c320 = arith.constant 320 : index
    %c0_73 = arith.constant 0 : index
    %191 = vector.load %arg5[%c320, %c0_73] : memref<1848x384xf32, #tpu.memory_space<vmem>>, vector<96x192xf32>
    %cst_74 = arith.constant dense<0.000000e+00> : vector<16x192xf32>
    %192 = tpu.matmul %190, %191, %cst_74 {dimension_numbers = #tpu.dot_dimension_numbers<[1], [0], [0], [1], [0, 0, 1, 1], [], []>} : vector<16x96xf32>, vector<96x192xf32>, vector<16x192xf32> -> vector<16x192xf32>
    %c416 = arith.constant 416 : index
    %c0_75 = arith.constant 0 : index
    %193 = vector.load %arg5[%c416, %c0_75] : memref<1848x384xf32, #tpu.memory_space<vmem>>, vector<1x192xf32>
    %194 = vector.broadcast %193 : vector<1x192xf32> to vector<16x192xf32>
    %195 = arith.addf %192, %194 : vector<16x192xf32>
    %cst_76 = arith.constant dense<0.000000e+00> : vector<16xf32>
    %196 = vector.multi_reduction <add>, %195, %cst_76 [1] : vector<16x192xf32> to vector<16xf32>
    %197 = vector.shape_cast %196 : vector<16xf32> to vector<16x1xf32>
    %cst_77 = arith.constant 1.920000e+02 : f32
    %198 = vector.broadcast %cst_77 : f32 to vector<16x1xf32>
    %199 = arith.divf %197, %198 : vector<16x1xf32>
    %200 = vector.broadcast %199 : vector<16x1xf32> to vector<16x192xf32>
    %201 = arith.subf %195, %200 : vector<16x192xf32>
    %202 = arith.mulf %201, %201 : vector<16x192xf32>
    %cst_78 = arith.constant dense<0.000000e+00> : vector<16xf32>
    %203 = vector.multi_reduction <add>, %202, %cst_78 [1] : vector<16x192xf32> to vector<16xf32>
    %204 = vector.shape_cast %203 : vector<16xf32> to vector<16x1xf32>
    %cst_79 = arith.constant 1.920000e+02 : f32
    %205 = vector.broadcast %cst_79 : f32 to vector<16x1xf32>
    %206 = arith.divf %204, %205 : vector<16x1xf32>
    %207 = vector.broadcast %199 : vector<16x1xf32> to vector<16x192xf32>
    %208 = arith.subf %195, %207 : vector<16x192xf32>
    %cst_80 = arith.constant 9.99999974E-6 : f32
    %209 = vector.broadcast %cst_80 : f32 to vector<16x1xf32>
    %210 = arith.addf %206, %209 : vector<16x1xf32>
    %211 = math.rsqrt %210 : vector<16x1xf32>
    %212 = vector.broadcast %211 : vector<16x1xf32> to vector<16x192xf32>
    %213 = arith.mulf %208, %212 : vector<16x192xf32>
    %c417 = arith.constant 417 : index
    %c0_81 = arith.constant 0 : index
    %214 = vector.load %arg5[%c417, %c0_81] : memref<1848x384xf32, #tpu.memory_space<vmem>>, vector<1x192xf32>
    %215 = vector.broadcast %214 : vector<1x192xf32> to vector<16x192xf32>
    %216 = arith.mulf %213, %215 : vector<16x192xf32>
    %c418 = arith.constant 418 : index
    %c0_82 = arith.constant 0 : index
    %217 = vector.load %arg5[%c418, %c0_82] : memref<1848x384xf32, #tpu.memory_space<vmem>>, vector<1x192xf32>
    %218 = vector.broadcast %217 : vector<1x192xf32> to vector<16x192xf32>
    %219 = arith.addf %216, %218 : vector<16x192xf32>
    %cst_83 = arith.constant 0.000000e+00 : f32
    %220 = vector.broadcast %cst_83 : f32 to vector<16x192xf32>
    %221 = arith.maximumf %219, %220 : vector<16x192xf32>
    %222 = vector.extract_strided_slice %159 {offsets = [0, 0], sizes = [2, 32], strides = [1, 1]} : vector<2x192xf32> to vector<2x32xf32>
    %c0_84 = arith.constant 0 : index
    %c0_85 = arith.constant 0 : index
    %223 = vector.load %arg8[%c0_84, %c0_85] : memref<12x32xf32, #tpu.memory_space<vmem>>, vector<2x32xf32>
    tpu.vector_store %arg8[%c0_84, %c0_85], %222 {strides = array<i32>} : memref<12x32xf32, #tpu.memory_space<vmem>>, vector<2x32xf32>,
    %224 = vector.extract_strided_slice %159 {offsets = [0, 32], sizes = [2, 32], strides = [1, 1]} : vector<2x192xf32> to vector<2x32xf32>
    %c2 = arith.constant 2 : index
    %c0_86 = arith.constant 0 : index
    %225 = vector.load %arg8[%c2, %c0_86] : memref<12x32xf32, #tpu.memory_space<vmem>>, vector<2x32xf32>
    tpu.vector_store %arg8[%c2, %c0_86], %224 {strides = array<i32>} : memref<12x32xf32, #tpu.memory_space<vmem>>, vector<2x32xf32>,
    %226 = vector.extract_strided_slice %159 {offsets = [0, 64], sizes = [2, 32], strides = [1, 1]} : vector<2x192xf32> to vector<2x32xf32>
    %c4 = arith.constant 4 : index
    %c0_87 = arith.constant 0 : index
    %227 = vector.load %arg8[%c4, %c0_87] : memref<12x32xf32, #tpu.memory_space<vmem>>, vector<2x32xf32>
    tpu.vector_store %arg8[%c4, %c0_87], %226 {strides = array<i32>} : memref<12x32xf32, #tpu.memory_space<vmem>>, vector<2x32xf32>,
    %228 = vector.extract_strided_slice %159 {offsets = [0, 96], sizes = [2, 32], strides = [1, 1]} : vector<2x192xf32> to vector<2x32xf32>
    %c6 = arith.constant 6 : index
    %c0_88 = arith.constant 0 : index
    %229 = vector.load %arg8[%c6, %c0_88] : memref<12x32xf32, #tpu.memory_space<vmem>>, vector<2x32xf32>
    tpu.vector_store %arg8[%c6, %c0_88], %228 {strides = array<i32>} : memref<12x32xf32, #tpu.memory_space<vmem>>, vector<2x32xf32>,
    %230 = vector.extract_strided_slice %159 {offsets = [0, 128], sizes = [2, 32], strides = [1, 1]} : vector<2x192xf32> to vector<2x32xf32>
    %c8 = arith.constant 8 : index
    %c0_89 = arith.constant 0 : index
    %231 = vector.load %arg8[%c8, %c0_89] : memref<12x32xf32, #tpu.memory_space<vmem>>, vector<2x32xf32>
    tpu.vector_store %arg8[%c8, %c0_89], %230 {strides = array<i32>} : memref<12x32xf32, #tpu.memory_space<vmem>>, vector<2x32xf32>,
    %232 = vector.extract_strided_slice %159 {offsets = [0, 160], sizes = [2, 32], strides = [1, 1]} : vector<2x192xf32> to vector<2x32xf32>
    %c10 = arith.constant 10 : index
    %c0_90 = arith.constant 0 : index
    %233 = vector.load %arg8[%c10, %c0_90] : memref<12x32xf32, #tpu.memory_space<vmem>>, vector<2x32xf32>
    tpu.vector_store %arg8[%c10, %c0_90], %232 {strides = array<i32>} : memref<12x32xf32, #tpu.memory_space<vmem>>, vector<2x32xf32>,
    %c0_91 = arith.constant 0 : index
    %c0_92 = arith.constant 0 : index
    %234 = vector.load %arg8[%c0_91, %c0_92] : memref<12x32xf32, #tpu.memory_space<vmem>>, vector<12x32xf32>
    %c1832 = arith.constant 1832 : index
    %c0_93 = arith.constant 0 : index
    %235 = vector.load %arg5[%c1832, %c0_93] : memref<1848x384xf32, #tpu.memory_space<vmem>>, vector<12x12xf32>
    %c584 = arith.constant 584 : index
    %c0_94 = arith.constant 0 : index
    %236 = vector.load %arg5[%c584, %c0_94] : memref<1848x384xf32, #tpu.memory_space<vmem>>, vector<32x96xf32>
    %cst_95 = arith.constant dense<0.000000e+00> : vector<12x96xf32>
    %237 = tpu.matmul %234, %236, %cst_95 {dimension_numbers = #tpu.dot_dimension_numbers<[1], [0], [0], [1], [0, 0, 1, 1], [], []>} : vector<12x32xf32>, vector<32x96xf32>, vector<12x96xf32> -> vector<12x96xf32>
    %c616 = arith.constant 616 : index
    %c0_96 = arith.constant 0 : index
    %238 = vector.load %arg5[%c616, %c0_96] : memref<1848x384xf32, #tpu.memory_space<vmem>>, vector<1x96xf32>
    %239 = vector.broadcast %238 : vector<1x96xf32> to vector<12x96xf32>
    %240 = arith.addf %237, %239 : vector<12x96xf32>
    %241 = vector.extract_strided_slice %240 {offsets = [0, 0], sizes = [12, 8], strides = [1, 1]} : vector<12x96xf32> to vector<12x8xf32>
    %242 = vector.extract_strided_slice %240 {offsets = [0, 32], sizes = [12, 8], strides = [1, 1]} : vector<12x96xf32> to vector<12x8xf32>
    %243 = vector.extract_strided_slice %240 {offsets = [0, 64], sizes = [12, 8], strides = [1, 1]} : vector<12x96xf32> to vector<12x8xf32>
    %244 = tpu.transpose %242, [1, 0] : vector<12x8xf32> -> vector<8x12xf32>
    %cst_97 = arith.constant dense<0.000000e+00> : vector<12x12xf32>
    %245 = tpu.matmul %241, %244, %cst_97 {dimension_numbers = #tpu.dot_dimension_numbers<[1], [0], [0], [1], [0, 0, 1, 1], [], []>} : vector<12x8xf32>, vector<8x12xf32>, vector<12x12xf32> -> vector<12x12xf32>
    %cst_98 = arith.constant 0.353553385 : f32
    %246 = vector.broadcast %cst_98 : f32 to vector<12x12xf32>
    %247 = arith.mulf %245, %246 : vector<12x12xf32>
    %248 = arith.addf %247, %235 : vector<12x12xf32>
    %cst_99 = arith.constant dense<0xFF800000> : vector<12xf32>
    %249 = vector.multi_reduction <maximumf>, %248, %cst_99 [1] : vector<12x12xf32> to vector<12xf32>
    %250 = vector.shape_cast %249 : vector<12xf32> to vector<12x1xf32>
    %251 = vector.broadcast %250 : vector<12x1xf32> to vector<12x12xf32>
    %252 = arith.subf %248, %251 : vector<12x12xf32>
    %253 = math.exp %252 : vector<12x12xf32>
    %cst_100 = arith.constant dense<0.000000e+00> : vector<12xf32>
    %254 = vector.multi_reduction <add>, %253, %cst_100 [1] : vector<12x12xf32> to vector<12xf32>
    %255 = vector.shape_cast %254 : vector<12xf32> to vector<12x1xf32>
    %256 = tpu.reciprocal %255 {approx = true} : vector<12x1xf32> -> vector<12x1xf32>
    %257 = vector.broadcast %256 : vector<12x1xf32> to vector<12x12xf32>
    %258 = arith.mulf %253, %257 : vector<12x12xf32>
    %cst_101 = arith.constant dense<0.000000e+00> : vector<12x8xf32>
    %259 = tpu.matmul %258, %243, %cst_101 {dimension_numbers = #tpu.dot_dimension_numbers<[1], [0], [0], [1], [0, 0, 1, 1], [], []>} : vector<12x12xf32>, vector<12x8xf32>, vector<12x8xf32> -> vector<12x8xf32>
    %260 = vector.extract_strided_slice %240 {offsets = [0, 8], sizes = [12, 8], strides = [1, 1]} : vector<12x96xf32> to vector<12x8xf32>
    %261 = vector.extract_strided_slice %240 {offsets = [0, 40], sizes = [12, 8], strides = [1, 1]} : vector<12x96xf32> to vector<12x8xf32>
    %262 = vector.extract_strided_slice %240 {offsets = [0, 72], sizes = [12, 8], strides = [1, 1]} : vector<12x96xf32> to vector<12x8xf32>
    %263 = tpu.transpose %261, [1, 0] : vector<12x8xf32> -> vector<8x12xf32>
    %cst_102 = arith.constant dense<0.000000e+00> : vector<12x12xf32>
    %264 = tpu.matmul %260, %263, %cst_102 {dimension_numbers = #tpu.dot_dimension_numbers<[1], [0], [0], [1], [0, 0, 1, 1], [], []>} : vector<12x8xf32>, vector<8x12xf32>, vector<12x12xf32> -> vector<12x12xf32>
    %cst_103 = arith.constant 0.353553385 : f32
    %265 = vector.broadcast %cst_103 : f32 to vector<12x12xf32>
    %266 = arith.mulf %264, %265 : vector<12x12xf32>
    %267 = arith.addf %266, %235 : vector<12x12xf32>
    %cst_104 = arith.constant dense<0xFF800000> : vector<12xf32>
    %268 = vector.multi_reduction <maximumf>, %267, %cst_104 [1] : vector<12x12xf32> to vector<12xf32>
    %269 = vector.shape_cast %268 : vector<12xf32> to vector<12x1xf32>
    %270 = vector.broadcast %269 : vector<12x1xf32> to vector<12x12xf32>
    %271 = arith.subf %267, %270 : vector<12x12xf32>
    %272 = math.exp %271 : vector<12x12xf32>
    %cst_105 = arith.constant dense<0.000000e+00> : vector<12xf32>
    %273 = vector.multi_reduction <add>, %272, %cst_105 [1] : vector<12x12xf32> to vector<12xf32>
    %274 = vector.shape_cast %273 : vector<12xf32> to vector<12x1xf32>
    %275 = tpu.reciprocal %274 {approx = true} : vector<12x1xf32> -> vector<12x1xf32>
    %276 = vector.broadcast %275 : vector<12x1xf32> to vector<12x12xf32>
    %277 = arith.mulf %272, %276 : vector<12x12xf32>
    %cst_106 = arith.constant dense<0.000000e+00> : vector<12x8xf32>
    %278 = tpu.matmul %277, %262, %cst_106 {dimension_numbers = #tpu.dot_dimension_numbers<[1], [0], [0], [1], [0, 0, 1, 1], [], []>} : vector<12x12xf32>, vector<12x8xf32>, vector<12x8xf32> -> vector<12x8xf32>
    %279 = vector.extract_strided_slice %240 {offsets = [0, 16], sizes = [12, 8], strides = [1, 1]} : vector<12x96xf32> to vector<12x8xf32>
    %280 = vector.extract_strided_slice %240 {offsets = [0, 48], sizes = [12, 8], strides = [1, 1]} : vector<12x96xf32> to vector<12x8xf32>
    %281 = vector.extract_strided_slice %240 {offsets = [0, 80], sizes = [12, 8], strides = [1, 1]} : vector<12x96xf32> to vector<12x8xf32>
    %282 = tpu.transpose %280, [1, 0] : vector<12x8xf32> -> vector<8x12xf32>
    %cst_107 = arith.constant dense<0.000000e+00> : vector<12x12xf32>
    %283 = tpu.matmul %279, %282, %cst_107 {dimension_numbers = #tpu.dot_dimension_numbers<[1], [0], [0], [1], [0, 0, 1, 1], [], []>} : vector<12x8xf32>, vector<8x12xf32>, vector<12x12xf32> -> vector<12x12xf32>
    %cst_108 = arith.constant 0.353553385 : f32
    %284 = vector.broadcast %cst_108 : f32 to vector<12x12xf32>
    %285 = arith.mulf %283, %284 : vector<12x12xf32>
    %286 = arith.addf %285, %235 : vector<12x12xf32>
    %cst_109 = arith.constant dense<0xFF800000> : vector<12xf32>
    %287 = vector.multi_reduction <maximumf>, %286, %cst_109 [1] : vector<12x12xf32> to vector<12xf32>
    %288 = vector.shape_cast %287 : vector<12xf32> to vector<12x1xf32>
    %289 = vector.broadcast %288 : vector<12x1xf32> to vector<12x12xf32>
    %290 = arith.subf %286, %289 : vector<12x12xf32>
    %291 = math.exp %290 : vector<12x12xf32>
    %cst_110 = arith.constant dense<0.000000e+00> : vector<12xf32>
    %292 = vector.multi_reduction <add>, %291, %cst_110 [1] : vector<12x12xf32> to vector<12xf32>
    %293 = vector.shape_cast %292 : vector<12xf32> to vector<12x1xf32>
    %294 = tpu.reciprocal %293 {approx = true} : vector<12x1xf32> -> vector<12x1xf32>
    %295 = vector.broadcast %294 : vector<12x1xf32> to vector<12x12xf32>
    %296 = arith.mulf %291, %295 : vector<12x12xf32>
    %cst_111 = arith.constant dense<0.000000e+00> : vector<12x8xf32>
    %297 = tpu.matmul %296, %281, %cst_111 {dimension_numbers = #tpu.dot_dimension_numbers<[1], [0], [0], [1], [0, 0, 1, 1], [], []>} : vector<12x12xf32>, vector<12x8xf32>, vector<12x8xf32> -> vector<12x8xf32>
    %298 = vector.extract_strided_slice %240 {offsets = [0, 24], sizes = [12, 8], strides = [1, 1]} : vector<12x96xf32> to vector<12x8xf32>
    %299 = vector.extract_strided_slice %240 {offsets = [0, 56], sizes = [12, 8], strides = [1, 1]} : vector<12x96xf32> to vector<12x8xf32>
    %300 = vector.extract_strided_slice %240 {offsets = [0, 88], sizes = [12, 8], strides = [1, 1]} : vector<12x96xf32> to vector<12x8xf32>
    %301 = tpu.transpose %299, [1, 0] : vector<12x8xf32> -> vector<8x12xf32>
    %cst_112 = arith.constant dense<0.000000e+00> : vector<12x12xf32>
    %302 = tpu.matmul %298, %301, %cst_112 {dimension_numbers = #tpu.dot_dimension_numbers<[1], [0], [0], [1], [0, 0, 1, 1], [], []>} : vector<12x8xf32>, vector<8x12xf32>, vector<12x12xf32> -> vector<12x12xf32>
    %cst_113 = arith.constant 0.353553385 : f32
    %303 = vector.broadcast %cst_113 : f32 to vector<12x12xf32>
    %304 = arith.mulf %302, %303 : vector<12x12xf32>
    %305 = arith.addf %304, %235 : vector<12x12xf32>
    %cst_114 = arith.constant dense<0xFF800000> : vector<12xf32>
    %306 = vector.multi_reduction <maximumf>, %305, %cst_114 [1] : vector<12x12xf32> to vector<12xf32>
    %307 = vector.shape_cast %306 : vector<12xf32> to vector<12x1xf32>
    %308 = vector.broadcast %307 : vector<12x1xf32> to vector<12x12xf32>
    %309 = arith.subf %305, %308 : vector<12x12xf32>
    %310 = math.exp %309 : vector<12x12xf32>
    %cst_115 = arith.constant dense<0.000000e+00> : vector<12xf32>
    %311 = vector.multi_reduction <add>, %310, %cst_115 [1] : vector<12x12xf32> to vector<12xf32>
    %312 = vector.shape_cast %311 : vector<12xf32> to vector<12x1xf32>
    %313 = tpu.reciprocal %312 {approx = true} : vector<12x1xf32> -> vector<12x1xf32>
    %314 = vector.broadcast %313 : vector<12x1xf32> to vector<12x12xf32>
    %315 = arith.mulf %310, %314 : vector<12x12xf32>
    %cst_116 = arith.constant dense<0.000000e+00> : vector<12x8xf32>
    %316 = tpu.matmul %315, %300, %cst_116 {dimension_numbers = #tpu.dot_dimension_numbers<[1], [0], [0], [1], [0, 0, 1, 1], [], []>} : vector<12x12xf32>, vector<12x8xf32>, vector<12x8xf32> -> vector<12x8xf32>
    %317 = tpu.concatenate %259, %278, %297, %316 in 1 : vector<12x8xf32>, vector<12x8xf32>, vector<12x8xf32>, vector<12x8xf32> -> vector<12x32xf32>
    %c624 = arith.constant 624 : index
    %c0_117 = arith.constant 0 : index
    %318 = vector.load %arg5[%c624, %c0_117] : memref<1848x384xf32, #tpu.memory_space<vmem>>, vector<32x32xf32>
    %cst_118 = arith.constant dense<0.000000e+00> : vector<12x32xf32>
    %319 = tpu.matmul %317, %318, %cst_118 {dimension_numbers = #tpu.dot_dimension_numbers<[1], [0], [0], [1], [0, 0, 1, 1], [], []>} : vector<12x32xf32>, vector<32x32xf32>, vector<12x32xf32> -> vector<12x32xf32>
    %c656 = arith.constant 656 : index
    %c0_119 = arith.constant 0 : index
    %320 = vector.load %arg5[%c656, %c0_119] : memref<1848x384xf32, #tpu.memory_space<vmem>>, vector<1x32xf32>
    %321 = vector.broadcast %320 : vector<1x32xf32> to vector<12x32xf32>
    %322 = arith.addf %319, %321 : vector<12x32xf32>
    %323 = arith.addf %234, %322 : vector<12x32xf32>
    %cst_120 = arith.constant dense<0.000000e+00> : vector<12xf32>
    %324 = vector.multi_reduction <add>, %323, %cst_120 [1] : vector<12x32xf32> to vector<12xf32>
    %325 = vector.shape_cast %324 : vector<12xf32> to vector<12x1xf32>
    %cst_121 = arith.constant 3.200000e+01 : f32
    %326 = vector.broadcast %cst_121 : f32 to vector<12x1xf32>
    %327 = arith.divf %325, %326 : vector<12x1xf32>
    %328 = vector.broadcast %327 : vector<12x1xf32> to vector<12x32xf32>
    %329 = arith.subf %323, %328 : vector<12x32xf32>
    %330 = arith.mulf %329, %329 : vector<12x32xf32>
    %cst_122 = arith.constant dense<0.000000e+00> : vector<12xf32>
    %331 = vector.multi_reduction <add>, %330, %cst_122 [1] : vector<12x32xf32> to vector<12xf32>
    %332 = vector.shape_cast %331 : vector<12xf32> to vector<12x1xf32>
    %cst_123 = arith.constant 3.200000e+01 : f32
    %333 = vector.broadcast %cst_123 : f32 to vector<12x1xf32>
    %334 = arith.divf %332, %333 : vector<12x1xf32>
    %335 = vector.broadcast %327 : vector<12x1xf32> to vector<12x32xf32>
    %336 = arith.subf %323, %335 : vector<12x32xf32>
    %cst_124 = arith.constant 9.99999974E-6 : f32
    %337 = vector.broadcast %cst_124 : f32 to vector<12x1xf32>
    %338 = arith.addf %334, %337 : vector<12x1xf32>
    %339 = math.rsqrt %338 : vector<12x1xf32>
    %340 = vector.broadcast %339 : vector<12x1xf32> to vector<12x32xf32>
    %341 = arith.mulf %336, %340 : vector<12x32xf32>
    %c1089 = arith.constant 1089 : index
    %c0_125 = arith.constant 0 : index
    %342 = vector.load %arg5[%c1089, %c0_125] : memref<1848x384xf32, #tpu.memory_space<vmem>>, vector<1x32xf32>
    %343 = vector.broadcast %342 : vector<1x32xf32> to vector<12x32xf32>
    %344 = arith.mulf %341, %343 : vector<12x32xf32>
    %c1090 = arith.constant 1090 : index
    %c0_126 = arith.constant 0 : index
    %345 = vector.load %arg5[%c1090, %c0_126] : memref<1848x384xf32, #tpu.memory_space<vmem>>, vector<1x32xf32>
    %346 = vector.broadcast %345 : vector<1x32xf32> to vector<12x32xf32>
    %347 = arith.addf %344, %346 : vector<12x32xf32>
    %c664 = arith.constant 664 : index
    %c0_127 = arith.constant 0 : index
    %348 = vector.load %arg5[%c664, %c0_127] : memref<1848x384xf32, #tpu.memory_space<vmem>>, vector<32x384xf32>
    %cst_128 = arith.constant dense<0.000000e+00> : vector<12x384xf32>
    %349 = tpu.matmul %347, %348, %cst_128 {dimension_numbers = #tpu.dot_dimension_numbers<[1], [0], [0], [1], [0, 0, 1, 1], [], []>} : vector<12x32xf32>, vector<32x384xf32>, vector<12x384xf32> -> vector<12x384xf32>
    %c696 = arith.constant 696 : index
    %c0_129 = arith.constant 0 : index
    %350 = vector.load %arg5[%c696, %c0_129] : memref<1848x384xf32, #tpu.memory_space<vmem>>, vector<1x384xf32>
    %351 = vector.broadcast %350 : vector<1x384xf32> to vector<12x384xf32>
    %352 = arith.addf %349, %351 : vector<12x384xf32>
    %cst_130 = arith.constant 0.000000e+00 : f32
    %353 = vector.broadcast %cst_130 : f32 to vector<12x384xf32>
    %354 = arith.maximumf %352, %353 : vector<12x384xf32>
    %c704 = arith.constant 704 : index
    %c0_131 = arith.constant 0 : index
    %355 = vector.load %arg5[%c704, %c0_131] : memref<1848x384xf32, #tpu.memory_space<vmem>>, vector<384x32xf32>
    %cst_132 = arith.constant dense<0.000000e+00> : vector<12x32xf32>
    %356 = tpu.matmul %354, %355, %cst_132 {dimension_numbers = #tpu.dot_dimension_numbers<[1], [0], [0], [1], [0, 0, 1, 1], [], []>} : vector<12x384xf32>, vector<384x32xf32>, vector<12x32xf32> -> vector<12x32xf32>
    %c1088 = arith.constant 1088 : index
    %c0_133 = arith.constant 0 : index
    %357 = vector.load %arg5[%c1088, %c0_133] : memref<1848x384xf32, #tpu.memory_space<vmem>>, vector<1x32xf32>
    %358 = vector.broadcast %357 : vector<1x32xf32> to vector<12x32xf32>
    %359 = arith.addf %356, %358 : vector<12x32xf32>
    %360 = arith.addf %347, %359 : vector<12x32xf32>
    %cst_134 = arith.constant dense<0.000000e+00> : vector<12xf32>
    %361 = vector.multi_reduction <add>, %360, %cst_134 [1] : vector<12x32xf32> to vector<12xf32>
    %362 = vector.shape_cast %361 : vector<12xf32> to vector<12x1xf32>
    %cst_135 = arith.constant 3.200000e+01 : f32
    %363 = vector.broadcast %cst_135 : f32 to vector<12x1xf32>
    %364 = arith.divf %362, %363 : vector<12x1xf32>
    %365 = vector.broadcast %364 : vector<12x1xf32> to vector<12x32xf32>
    %366 = arith.subf %360, %365 : vector<12x32xf32>
    %367 = arith.mulf %366, %366 : vector<12x32xf32>
    %cst_136 = arith.constant dense<0.000000e+00> : vector<12xf32>
    %368 = vector.multi_reduction <add>, %367, %cst_136 [1] : vector<12x32xf32> to vector<12xf32>
    %369 = vector.shape_cast %368 : vector<12xf32> to vector<12x1xf32>
    %cst_137 = arith.constant 3.200000e+01 : f32
    %370 = vector.broadcast %cst_137 : f32 to vector<12x1xf32>
    %371 = arith.divf %369, %370 : vector<12x1xf32>
    %372 = vector.broadcast %364 : vector<12x1xf32> to vector<12x32xf32>
    %373 = arith.subf %360, %372 : vector<12x32xf32>
    %cst_138 = arith.constant 9.99999974E-6 : f32
    %374 = vector.broadcast %cst_138 : f32 to vector<12x1xf32>
    %375 = arith.addf %371, %374 : vector<12x1xf32>
    %376 = math.rsqrt %375 : vector<12x1xf32>
    %377 = vector.broadcast %376 : vector<12x1xf32> to vector<12x32xf32>
    %378 = arith.mulf %373, %377 : vector<12x32xf32>
    %c1091 = arith.constant 1091 : index
    %c0_139 = arith.constant 0 : index
    %379 = vector.load %arg5[%c1091, %c0_139] : memref<1848x384xf32, #tpu.memory_space<vmem>>, vector<1x32xf32>
    %380 = vector.broadcast %379 : vector<1x32xf32> to vector<12x32xf32>
    %381 = arith.mulf %378, %380 : vector<12x32xf32>
    %c1092 = arith.constant 1092 : index
    %c0_140 = arith.constant 0 : index
    %382 = vector.load %arg5[%c1092, %c0_140] : memref<1848x384xf32, #tpu.memory_space<vmem>>, vector<1x32xf32>
    %383 = vector.broadcast %382 : vector<1x32xf32> to vector<12x32xf32>
    %384 = arith.addf %381, %383 : vector<12x32xf32>
    %c1096 = arith.constant 1096 : index
    %c0_141 = arith.constant 0 : index
    %385 = vector.load %arg5[%c1096, %c0_141] : memref<1848x384xf32, #tpu.memory_space<vmem>>, vector<32x96xf32>
    %cst_142 = arith.constant dense<0.000000e+00> : vector<12x96xf32>
    %386 = tpu.matmul %384, %385, %cst_142 {dimension_numbers = #tpu.dot_dimension_numbers<[1], [0], [0], [1], [0, 0, 1, 1], [], []>} : vector<12x32xf32>, vector<32x96xf32>, vector<12x96xf32> -> vector<12x96xf32>
    %c1128 = arith.constant 1128 : index
    %c0_143 = arith.constant 0 : index
    %387 = vector.load %arg5[%c1128, %c0_143] : memref<1848x384xf32, #tpu.memory_space<vmem>>, vector<1x96xf32>
    %388 = vector.broadcast %387 : vector<1x96xf32> to vector<12x96xf32>
    %389 = arith.addf %386, %388 : vector<12x96xf32>
    %390 = vector.extract_strided_slice %389 {offsets = [0, 0], sizes = [12, 8], strides = [1, 1]} : vector<12x96xf32> to vector<12x8xf32>
    %391 = vector.extract_strided_slice %389 {offsets = [0, 32], sizes = [12, 8], strides = [1, 1]} : vector<12x96xf32> to vector<12x8xf32>
    %392 = vector.extract_strided_slice %389 {offsets = [0, 64], sizes = [12, 8], strides = [1, 1]} : vector<12x96xf32> to vector<12x8xf32>
    %393 = tpu.transpose %391, [1, 0] : vector<12x8xf32> -> vector<8x12xf32>
    %cst_144 = arith.constant dense<0.000000e+00> : vector<12x12xf32>
    %394 = tpu.matmul %390, %393, %cst_144 {dimension_numbers = #tpu.dot_dimension_numbers<[1], [0], [0], [1], [0, 0, 1, 1], [], []>} : vector<12x8xf32>, vector<8x12xf32>, vector<12x12xf32> -> vector<12x12xf32>
    %cst_145 = arith.constant 0.353553385 : f32
    %395 = vector.broadcast %cst_145 : f32 to vector<12x12xf32>
    %396 = arith.mulf %394, %395 : vector<12x12xf32>
    %397 = arith.addf %396, %235 : vector<12x12xf32>
    %cst_146 = arith.constant dense<0xFF800000> : vector<12xf32>
    %398 = vector.multi_reduction <maximumf>, %397, %cst_146 [1] : vector<12x12xf32> to vector<12xf32>
    %399 = vector.shape_cast %398 : vector<12xf32> to vector<12x1xf32>
    %400 = vector.broadcast %399 : vector<12x1xf32> to vector<12x12xf32>
    %401 = arith.subf %397, %400 : vector<12x12xf32>
    %402 = math.exp %401 : vector<12x12xf32>
    %cst_147 = arith.constant dense<0.000000e+00> : vector<12xf32>
    %403 = vector.multi_reduction <add>, %402, %cst_147 [1] : vector<12x12xf32> to vector<12xf32>
    %404 = vector.shape_cast %403 : vector<12xf32> to vector<12x1xf32>
    %405 = tpu.reciprocal %404 {approx = true} : vector<12x1xf32> -> vector<12x1xf32>
    %406 = vector.broadcast %405 : vector<12x1xf32> to vector<12x12xf32>
    %407 = arith.mulf %402, %406 : vector<12x12xf32>
    %cst_148 = arith.constant dense<0.000000e+00> : vector<12x8xf32>
    %408 = tpu.matmul %407, %392, %cst_148 {dimension_numbers = #tpu.dot_dimension_numbers<[1], [0], [0], [1], [0, 0, 1, 1], [], []>} : vector<12x12xf32>, vector<12x8xf32>, vector<12x8xf32> -> vector<12x8xf32>
    %409 = vector.extract_strided_slice %389 {offsets = [0, 8], sizes = [12, 8], strides = [1, 1]} : vector<12x96xf32> to vector<12x8xf32>
    %410 = vector.extract_strided_slice %389 {offsets = [0, 40], sizes = [12, 8], strides = [1, 1]} : vector<12x96xf32> to vector<12x8xf32>
    %411 = vector.extract_strided_slice %389 {offsets = [0, 72], sizes = [12, 8], strides = [1, 1]} : vector<12x96xf32> to vector<12x8xf32>
    %412 = tpu.transpose %410, [1, 0] : vector<12x8xf32> -> vector<8x12xf32>
    %cst_149 = arith.constant dense<0.000000e+00> : vector<12x12xf32>
    %413 = tpu.matmul %409, %412, %cst_149 {dimension_numbers = #tpu.dot_dimension_numbers<[1], [0], [0], [1], [0, 0, 1, 1], [], []>} : vector<12x8xf32>, vector<8x12xf32>, vector<12x12xf32> -> vector<12x12xf32>
    %cst_150 = arith.constant 0.353553385 : f32
    %414 = vector.broadcast %cst_150 : f32 to vector<12x12xf32>
    %415 = arith.mulf %413, %414 : vector<12x12xf32>
    %416 = arith.addf %415, %235 : vector<12x12xf32>
    %cst_151 = arith.constant dense<0xFF800000> : vector<12xf32>
    %417 = vector.multi_reduction <maximumf>, %416, %cst_151 [1] : vector<12x12xf32> to vector<12xf32>
    %418 = vector.shape_cast %417 : vector<12xf32> to vector<12x1xf32>
    %419 = vector.broadcast %418 : vector<12x1xf32> to vector<12x12xf32>
    %420 = arith.subf %416, %419 : vector<12x12xf32>
    %421 = math.exp %420 : vector<12x12xf32>
    %cst_152 = arith.constant dense<0.000000e+00> : vector<12xf32>
    %422 = vector.multi_reduction <add>, %421, %cst_152 [1] : vector<12x12xf32> to vector<12xf32>
    %423 = vector.shape_cast %422 : vector<12xf32> to vector<12x1xf32>
    %424 = tpu.reciprocal %423 {approx = true} : vector<12x1xf32> -> vector<12x1xf32>
    %425 = vector.broadcast %424 : vector<12x1xf32> to vector<12x12xf32>
    %426 = arith.mulf %421, %425 : vector<12x12xf32>
    %cst_153 = arith.constant dense<0.000000e+00> : vector<12x8xf32>
    %427 = tpu.matmul %426, %411, %cst_153 {dimension_numbers = #tpu.dot_dimension_numbers<[1], [0], [0], [1], [0, 0, 1, 1], [], []>} : vector<12x12xf32>, vector<12x8xf32>, vector<12x8xf32> -> vector<12x8xf32>
    %428 = vector.extract_strided_slice %389 {offsets = [0, 16], sizes = [12, 8], strides = [1, 1]} : vector<12x96xf32> to vector<12x8xf32>
    %429 = vector.extract_strided_slice %389 {offsets = [0, 48], sizes = [12, 8], strides = [1, 1]} : vector<12x96xf32> to vector<12x8xf32>
    %430 = vector.extract_strided_slice %389 {offsets = [0, 80], sizes = [12, 8], strides = [1, 1]} : vector<12x96xf32> to vector<12x8xf32>
    %431 = tpu.transpose %429, [1, 0] : vector<12x8xf32> -> vector<8x12xf32>
    %cst_154 = arith.constant dense<0.000000e+00> : vector<12x12xf32>
    %432 = tpu.matmul %428, %431, %cst_154 {dimension_numbers = #tpu.dot_dimension_numbers<[1], [0], [0], [1], [0, 0, 1, 1], [], []>} : vector<12x8xf32>, vector<8x12xf32>, vector<12x12xf32> -> vector<12x12xf32>
    %cst_155 = arith.constant 0.353553385 : f32
    %433 = vector.broadcast %cst_155 : f32 to vector<12x12xf32>
    %434 = arith.mulf %432, %433 : vector<12x12xf32>
    %435 = arith.addf %434, %235 : vector<12x12xf32>
    %cst_156 = arith.constant dense<0xFF800000> : vector<12xf32>
    %436 = vector.multi_reduction <maximumf>, %435, %cst_156 [1] : vector<12x12xf32> to vector<12xf32>
    %437 = vector.shape_cast %436 : vector<12xf32> to vector<12x1xf32>
    %438 = vector.broadcast %437 : vector<12x1xf32> to vector<12x12xf32>
    %439 = arith.subf %435, %438 : vector<12x12xf32>
    %440 = math.exp %439 : vector<12x12xf32>
    %cst_157 = arith.constant dense<0.000000e+00> : vector<12xf32>
    %441 = vector.multi_reduction <add>, %440, %cst_157 [1] : vector<12x12xf32> to vector<12xf32>
    %442 = vector.shape_cast %441 : vector<12xf32> to vector<12x1xf32>
    %443 = tpu.reciprocal %442 {approx = true} : vector<12x1xf32> -> vector<12x1xf32>
    %444 = vector.broadcast %443 : vector<12x1xf32> to vector<12x12xf32>
    %445 = arith.mulf %440, %444 : vector<12x12xf32>
    %cst_158 = arith.constant dense<0.000000e+00> : vector<12x8xf32>
    %446 = tpu.matmul %445, %430, %cst_158 {dimension_numbers = #tpu.dot_dimension_numbers<[1], [0], [0], [1], [0, 0, 1, 1], [], []>} : vector<12x12xf32>, vector<12x8xf32>, vector<12x8xf32> -> vector<12x8xf32>
    %447 = vector.extract_strided_slice %389 {offsets = [0, 24], sizes = [12, 8], strides = [1, 1]} : vector<12x96xf32> to vector<12x8xf32>
    %448 = vector.extract_strided_slice %389 {offsets = [0, 56], sizes = [12, 8], strides = [1, 1]} : vector<12x96xf32> to vector<12x8xf32>
    %449 = vector.extract_strided_slice %389 {offsets = [0, 88], sizes = [12, 8], strides = [1, 1]} : vector<12x96xf32> to vector<12x8xf32>
    %450 = tpu.transpose %448, [1, 0] : vector<12x8xf32> -> vector<8x12xf32>
    %cst_159 = arith.constant dense<0.000000e+00> : vector<12x12xf32>
    %451 = tpu.matmul %447, %450, %cst_159 {dimension_numbers = #tpu.dot_dimension_numbers<[1], [0], [0], [1], [0, 0, 1, 1], [], []>} : vector<12x8xf32>, vector<8x12xf32>, vector<12x12xf32> -> vector<12x12xf32>
    %cst_160 = arith.constant 0.353553385 : f32
    %452 = vector.broadcast %cst_160 : f32 to vector<12x12xf32>
    %453 = arith.mulf %451, %452 : vector<12x12xf32>
    %454 = arith.addf %453, %235 : vector<12x12xf32>
    %cst_161 = arith.constant dense<0xFF800000> : vector<12xf32>
    %455 = vector.multi_reduction <maximumf>, %454, %cst_161 [1] : vector<12x12xf32> to vector<12xf32>
    %456 = vector.shape_cast %455 : vector<12xf32> to vector<12x1xf32>
    %457 = vector.broadcast %456 : vector<12x1xf32> to vector<12x12xf32>
    %458 = arith.subf %454, %457 : vector<12x12xf32>
    %459 = math.exp %458 : vector<12x12xf32>
    %cst_162 = arith.constant dense<0.000000e+00> : vector<12xf32>
    %460 = vector.multi_reduction <add>, %459, %cst_162 [1] : vector<12x12xf32> to vector<12xf32>
    %461 = vector.shape_cast %460 : vector<12xf32> to vector<12x1xf32>
    %462 = tpu.reciprocal %461 {approx = true} : vector<12x1xf32> -> vector<12x1xf32>
    %463 = vector.broadcast %462 : vector<12x1xf32> to vector<12x12xf32>
    %464 = arith.mulf %459, %463 : vector<12x12xf32>
    %cst_163 = arith.constant dense<0.000000e+00> : vector<12x8xf32>
    %465 = tpu.matmul %464, %449, %cst_163 {dimension_numbers = #tpu.dot_dimension_numbers<[1], [0], [0], [1], [0, 0, 1, 1], [], []>} : vector<12x12xf32>, vector<12x8xf32>, vector<12x8xf32> -> vector<12x8xf32>
    %466 = tpu.concatenate %408, %427, %446, %465 in 1 : vector<12x8xf32>, vector<12x8xf32>, vector<12x8xf32>, vector<12x8xf32> -> vector<12x32xf32>
    %c1136 = arith.constant 1136 : index
    %c0_164 = arith.constant 0 : index
    %467 = vector.load %arg5[%c1136, %c0_164] : memref<1848x384xf32, #tpu.memory_space<vmem>>, vector<32x32xf32>
    %cst_165 = arith.constant dense<0.000000e+00> : vector<12x32xf32>
    %468 = tpu.matmul %466, %467, %cst_165 {dimension_numbers = #tpu.dot_dimension_numbers<[1], [0], [0], [1], [0, 0, 1, 1], [], []>} : vector<12x32xf32>, vector<32x32xf32>, vector<12x32xf32> -> vector<12x32xf32>
    %c1168 = arith.constant 1168 : index
    %c0_166 = arith.constant 0 : index
    %469 = vector.load %arg5[%c1168, %c0_166] : memref<1848x384xf32, #tpu.memory_space<vmem>>, vector<1x32xf32>
    %470 = vector.broadcast %469 : vector<1x32xf32> to vector<12x32xf32>
    %471 = arith.addf %468, %470 : vector<12x32xf32>
    %472 = arith.addf %384, %471 : vector<12x32xf32>
    %cst_167 = arith.constant dense<0.000000e+00> : vector<12xf32>
    %473 = vector.multi_reduction <add>, %472, %cst_167 [1] : vector<12x32xf32> to vector<12xf32>
    %474 = vector.shape_cast %473 : vector<12xf32> to vector<12x1xf32>
    %cst_168 = arith.constant 3.200000e+01 : f32
    %475 = vector.broadcast %cst_168 : f32 to vector<12x1xf32>
    %476 = arith.divf %474, %475 : vector<12x1xf32>
    %477 = vector.broadcast %476 : vector<12x1xf32> to vector<12x32xf32>
    %478 = arith.subf %472, %477 : vector<12x32xf32>
    %479 = arith.mulf %478, %478 : vector<12x32xf32>
    %cst_169 = arith.constant dense<0.000000e+00> : vector<12xf32>
    %480 = vector.multi_reduction <add>, %479, %cst_169 [1] : vector<12x32xf32> to vector<12xf32>
    %481 = vector.shape_cast %480 : vector<12xf32> to vector<12x1xf32>
    %cst_170 = arith.constant 3.200000e+01 : f32
    %482 = vector.broadcast %cst_170 : f32 to vector<12x1xf32>
    %483 = arith.divf %481, %482 : vector<12x1xf32>
    %484 = vector.broadcast %476 : vector<12x1xf32> to vector<12x32xf32>
    %485 = arith.subf %472, %484 : vector<12x32xf32>
    %cst_171 = arith.constant 9.99999974E-6 : f32
    %486 = vector.broadcast %cst_171 : f32 to vector<12x1xf32>
    %487 = arith.addf %483, %486 : vector<12x1xf32>
    %488 = math.rsqrt %487 : vector<12x1xf32>
    %489 = vector.broadcast %488 : vector<12x1xf32> to vector<12x32xf32>
    %490 = arith.mulf %485, %489 : vector<12x32xf32>
    %c1601 = arith.constant 1601 : index
    %c0_172 = arith.constant 0 : index
    %491 = vector.load %arg5[%c1601, %c0_172] : memref<1848x384xf32, #tpu.memory_space<vmem>>, vector<1x32xf32>
    %492 = vector.broadcast %491 : vector<1x32xf32> to vector<12x32xf32>
    %493 = arith.mulf %490, %492 : vector<12x32xf32>
    %c1602 = arith.constant 1602 : index
    %c0_173 = arith.constant 0 : index
    %494 = vector.load %arg5[%c1602, %c0_173] : memref<1848x384xf32, #tpu.memory_space<vmem>>, vector<1x32xf32>
    %495 = vector.broadcast %494 : vector<1x32xf32> to vector<12x32xf32>
    %496 = arith.addf %493, %495 : vector<12x32xf32>
    %c1176 = arith.constant 1176 : index
    %c0_174 = arith.constant 0 : index
    %497 = vector.load %arg5[%c1176, %c0_174] : memref<1848x384xf32, #tpu.memory_space<vmem>>, vector<32x384xf32>
    %cst_175 = arith.constant dense<0.000000e+00> : vector<12x384xf32>
    %498 = tpu.matmul %496, %497, %cst_175 {dimension_numbers = #tpu.dot_dimension_numbers<[1], [0], [0], [1], [0, 0, 1, 1], [], []>} : vector<12x32xf32>, vector<32x384xf32>, vector<12x384xf32> -> vector<12x384xf32>
    %c1208 = arith.constant 1208 : index
    %c0_176 = arith.constant 0 : index
    %499 = vector.load %arg5[%c1208, %c0_176] : memref<1848x384xf32, #tpu.memory_space<vmem>>, vector<1x384xf32>
    %500 = vector.broadcast %499 : vector<1x384xf32> to vector<12x384xf32>
    %501 = arith.addf %498, %500 : vector<12x384xf32>
    %cst_177 = arith.constant 0.000000e+00 : f32
    %502 = vector.broadcast %cst_177 : f32 to vector<12x384xf32>
    %503 = arith.maximumf %501, %502 : vector<12x384xf32>
    %c1216 = arith.constant 1216 : index
    %c0_178 = arith.constant 0 : index
    %504 = vector.load %arg5[%c1216, %c0_178] : memref<1848x384xf32, #tpu.memory_space<vmem>>, vector<384x32xf32>
    %cst_179 = arith.constant dense<0.000000e+00> : vector<12x32xf32>
    %505 = tpu.matmul %503, %504, %cst_179 {dimension_numbers = #tpu.dot_dimension_numbers<[1], [0], [0], [1], [0, 0, 1, 1], [], []>} : vector<12x384xf32>, vector<384x32xf32>, vector<12x32xf32> -> vector<12x32xf32>
    %c1600 = arith.constant 1600 : index
    %c0_180 = arith.constant 0 : index
    %506 = vector.load %arg5[%c1600, %c0_180] : memref<1848x384xf32, #tpu.memory_space<vmem>>, vector<1x32xf32>
    %507 = vector.broadcast %506 : vector<1x32xf32> to vector<12x32xf32>
    %508 = arith.addf %505, %507 : vector<12x32xf32>
    %509 = arith.addf %496, %508 : vector<12x32xf32>
    %cst_181 = arith.constant dense<0.000000e+00> : vector<12xf32>
    %510 = vector.multi_reduction <add>, %509, %cst_181 [1] : vector<12x32xf32> to vector<12xf32>
    %511 = vector.shape_cast %510 : vector<12xf32> to vector<12x1xf32>
    %cst_182 = arith.constant 3.200000e+01 : f32
    %512 = vector.broadcast %cst_182 : f32 to vector<12x1xf32>
    %513 = arith.divf %511, %512 : vector<12x1xf32>
    %514 = vector.broadcast %513 : vector<12x1xf32> to vector<12x32xf32>
    %515 = arith.subf %509, %514 : vector<12x32xf32>
    %516 = arith.mulf %515, %515 : vector<12x32xf32>
    %cst_183 = arith.constant dense<0.000000e+00> : vector<12xf32>
    %517 = vector.multi_reduction <add>, %516, %cst_183 [1] : vector<12x32xf32> to vector<12xf32>
    %518 = vector.shape_cast %517 : vector<12xf32> to vector<12x1xf32>
    %cst_184 = arith.constant 3.200000e+01 : f32
    %519 = vector.broadcast %cst_184 : f32 to vector<12x1xf32>
    %520 = arith.divf %518, %519 : vector<12x1xf32>
    %521 = vector.broadcast %513 : vector<12x1xf32> to vector<12x32xf32>
    %522 = arith.subf %509, %521 : vector<12x32xf32>
    %cst_185 = arith.constant 9.99999974E-6 : f32
    %523 = vector.broadcast %cst_185 : f32 to vector<12x1xf32>
    %524 = arith.addf %520, %523 : vector<12x1xf32>
    %525 = math.rsqrt %524 : vector<12x1xf32>
    %526 = vector.broadcast %525 : vector<12x1xf32> to vector<12x32xf32>
    %527 = arith.mulf %522, %526 : vector<12x32xf32>
    %c1603 = arith.constant 1603 : index
    %c0_186 = arith.constant 0 : index
    %528 = vector.load %arg5[%c1603, %c0_186] : memref<1848x384xf32, #tpu.memory_space<vmem>>, vector<1x32xf32>
    %529 = vector.broadcast %528 : vector<1x32xf32> to vector<12x32xf32>
    %530 = arith.mulf %527, %529 : vector<12x32xf32>
    %c1604 = arith.constant 1604 : index
    %c0_187 = arith.constant 0 : index
    %531 = vector.load %arg5[%c1604, %c0_187] : memref<1848x384xf32, #tpu.memory_space<vmem>>, vector<1x32xf32>
    %532 = vector.broadcast %531 : vector<1x32xf32> to vector<12x32xf32>
    %533 = arith.addf %530, %532 : vector<12x32xf32>
    %c424 = arith.constant 424 : index
    %c0_188 = arith.constant 0 : index
    %534 = vector.load %arg5[%c424, %c0_188] : memref<1848x384xf32, #tpu.memory_space<vmem>>, vector<32x32xf32>
    %cst_189 = arith.constant dense<0.000000e+00> : vector<12x32xf32>
    %535 = tpu.matmul %533, %534, %cst_189 {dimension_numbers = #tpu.dot_dimension_numbers<[1], [0], [0], [1], [0, 0, 1, 1], [], []>} : vector<12x32xf32>, vector<32x32xf32>, vector<12x32xf32> -> vector<12x32xf32>
    %c456 = arith.constant 456 : index
    %c0_190 = arith.constant 0 : index
    %536 = vector.load %arg5[%c456, %c0_190] : memref<1848x384xf32, #tpu.memory_space<vmem>>, vector<1x32xf32>
    %537 = vector.broadcast %536 : vector<1x32xf32> to vector<12x32xf32>
    %538 = arith.addf %535, %537 : vector<12x32xf32>
    %cst_191 = arith.constant dense<0.000000e+00> : vector<12xf32>
    %539 = vector.multi_reduction <add>, %538, %cst_191 [1] : vector<12x32xf32> to vector<12xf32>
    %540 = vector.shape_cast %539 : vector<12xf32> to vector<12x1xf32>
    %cst_192 = arith.constant 3.200000e+01 : f32
    %541 = vector.broadcast %cst_192 : f32 to vector<12x1xf32>
    %542 = arith.divf %540, %541 : vector<12x1xf32>
    %543 = vector.broadcast %542 : vector<12x1xf32> to vector<12x32xf32>
    %544 = arith.subf %538, %543 : vector<12x32xf32>
    %545 = arith.mulf %544, %544 : vector<12x32xf32>
    %cst_193 = arith.constant dense<0.000000e+00> : vector<12xf32>
    %546 = vector.multi_reduction <add>, %545, %cst_193 [1] : vector<12x32xf32> to vector<12xf32>
    %547 = vector.shape_cast %546 : vector<12xf32> to vector<12x1xf32>
    %cst_194 = arith.constant 3.200000e+01 : f32
    %548 = vector.broadcast %cst_194 : f32 to vector<12x1xf32>
    %549 = arith.divf %547, %548 : vector<12x1xf32>
    %550 = vector.broadcast %542 : vector<12x1xf32> to vector<12x32xf32>
    %551 = arith.subf %538, %550 : vector<12x32xf32>
    %cst_195 = arith.constant 9.99999974E-6 : f32
    %552 = vector.broadcast %cst_195 : f32 to vector<12x1xf32>
    %553 = arith.addf %549, %552 : vector<12x1xf32>
    %554 = math.rsqrt %553 : vector<12x1xf32>
    %555 = vector.broadcast %554 : vector<12x1xf32> to vector<12x32xf32>
    %556 = arith.mulf %551, %555 : vector<12x32xf32>
    %c457 = arith.constant 457 : index
    %c0_196 = arith.constant 0 : index
    %557 = vector.load %arg5[%c457, %c0_196] : memref<1848x384xf32, #tpu.memory_space<vmem>>, vector<1x32xf32>
    %558 = vector.broadcast %557 : vector<1x32xf32> to vector<12x32xf32>
    %559 = arith.mulf %556, %558 : vector<12x32xf32>
    %c458 = arith.constant 458 : index
    %c0_197 = arith.constant 0 : index
    %560 = vector.load %arg5[%c458, %c0_197] : memref<1848x384xf32, #tpu.memory_space<vmem>>, vector<1x32xf32>
    %561 = vector.broadcast %560 : vector<1x32xf32> to vector<12x32xf32>
    %562 = arith.addf %559, %561 : vector<12x32xf32>
    %cst_198 = arith.constant 0.000000e+00 : f32
    %563 = vector.broadcast %cst_198 : f32 to vector<12x32xf32>
    %564 = arith.maximumf %562, %563 : vector<12x32xf32>
    %c464 = arith.constant 464 : index
    %c0_199 = arith.constant 0 : index
    %565 = vector.load %arg5[%c464, %c0_199] : memref<1848x384xf32, #tpu.memory_space<vmem>>, vector<32x32xf32>
    %cst_200 = arith.constant dense<0.000000e+00> : vector<12x32xf32>
    %566 = tpu.matmul %564, %565, %cst_200 {dimension_numbers = #tpu.dot_dimension_numbers<[1], [0], [0], [1], [0, 0, 1, 1], [], []>} : vector<12x32xf32>, vector<32x32xf32>, vector<12x32xf32> -> vector<12x32xf32>
    %c496 = arith.constant 496 : index
    %c0_201 = arith.constant 0 : index
    %567 = vector.load %arg5[%c496, %c0_201] : memref<1848x384xf32, #tpu.memory_space<vmem>>, vector<1x32xf32>
    %568 = vector.broadcast %567 : vector<1x32xf32> to vector<12x32xf32>
    %569 = arith.addf %566, %568 : vector<12x32xf32>
    %cst_202 = arith.constant dense<0.000000e+00> : vector<12xf32>
    %570 = vector.multi_reduction <add>, %569, %cst_202 [1] : vector<12x32xf32> to vector<12xf32>
    %571 = vector.shape_cast %570 : vector<12xf32> to vector<12x1xf32>
    %cst_203 = arith.constant 3.200000e+01 : f32
    %572 = vector.broadcast %cst_203 : f32 to vector<12x1xf32>
    %573 = arith.divf %571, %572 : vector<12x1xf32>
    %574 = vector.broadcast %573 : vector<12x1xf32> to vector<12x32xf32>
    %575 = arith.subf %569, %574 : vector<12x32xf32>
    %576 = arith.mulf %575, %575 : vector<12x32xf32>
    %cst_204 = arith.constant dense<0.000000e+00> : vector<12xf32>
    %577 = vector.multi_reduction <add>, %576, %cst_204 [1] : vector<12x32xf32> to vector<12xf32>
    %578 = vector.shape_cast %577 : vector<12xf32> to vector<12x1xf32>
    %cst_205 = arith.constant 3.200000e+01 : f32
    %579 = vector.broadcast %cst_205 : f32 to vector<12x1xf32>
    %580 = arith.divf %578, %579 : vector<12x1xf32>
    %581 = vector.broadcast %573 : vector<12x1xf32> to vector<12x32xf32>
    %582 = arith.subf %569, %581 : vector<12x32xf32>
    %cst_206 = arith.constant 9.99999974E-6 : f32
    %583 = vector.broadcast %cst_206 : f32 to vector<12x1xf32>
    %584 = arith.addf %580, %583 : vector<12x1xf32>
    %585 = math.rsqrt %584 : vector<12x1xf32>
    %586 = vector.broadcast %585 : vector<12x1xf32> to vector<12x32xf32>
    %587 = arith.mulf %582, %586 : vector<12x32xf32>
    %c497 = arith.constant 497 : index
    %c0_207 = arith.constant 0 : index
    %588 = vector.load %arg5[%c497, %c0_207] : memref<1848x384xf32, #tpu.memory_space<vmem>>, vector<1x32xf32>
    %589 = vector.broadcast %588 : vector<1x32xf32> to vector<12x32xf32>
    %590 = arith.mulf %587, %589 : vector<12x32xf32>
    %c498 = arith.constant 498 : index
    %c0_208 = arith.constant 0 : index
    %591 = vector.load %arg5[%c498, %c0_208] : memref<1848x384xf32, #tpu.memory_space<vmem>>, vector<1x32xf32>
    %592 = vector.broadcast %591 : vector<1x32xf32> to vector<12x32xf32>
    %593 = arith.addf %590, %592 : vector<12x32xf32>
    %cst_209 = arith.constant 0.000000e+00 : f32
    %594 = vector.broadcast %cst_209 : f32 to vector<12x32xf32>
    %595 = arith.maximumf %593, %594 : vector<12x32xf32>
    %c1608 = arith.constant 1608 : index
    %c0_210 = arith.constant 0 : index
    %596 = vector.load %arg5[%c1608, %c0_210] : memref<1848x384xf32, #tpu.memory_space<vmem>>, vector<32x1xf32>
    %cst_211 = arith.constant dense<0.000000e+00> : vector<12x1xf32>
    %597 = tpu.matmul %595, %596, %cst_211 {dimension_numbers = #tpu.dot_dimension_numbers<[1], [0], [0], [1], [0, 0, 1, 1], [], []>} : vector<12x32xf32>, vector<32x1xf32>, vector<12x1xf32> -> vector<12x1xf32>
    %c1640 = arith.constant 1640 : index
    %c0_212 = arith.constant 0 : index
    %598 = vector.load %arg5[%c1640, %c0_212] : memref<1848x384xf32, #tpu.memory_space<vmem>>, vector<1x1xf32>
    %599 = vector.broadcast %598 : vector<1x1xf32> to vector<12x1xf32>
    %600 = arith.addf %597, %599 : vector<12x1xf32>
    %c0_213 = arith.constant 0 : index
    %c0_214 = arith.constant 0 : index
    %601 = vector.load %arg6[%c0_213, %c0_214] : memref<12x1xf32, #tpu.memory_space<vmem>>, vector<12x1xf32>
    tpu.vector_store %arg6[%c0_213, %c0_214], %600 {strides = array<i32>} : memref<12x1xf32, #tpu.memory_space<vmem>>, vector<12x1xf32>,
    %602 = vector.extract_strided_slice %221 {offsets = [0, 0], sizes = [16, 32], strides = [1, 1]} : vector<16x192xf32> to vector<16x32xf32>
    %c0_215 = arith.constant 0 : index
    %c0_216 = arith.constant 0 : index
    %603 = vector.load %arg9[%c0_215, %c0_216] : memref<96x32xf32, #tpu.memory_space<vmem>>, vector<16x32xf32>
    tpu.vector_store %arg9[%c0_215, %c0_216], %602 {strides = array<i32>} : memref<96x32xf32, #tpu.memory_space<vmem>>, vector<16x32xf32>,
    %604 = vector.extract_strided_slice %221 {offsets = [0, 32], sizes = [16, 32], strides = [1, 1]} : vector<16x192xf32> to vector<16x32xf32>
    %c16 = arith.constant 16 : index
    %c0_217 = arith.constant 0 : index
    %605 = vector.load %arg9[%c16, %c0_217] : memref<96x32xf32, #tpu.memory_space<vmem>>, vector<16x32xf32>
    tpu.vector_store %arg9[%c16, %c0_217], %604 {strides = array<i32>} : memref<96x32xf32, #tpu.memory_space<vmem>>, vector<16x32xf32>,
    %606 = vector.extract_strided_slice %221 {offsets = [0, 64], sizes = [16, 32], strides = [1, 1]} : vector<16x192xf32> to vector<16x32xf32>
    %c32 = arith.constant 32 : index
    %c0_218 = arith.constant 0 : index
    %607 = vector.load %arg9[%c32, %c0_218] : memref<96x32xf32, #tpu.memory_space<vmem>>, vector<16x32xf32>
    tpu.vector_store %arg9[%c32, %c0_218], %606 {strides = array<i32>} : memref<96x32xf32, #tpu.memory_space<vmem>>, vector<16x32xf32>,
    %608 = vector.extract_strided_slice %221 {offsets = [0, 96], sizes = [16, 32], strides = [1, 1]} : vector<16x192xf32> to vector<16x32xf32>
    %c48 = arith.constant 48 : index
    %c0_219 = arith.constant 0 : index
    %609 = vector.load %arg9[%c48, %c0_219] : memref<96x32xf32, #tpu.memory_space<vmem>>, vector<16x32xf32>
    tpu.vector_store %arg9[%c48, %c0_219], %608 {strides = array<i32>} : memref<96x32xf32, #tpu.memory_space<vmem>>, vector<16x32xf32>,
    %610 = vector.extract_strided_slice %221 {offsets = [0, 128], sizes = [16, 32], strides = [1, 1]} : vector<16x192xf32> to vector<16x32xf32>
    %c64 = arith.constant 64 : index
    %c0_220 = arith.constant 0 : index
    %611 = vector.load %arg9[%c64, %c0_220] : memref<96x32xf32, #tpu.memory_space<vmem>>, vector<16x32xf32>
    tpu.vector_store %arg9[%c64, %c0_220], %610 {strides = array<i32>} : memref<96x32xf32, #tpu.memory_space<vmem>>, vector<16x32xf32>,
    %612 = vector.extract_strided_slice %221 {offsets = [0, 160], sizes = [16, 32], strides = [1, 1]} : vector<16x192xf32> to vector<16x32xf32>
    %c80 = arith.constant 80 : index
    %c0_221 = arith.constant 0 : index
    %613 = vector.load %arg9[%c80, %c0_221] : memref<96x32xf32, #tpu.memory_space<vmem>>, vector<16x32xf32>
    tpu.vector_store %arg9[%c80, %c0_221], %612 {strides = array<i32>} : memref<96x32xf32, #tpu.memory_space<vmem>>, vector<16x32xf32>,
    %cst_222 = arith.constant 0.000000e+00 : f32
    %614 = vector.broadcast %cst_222 : f32 to vector<10x32xf32>
    %615 = tpu.concatenate %97, %614 in 0 : vector<2x32xf32>, vector<10x32xf32> -> vector<12x32xf32>
    %616 = arith.addf %533, %615 : vector<12x32xf32>
    %c0_223 = arith.constant 0 : index
    %c0_224 = arith.constant 0 : index
    %617 = vector.load %arg9[%c0_223, %c0_224] : memref<96x32xf32, #tpu.memory_space<vmem>>, vector<96x32xf32>
    %c1736 = arith.constant 1736 : index
    %c0_225 = arith.constant 0 : index
    %618 = vector.load %arg5[%c1736, %c0_225] : memref<1848x384xf32, #tpu.memory_space<vmem>>, vector<96x12xf32>
    %cst_226 = arith.constant dense<0.000000e+00> : vector<96x32xf32>
    %619 = tpu.matmul %618, %616, %cst_226 {dimension_numbers = #tpu.dot_dimension_numbers<[1], [0], [0], [1], [0, 0, 1, 1], [], []>} : vector<96x12xf32>, vector<12x32xf32>, vector<96x32xf32> -> vector<96x32xf32>
    %620 = arith.addf %617, %619 : vector<96x32xf32>
    %c504 = arith.constant 504 : index
    %c0_227 = arith.constant 0 : index
    %621 = vector.load %arg5[%c504, %c0_227] : memref<1848x384xf32, #tpu.memory_space<vmem>>, vector<32x32xf32>
    %cst_228 = arith.constant dense<0.000000e+00> : vector<96x32xf32>
    %622 = tpu.matmul %620, %621, %cst_228 {dimension_numbers = #tpu.dot_dimension_numbers<[1], [0], [0], [1], [0, 0, 1, 1], [], []>} : vector<96x32xf32>, vector<32x32xf32>, vector<96x32xf32> -> vector<96x32xf32>
    %c536 = arith.constant 536 : index
    %c0_229 = arith.constant 0 : index
    %623 = vector.load %arg5[%c536, %c0_229] : memref<1848x384xf32, #tpu.memory_space<vmem>>, vector<1x32xf32>
    %624 = vector.broadcast %623 : vector<1x32xf32> to vector<96x32xf32>
    %625 = arith.addf %622, %624 : vector<96x32xf32>
    %cst_230 = arith.constant dense<0.000000e+00> : vector<96xf32>
    %626 = vector.multi_reduction <add>, %625, %cst_230 [1] : vector<96x32xf32> to vector<96xf32>
    %627 = vector.shape_cast %626 : vector<96xf32> to vector<96x1xf32>
    %cst_231 = arith.constant 3.200000e+01 : f32
    %628 = vector.broadcast %cst_231 : f32 to vector<96x1xf32>
    %629 = arith.divf %627, %628 : vector<96x1xf32>
    %630 = vector.broadcast %629 : vector<96x1xf32> to vector<96x32xf32>
    %631 = arith.subf %625, %630 : vector<96x32xf32>
    %632 = arith.mulf %631, %631 : vector<96x32xf32>
    %cst_232 = arith.constant dense<0.000000e+00> : vector<96xf32>
    %633 = vector.multi_reduction <add>, %632, %cst_232 [1] : vector<96x32xf32> to vector<96xf32>
    %634 = vector.shape_cast %633 : vector<96xf32> to vector<96x1xf32>
    %cst_233 = arith.constant 3.200000e+01 : f32
    %635 = vector.broadcast %cst_233 : f32 to vector<96x1xf32>
    %636 = arith.divf %634, %635 : vector<96x1xf32>
    %637 = vector.broadcast %629 : vector<96x1xf32> to vector<96x32xf32>
    %638 = arith.subf %625, %637 : vector<96x32xf32>
    %cst_234 = arith.constant 9.99999974E-6 : f32
    %639 = vector.broadcast %cst_234 : f32 to vector<96x1xf32>
    %640 = arith.addf %636, %639 : vector<96x1xf32>
    %641 = math.rsqrt %640 : vector<96x1xf32>
    %642 = vector.broadcast %641 : vector<96x1xf32> to vector<96x32xf32>
    %643 = arith.mulf %638, %642 : vector<96x32xf32>
    %c537 = arith.constant 537 : index
    %c0_235 = arith.constant 0 : index
    %644 = vector.load %arg5[%c537, %c0_235] : memref<1848x384xf32, #tpu.memory_space<vmem>>, vector<1x32xf32>
    %645 = vector.broadcast %644 : vector<1x32xf32> to vector<96x32xf32>
    %646 = arith.mulf %643, %645 : vector<96x32xf32>
    %c538 = arith.constant 538 : index
    %c0_236 = arith.constant 0 : index
    %647 = vector.load %arg5[%c538, %c0_236] : memref<1848x384xf32, #tpu.memory_space<vmem>>, vector<1x32xf32>
    %648 = vector.broadcast %647 : vector<1x32xf32> to vector<96x32xf32>
    %649 = arith.addf %646, %648 : vector<96x32xf32>
    %cst_237 = arith.constant 0.000000e+00 : f32
    %650 = vector.broadcast %cst_237 : f32 to vector<96x32xf32>
    %651 = arith.maximumf %649, %650 : vector<96x32xf32>
    %c544 = arith.constant 544 : index
    %c0_238 = arith.constant 0 : index
    %652 = vector.load %arg5[%c544, %c0_238] : memref<1848x384xf32, #tpu.memory_space<vmem>>, vector<32x32xf32>
    %cst_239 = arith.constant dense<0.000000e+00> : vector<96x32xf32>
    %653 = tpu.matmul %651, %652, %cst_239 {dimension_numbers = #tpu.dot_dimension_numbers<[1], [0], [0], [1], [0, 0, 1, 1], [], []>} : vector<96x32xf32>, vector<32x32xf32>, vector<96x32xf32> -> vector<96x32xf32>
    %c576 = arith.constant 576 : index
    %c0_240 = arith.constant 0 : index
    %654 = vector.load %arg5[%c576, %c0_240] : memref<1848x384xf32, #tpu.memory_space<vmem>>, vector<1x32xf32>
    %655 = vector.broadcast %654 : vector<1x32xf32> to vector<96x32xf32>
    %656 = arith.addf %653, %655 : vector<96x32xf32>
    %cst_241 = arith.constant dense<0.000000e+00> : vector<96xf32>
    %657 = vector.multi_reduction <add>, %656, %cst_241 [1] : vector<96x32xf32> to vector<96xf32>
    %658 = vector.shape_cast %657 : vector<96xf32> to vector<96x1xf32>
    %cst_242 = arith.constant 3.200000e+01 : f32
    %659 = vector.broadcast %cst_242 : f32 to vector<96x1xf32>
    %660 = arith.divf %658, %659 : vector<96x1xf32>
    %661 = vector.broadcast %660 : vector<96x1xf32> to vector<96x32xf32>
    %662 = arith.subf %656, %661 : vector<96x32xf32>
    %663 = arith.mulf %662, %662 : vector<96x32xf32>
    %cst_243 = arith.constant dense<0.000000e+00> : vector<96xf32>
    %664 = vector.multi_reduction <add>, %663, %cst_243 [1] : vector<96x32xf32> to vector<96xf32>
    %665 = vector.shape_cast %664 : vector<96xf32> to vector<96x1xf32>
    %cst_244 = arith.constant 3.200000e+01 : f32
    %666 = vector.broadcast %cst_244 : f32 to vector<96x1xf32>
    %667 = arith.divf %665, %666 : vector<96x1xf32>
    %668 = vector.broadcast %660 : vector<96x1xf32> to vector<96x32xf32>
    %669 = arith.subf %656, %668 : vector<96x32xf32>
    %cst_245 = arith.constant 9.99999974E-6 : f32
    %670 = vector.broadcast %cst_245 : f32 to vector<96x1xf32>
    %671 = arith.addf %667, %670 : vector<96x1xf32>
    %672 = math.rsqrt %671 : vector<96x1xf32>
    %673 = vector.broadcast %672 : vector<96x1xf32> to vector<96x32xf32>
    %674 = arith.mulf %669, %673 : vector<96x32xf32>
    %c577 = arith.constant 577 : index
    %c0_246 = arith.constant 0 : index
    %675 = vector.load %arg5[%c577, %c0_246] : memref<1848x384xf32, #tpu.memory_space<vmem>>, vector<1x32xf32>
    %676 = vector.broadcast %675 : vector<1x32xf32> to vector<96x32xf32>
    %677 = arith.mulf %674, %676 : vector<96x32xf32>
    %c578 = arith.constant 578 : index
    %c0_247 = arith.constant 0 : index
    %678 = vector.load %arg5[%c578, %c0_247] : memref<1848x384xf32, #tpu.memory_space<vmem>>, vector<1x32xf32>
    %679 = vector.broadcast %678 : vector<1x32xf32> to vector<96x32xf32>
    %680 = arith.addf %677, %679 : vector<96x32xf32>
    %cst_248 = arith.constant 0.000000e+00 : f32
    %681 = vector.broadcast %cst_248 : f32 to vector<96x32xf32>
    %682 = arith.maximumf %680, %681 : vector<96x32xf32>
    %c1648 = arith.constant 1648 : index
    %c0_249 = arith.constant 0 : index
    %683 = vector.load %arg5[%c1648, %c0_249] : memref<1848x384xf32, #tpu.memory_space<vmem>>, vector<32x40xf32>
    %cst_250 = arith.constant dense<0.000000e+00> : vector<96x40xf32>
    %684 = tpu.matmul %682, %683, %cst_250 {dimension_numbers = #tpu.dot_dimension_numbers<[1], [0], [0], [1], [0, 0, 1, 1], [], []>} : vector<96x32xf32>, vector<32x40xf32>, vector<96x40xf32> -> vector<96x40xf32>
    %c1680 = arith.constant 1680 : index
    %c0_251 = arith.constant 0 : index
    %685 = vector.load %arg5[%c1680, %c0_251] : memref<1848x384xf32, #tpu.memory_space<vmem>>, vector<1x40xf32>
    %686 = vector.broadcast %685 : vector<1x40xf32> to vector<96x40xf32>
    %687 = arith.addf %684, %686 : vector<96x40xf32>
    %c1688 = arith.constant 1688 : index
    %c0_252 = arith.constant 0 : index
    %688 = vector.load %arg5[%c1688, %c0_252] : memref<1848x384xf32, #tpu.memory_space<vmem>>, vector<40x384xf32>
    %cst_253 = arith.constant dense<0.000000e+00> : vector<96x384xf32>
    %689 = tpu.matmul %687, %688, %cst_253 {dimension_numbers = #tpu.dot_dimension_numbers<[1], [0], [0], [1], [0, 0, 1, 1], [], []>} : vector<96x40xf32>, vector<40x384xf32>, vector<96x384xf32> -> vector<96x384xf32>
    %c1728 = arith.constant 1728 : index
    %c0_254 = arith.constant 0 : index
    %690 = vector.load %arg5[%c1728, %c0_254] : memref<1848x384xf32, #tpu.memory_space<vmem>>, vector<1x384xf32>
    %cst_255 = arith.constant 5.000000e-01 : f32
    %691 = vector.broadcast %cst_255 : f32 to vector<1x384xf32>
    %692 = arith.cmpf ogt, %690, %691 : vector<1x384xf32>
    %693 = math.exp %689 : vector<96x384xf32>
    %694 = vector.shape_cast %692 : vector<1x384xi1> to vector<1x384xi1>
    %695 = vector.broadcast %694 : vector<1x384xi1> to vector<96x384xi1>
    %696 = arith.select %695, %693, %689 : vector<96x384xi1>, vector<96x384xf32>
    %c0_256 = arith.constant 0 : index
    %c0_257 = arith.constant 0 : index
    %697 = vector.load %arg7[%c0_256, %c0_257] : memref<96x384xf32, #tpu.memory_space<vmem>>, vector<96x384xf32>
    tpu.vector_store %arg7[%c0_256, %c0_257], %696 {strides = array<i32>} : memref<96x384xf32, #tpu.memory_space<vmem>>, vector<96x384xf32>,
    return
  }
  func.func @transform_0(%arg0: i32) -> (i32, i32) {
    %c0_i32 = arith.constant 0 : i32
    %c0_i32_0 = arith.constant 0 : i32
    return %arg0, %c0_i32 : i32, i32
  }
  func.func @transform_1(%arg0: i32) -> (i32, i32) {
    %c0_i32 = arith.constant 0 : i32
    %c0_i32_0 = arith.constant 0 : i32
    return %arg0, %c0_i32 : i32, i32
  }
  func.func @transform_2(%arg0: i32) -> (i32, i32) {
    %c0_i32 = arith.constant 0 : i32
    %c0_i32_0 = arith.constant 0 : i32
    return %arg0, %c0_i32 : i32, i32
  }
  func.func @transform_3(%arg0: i32) -> (i32, i32) {
    %c0_i32 = arith.constant 0 : i32
    %c0_i32_0 = arith.constant 0 : i32
    return %arg0, %c0_i32 : i32, i32
  }
  func.func @transform_4(%arg0: i32) -> (i32, i32) {
    %c0_i32 = arith.constant 0 : i32
    %c0_i32_0 = arith.constant 0 : i32
    %c0_i32_1 = arith.constant 0 : i32
    return %c0_i32, %c0_i32_0 : i32, i32
  }
  func.func @transform_5(%arg0: i32) -> (i32, i32) {
    %c0_i32 = arith.constant 0 : i32
    %c0_i32_0 = arith.constant 0 : i32
    return %arg0, %c0_i32 : i32, i32
  }
  func.func @transform_6(%arg0: i32) -> (i32, i32) {
    %c0_i32 = arith.constant 0 : i32
    %c0_i32_0 = arith.constant 0 : i32
    return %arg0, %c0_i32 : i32, i32
  }
}

</mosaic_0001>

<bundles_post_ra>
// kernel: tpu_custom_call.1
= control target key start
LH: loop header
LB: loop body
LE: loop exit
PB: predicated region body
PF: predicated region fallthrough
CT: control target
= control target key end

     0   :  { %12 = vsyncpa [#allocation5], 0  ;;  %s9073_s0 = inlined_call_operand.hbm [shape: f32[2,32], index: 0, kind: input, shape index: {}]   ;;  %s9074_s1 = inlined_call_operand.hbm [shape: f32[16,32], index: 1, kind: input, shape index: {}]   ;;  %s9075_s2 = inlined_call_operand.hbm [shape: f32[2,32], index: 2, kind: input, shape index: {}]   ;;  %s9076_s3 = inlined_call_operand.hbm [shape: f32[2,20], index: 3, kind: input, shape index: {}]   ;;  %s9077_s4 = inlined_call_operand.hbm [shape: f32[1848,384], index: 4, kind: input, shape index: {}]   ;;  %s9078_s5 = inlined_call_operand.vmem [shape: f32[12,1], index: 5, kind: output, shape index: {0}]   ;;  %s9079_s6 = inlined_call_operand.hbm [shape: f32[96,384], index: 6, kind: output, shape index: {1}]  }
   0x1   :  { %13 = vsyncpa [#allocation8], 0 }
   0x2   :  { %14 = vsyncpa [#allocation11], 0 }
   0x3   :  { %15 = vsyncpa [#allocation6], 0  ;;  %s7811_s21 = smov [#allocation7]   ;;  %s7671_s25 = scalar_lea.hbm %s9074_s1, 256 }
   0x4   :  { %s31_s22 = sshll.u32 %s7811_s21, 4  ;;  %p7672_p0 = scmp.ne.s32.totalorder %s9074_s1, %s7671_s25  ;;  %s32_s22 = int_to_ptr.vmem [resolvable:$true] %s31_s22 }
   0x5   :  { %p7675_p1 = scmp.lt.u32.totalorder %s7671_s25, %s9074_s1 }
   0x7   :  { %p7677_p2 = pnand %p7675_p1, %p7672_p0 }
   0x9   :  { %7680 = shalt.err (!%p7677_p2)
}
   0xa   :  { %s7681_s30 = scalar_lea.vmem %s32_s22, 256  ;;  %p7686_p4 = scmp.lt.s32.totalorder %s32_s22, %s32_s22 }
   0xb   :  { %p7682_p3 = scmp.ne.s32.totalorder %s32_s22, %s7681_s30  ;;  %p7687_p5 = scmp.lt.s32.totalorder %s7681_s30, %s7681_s30 }
   0xd   :  { %p7688_p6 = por %p7687_p5, %p7686_p4 }
   0xf   :  { %p7689_p7 = pnand %p7688_p6, %p7682_p3 }
  0x11   :  { %7692 = shalt.err (!%p7689_p7)
}
  0x12   :  { %s7812_s7 = smov 128   ;;  %s7813_s8 = smov 8  }
  0x13   :  { %37 = dma.hbm_to_vmem [thread:$0]  %s9074_s1, 256, %s32_s22, [#allocation8], %s7812_s7, %s7812_s7, %s7813_s8  }
  0x14   :  { %s7814_s11 = smov [#allocation10]   ;;  %s7815_s13 = smov [#allocation4]  }
  0x15   :  { %s54_s12 = sshll.u32 %s7814_s11, 4  ;;  %s22_s14 = sshll.u32 %s7815_s13, 4  ;;  %s55_s12 = int_to_ptr.vmem [resolvable:$true] %s54_s12  ;;  %s23_s14 = int_to_ptr.vmem [resolvable:$true] %s22_s14 }
  0x16   :  { %s7693_s17 = scalar_lea.hbm %s9076_s3, 32 }
  0x17   :  { %p7694_p8 = scmp.ne.s32.totalorder %s9076_s3, %s7693_s17  ;;  %p7697_p9 = scmp.lt.u32.totalorder %s7693_s17, %s9076_s3 }
  0x19   :  { %p7699_p10 = pnand %p7697_p9, %p7694_p8 }
  0x1b   :  { %7702 = shalt.err (!%p7699_p10)
}
  0x1c   :  { %s7703_s1 = scalar_lea.vmem %s55_s12, 32  ;;  %p7708_p12 = scmp.lt.s32.totalorder %s55_s12, %s55_s12 }
  0x1d   :  { %p7704_p11 = scmp.ne.s32.totalorder %s55_s12, %s7703_s1  ;;  %p7709_p13 = scmp.lt.s32.totalorder %s7703_s1, %s7703_s1 }
  0x1f   :  { %p7710_p0 = por %p7709_p13, %p7708_p12 }
  0x21   :  { %p7711_p1 = pnand %p7710_p0, %p7704_p11 }
  0x23   :  { %7714 = shalt.err (!%p7711_p1)
}
  0x24   :  { %57 = dma.hbm_to_vmem [thread:$0]  %s9076_s3, 32, %s55_s12, [#allocation11]  }
  0x25   :  { %s7715_s26 = scalar_lea.hbm %s9073_s0, 32 }
  0x26   :  { %p7716_p2 = scmp.ne.s32.totalorder %s9073_s0, %s7715_s26  ;;  %p7719_p3 = scmp.lt.u32.totalorder %s7715_s26, %s9073_s0 }
  0x28   :  { %p7721_p4 = pnand %p7719_p3, %p7716_p2 }
  0x2a   :  { %7724 = shalt.err (!%p7721_p4)
}
  0x2b   :  { %s7725_s7 = scalar_lea.vmem %s23_s14, 32  ;;  %p7730_p6 = scmp.lt.s32.totalorder %s23_s14, %s23_s14 }
  0x2c   :  { %p7726_p5 = scmp.ne.s32.totalorder %s23_s14, %s7725_s7  ;;  %p7731_p7 = scmp.lt.s32.totalorder %s7725_s7, %s7725_s7 }
  0x2e   :  { %p7732_p8 = por %p7731_p7, %p7730_p6 }
  0x30   :  { %p7733_p9 = pnand %p7732_p8, %p7726_p5 }
  0x32   :  { %7736 = shalt.err (!%p7733_p9)
}
  0x33   :  { %25 = dma.hbm_to_vmem [thread:$0]  %s9073_s0, 32, %s23_s14, [#allocation5]  }
  0x34   :  { %s7816_s10 = smov [#allocation9]   ;;  %s7817_s12 = smov [#allocation12]  }
  0x35   :  { %s44_s11 = sshll.u32 %s7816_s10, 4  ;;  %s63_s13 = sshll.u32 %s7817_s12, 4  ;;  %s45_s11 = int_to_ptr.vmem [resolvable:$true] %s44_s11  ;;  %s64_s13 = int_to_ptr.vmem [resolvable:$true] %s63_s13 }
  0x36   :  { %s7737_s17 = scalar_lea.hbm %s9075_s2, 32 }
  0x37   :  { %p7738_p10 = scmp.ne.s32.totalorder %s9075_s2, %s7737_s17  ;;  %p7741_p11 = scmp.lt.u32.totalorder %s7737_s17, %s9075_s2 }
  0x39   :  { %p7743_p12 = pnand %p7741_p11, %p7738_p10 }
  0x3b   :  { %7746 = shalt.err (!%p7743_p12)
}
  0x3c   :  { %s7747_s0 = scalar_lea.vmem %s45_s11, 32  ;;  %p7752_p0 = scmp.lt.s32.totalorder %s45_s11, %s45_s11 }
  0x3d   :  { %p7748_p13 = scmp.ne.s32.totalorder %s45_s11, %s7747_s0  ;;  %p7753_p1 = scmp.lt.s32.totalorder %s7747_s0, %s7747_s0 }
  0x3f   :  { %p7754_p2 = por %p7753_p1, %p7752_p0 }
  0x41   :  { %p7755_p3 = pnand %p7754_p2, %p7748_p13 }
  0x43   :  { %7758 = shalt.err (!%p7755_p3)
}
  0x44   :  { %47 = dma.hbm_to_vmem [thread:$0]  %s9075_s2, 32, %s45_s11, [#allocation8]  }
  0x45   :  { %s7759_s24 = scalar_lea.hbm %s9077_s4, 88704 }
  0x46   :  { %p7760_p4 = scmp.ne.s32.totalorder %s9077_s4, %s7759_s24  ;;  %p7763_p5 = scmp.lt.u32.totalorder %s7759_s24, %s9077_s4 }
  0x48   :  { %p7765_p6 = pnand %p7763_p5, %p7760_p4 }
  0x4a   :  { %7768 = shalt.err (!%p7765_p6)
}
  0x4b   :  { %s7769_s29 = scalar_lea.vmem %s64_s13, 88704  ;;  %p7774_p8 = scmp.lt.s32.totalorder %s64_s13, %s64_s13 }
  0x4c   :  { %p7770_p7 = scmp.ne.s32.totalorder %s64_s13, %s7769_s29  ;;  %p7775_p9 = scmp.lt.s32.totalorder %s7769_s29, %s7769_s29 }
  0x4e   :  { %p7776_p10 = por %p7775_p9, %p7774_p8 }
  0x50   :  { %p7777_p11 = pnand %p7776_p10, %p7770_p7 }
  0x52   :  { %7780 = shalt.err (!%p7777_p11)
}
  0x53   :  { %s7818_s2 = smov 384   ;;  %s7819_s30 = smov 24  }
  0x54   :  { %69 = dma.hbm_to_vmem [thread:$0]  %s9077_s4, 88704, %s64_s13, [#allocation11], %s7818_s2, %s7818_s2, %s7819_s30  }
  0x55   :  { %7803 = dma.done.wait [#allocation5], 32  }
  0x56   :  { %7804 = vsyncadd [#allocation5], 4294967264 }
  0x57   :  { %7805 = dma.done.wait [#allocation8], 288  }
  0x58   :  { %7806 = vsyncadd [#allocation8], 4294967008 }
  0x59   :  { %7807 = dma.done.wait [#allocation11], 88736  }
  0x5a   :  { %7808 = vsyncadd [#allocation11], 4294878560  ;;  %v7820_v0 = vmov 0.0|0.0   ;;  %vm7821_vm0 = vmmov 0   ;;  %v7822_v1 = vmov 0.0   ;;  %v90_v2 = vld [vmem:[#allocation12] sm:$0xff] }
  0x5b   :  { %6894 = vmatprep.subr.bf16.mxu0 %v7820_v0  ;;  %6897 = vmatprep.subr.bf16.mxu1 %v7820_v0  ;;  %v91_v3 = vld [vmem:[#allocation12 + $0x18] sm:$0xff]  ;;  %v92_v5 = vld [vmem:[#allocation12 + $0x30] sm:$0xf]  ;;  %vm98_vm1 = vcmask 1043456   ;;  %vm94_vm2 = vcmask 162816   ;;  %vm172_vm3 = vcmask 254976  }
  0x5c   :  { %6430 = vmatprep.mubr.msk.f32.mxu0 %vm7821_vm0, %v7822_v1  ;;  %6449 = vmatprep.mubr.msk.f32.mxu1 %vm7821_vm0, %v7822_v1  ;;  %v6895_v4 = vpack.c.bf16 %v91_v3, %v90_v2  ;;  %v89_v6 = vld [vmem:[#allocation10] sm:$0x3]  ;;  %v93_v7 = vld [vmem:[#allocation12 + $0x34] ss:$0 sm:$0xff]  ;;  %v397_v19 = vld [vmem:[#allocation12 + $0x1c8] sm:$0xff]  ;;  %vm196_vm4 = vcmask 261120  }
  0x5d   :  { %v395_v17 = vld [vmem:[#allocation12 + $0x198] sm:$0xff]  ;;  %v396_v18 = vld [vmem:[#allocation12 + $0x1b0] sm:$0xff]  ;;  %v398_v21 = vld [vmem:[#allocation12 + $0x1e0] sm:$0xff]  ;;  %s7823_s4 = smov 32   ;;  %vm473_vm5 = vcmask 779264   ;;  %vm207_vm6 = vcmask 523264  }
  0x5e   :  { %6896 = vmatpush3.bf16.msra.mxu0 %v6895_v4  ;;  %v6916_v20 = vpack.c.bf16 %v396_v18, %v395_v17  ;;  %v6919_v22 = vpack.c.bf16 %v398_v21, %v397_v19  ;;  %v85_v23 = vld [vmem:[#allocation4] sm:$0x3]  ;;  %v199_v25 = vld [vmem:[#allocation12 + $0x60] sm:$0xff]  ;;  %v200_v26 = vld [vmem:[#allocation12 + $0x78] sm:$0xff]  ;;  %vm530_vm7 = vcmask 785408   ;;  %vm605_vm8 = vcmask 1041408  }
  0x5f   :  { %6428 = vmatprep.subr.mxu0 %v7822_v1  ;;  %v198_v24 = vld [vmem:[#allocation12 + $0x48] sm:$0xff]  ;;  %v201_v28 = vld [vmem:[#allocation12 + $0x90] sm:$0xff]  ;;  %v203_v31 = vld [vmem:[#allocation12 + $0xc0] sm:$0xff]  ;;  %vm607_vm9 = vcmask 517120   ;;  %s7824_s9 = smov 64   ;;  %s7825_s10 = smov 96  }
  0x60   :  { %v6898_v27 = vpack.c.bf16 %v199_v25, %v198_v24  ;;  %v6901_v29 = vpack.c.bf16 %v201_v28, %v200_v26  ;;  %v202_v30 = vld [vmem:[#allocation12 + $0xa8] sm:$0xff]  ;;  %v204_v33 = vld [vmem:[#allocation12 + $0xd8] sm:$0xff]  ;;  %v205_v34 = vld [vmem:[#allocation12 + $0xf0] sm:$0xff]  ;;  %vm1090_vm10 = vcmask 64512   ;;  %s7826_s11 = smov 88   ;;  %s7827_s12 = smov 120  }
  0x61   :  { %v6904_v32 = vpack.c.bf16 %v203_v31, %v202_v30  ;;  %v6907_v35 = vpack.c.bf16 %v205_v34, %v204_v33  ;;  %v187_v40 = vld [vmem:[#allocation12 + $0x35] ss:$0 sm:$0xff]  ;;  %v189_v42 = vld [vmem:[#allocation12 + $0x36] ss:$0 sm:$0xff]  ;;  %v399_v46 = vld [vmem:[#allocation12 + $0x1f8] ss:$0 sm:$0xff] }
  0x62   :  { %6429 = vmatpush3.msk.msra.mxu0 %vm98_vm1, %v92_v5  ;;  %6899 = vmatpush3.bf16.msra.mxu1 %v6898_v27  ;;  %v88_v51 = vld [vmem:[#allocation9] sm:$0x3]  ;;  %v206_v54 = vld [vmem:[#allocation12 + $0x108] ss:$0 sm:$0xff]  ;;  %v296_v25 = vld [vmem:[#allocation12 + $0x10a] ss:$0 sm:$0xff] }
  0x63   :  { %6431 = vmatmul.mubr.msk.f32.vlgmr.msra.gmra.mrb[0].mxu0 %vm94_vm2, %v89_v6  ;;  %6915 = vmatprep.subr.bf16.mxu0 %v7820_v0  ;;  %v493_v26 = vld [vmem:[#allocation12 + $0x210] sm:$0xff]  ;;  %v495_v27 = vld [vmem:[#allocation12 + $0x228] sm:$0xff]  ;;  %v497_v34 = vld [vmem:[#allocation12 + $0x240] sm:$0xff]  ;;  %s7828_s13 = smov 112   ;;  %s7829_s15 = smov 80   ;;  %vm1182_vm12 = vcmask 93184  }
  0x64   :  { %6471 = vmatprep.mubr.msk.f32.mxu0 %vm7821_vm0, %v7822_v1  ;;  %6917 = vmatpush3.bf16.msra.mxu0 %v6916_v20  ;;  %v498_v28 = vld [vmem:[#allocation12 + $0x248] sm:$0xff]  ;;  %v6923_v31 = vpack.c.bf16 %v495_v27, %v493_v26  ;;  %vm8057_vm11 = vmpackc.low %vm1090_vm10, %vm1090_vm10  ;;  %vm1178_vm13 = vcmask 97280   ;;  %s7830_s16 = smov 56   ;;  %s7831_s17 = smov 48   ;;  %vm7834_vm14 = vmmov 1   ;;  %vm2028_vm2 = vcmask 257024  }
  0x65   :  { %6918 = vmatprep.subr.bf16.mxu0 %v7820_v0  ;;  %6900 = vmatprep.subr.bf16.mxu1 %v7820_v0  ;;  %s7832_s18 = smov 72   ;;  %s7833_s19 = smov 104   ;;  %vm8140_vm15 = vmpackc.low %vm98_vm1, %vm7834_vm14  ;;  %vm1934_vm1 = vcmask 195584  }
  0x66   :  { %6902 = vmatpush3.bf16.msra.mxu1 %v6901_v29  ;;  %v500_v29 = vld [vmem:[#allocation12 + $0x260] sm:$0xff]  ;;  %s7835_s20 = smov 16   ;;  %s7836_s21 = smov 40  }
  0x67   :  { %6903 = vmatprep.subr.bf16.mxu1 %v7820_v0  ;;  %v6925_v33 = vpack.c.bf16 %v500_v29, %v498_v28 }
  0x68   :  { %6920 = vmatpush3.bf16.msra.mxu0 %v6919_v22  ;;  %v294_v22 = vld [vmem:[#allocation12 + $0x109] ss:$0 sm:$0xff] }
  0x6a   :  { %6905 = vmatpush3.bf16.msra.mxu1 %v6904_v32 }
  0x6b   :  { %6472 = vmatmul.mubr.msk.f32.vlgmr.msra.gmra.mrb[2].mxu0 %vm196_vm4, %v85_v23  ;;  %6906 = vmatprep.subr.bf16.mxu1 %v7820_v0 }
  0x6e   :  { %6908 = vmatpush3.bf16.msra.mxu1 %v6907_v35  ;;  %v499_v35 = vld [vmem:[#allocation12 + $0x258] sm:$0xff] }
  0x6f   :  { %6909 = vmatprep.subr.bf16.mxu1 %v7820_v0 }
 0x136   :  { %v168_v8 = vpop.f32.mrb[0].mxu0 }
 0x137   :  { %v169_v9 = vadd.f32 %v168_v8, %v93_v7  ;;  %v6432_v10 = vpop.f32.mrb[1].mxu0  ;;  %v299_v7 = vld [vmem:[#allocation12 + $0x120] sm:$0xff]  ;;  %v300_v8 = vld [vmem:[#allocation12 + $0x138] sm:$0xff] }
 0x138   :  { %v301_v10 = vld [vmem:[#allocation12 + $0x150] sm:$0xff] }
 0x139   :  { %v173_v11 = vsel %vm172_vm3, %v169_v9, 0.0 }
 0x13a   :  { %174 = vadd.xlane.f32.xlu0 %v173_v11  ;;  %v302_v11 = vld [vmem:[#allocation12 + $0x168] sm:$0xff] }
 0x13e   :  { %v469_v47 = vpop.f32.mrb[2].mxu0 }
 0x13f   :  { %v470_v48 = vadd.f32 %v469_v47, %v399_v46  ;;  %v6473_v49 = vpop.f32.mrb[3].mxu0  ;;  %v505_v46 = vld [vmem:[#allocation12 + $0x2a0] sm:$0xff]  ;;  %v507_v47 = vld [vmem:[#allocation12 + $0x2b8] sm:$0xff] }
 0x140   :  { %v510_v49 = vld [vmem:[#allocation12 + $0x2d8] sm:$0xff] }
 0x141   :  { %v474_v50 = vsel %vm473_vm5, %v470_v48, 0.0 }
 0x1c7   :  { %v175_v12 = vpop.xlane.xlu0 %174 }
 0x1c8   :  { %v177_v13 = vmul.f32 0.03125, %v175_v12  ;;  %v6913_v12 = vpack.c.bf16 %v302_v11, %v301_v10  ;;  %v663_v10 = vld [vmem:[#allocation12 + $0x390] sm:$0xff] }
 0x1c9   :  { %v86_v11 = vld [vmem:[#allocation7] sm:$0xff] }
 0x1ca   :  { %v178_v14 = vsub.f32 %v169_v9, %v177_v13  ;;  %v6910_v9 = vpack.c.bf16 %v300_v8, %v299_v7  ;;  %v494_v13 = vld [vmem:[#allocation12 + $0x218] sm:$0xff]  ;;  %v661_v7 = vld [vmem:[#allocation12 + $0x360] sm:$0xff]  ;;  %6482 = vmatprep.mubr.msk.f32.mxu0 %vm196_vm4, %v86_v11 }
 0x1cb   :  { %v662_v8 = vld [vmem:[#allocation12 + $0x378] sm:$0xff] }
 0x1cc   :  { %v179_v15 = vmul.f32 %v178_v14, %v178_v14 }
 0x1ce   :  { %v180_v16 = vsel %vm172_vm3, %v179_v15, 0.0 }
 0x1cf   :  { %181 = vadd.xlane.f32.xlu0 %v180_v16 }
 0x1d3   :  { %475 = vadd.xlane.f32.xlu0 %v474_v50  ;;  %v512_v50 = vld [vmem:[#allocation12 + $0x2f0] sm:$0xff] }
 0x25c   :  { %v182_v36 = vpop.xlane.xlu0 %181 }
 0x25d   :  { %v183_v37 = vmul.f32 0.03125, %v182_v36  ;;  %v502_v36 = vld [vmem:[#allocation12 + $0x278] sm:$0xff] }
 0x25f   :  { %v184_v38 = vadd.f32 1e-05, %v183_v37  ;;  %v504_v37 = vld [vmem:[#allocation12 + $0x290] sm:$0xff] }
 0x260   :  { %v476_v59 = vpop.xlane.xlu0 %475 }
 0x261   :  { %7443 = vrsqrt.f32 %v184_v38  ;;  %v478_v60 = vmul.f32 0.010416667, %v476_v59  ;;  %v6927_v38 = vpack.c.bf16 %v499_v35, %v497_v34 }
 0x263   :  { %v7964_v63 = vsub.f32 %v470_v48, %v478_v60 }
 0x265   :  { %v480_v5 = vmul.f32 %v7964_v63, %v7964_v63 }
 0x267   :  { %v481_v6 = vsel %vm473_vm5, %v480_v5, 0.0  ;;  %vm4292_vm5 = vcmask 7168  }
 0x26b   :  { %v7444_v39 = vpop.eup %7443 }
 0x26c   :  { %v186_v41 = vmul.f32 %v7444_v39, %v178_v14  ;;  %v496_v14 = vld [vmem:[#allocation12 + $0x230] sm:$0xff]  ;;  %v6929_v39 = vpack.c.bf16 %v504_v37, %v502_v36 }
 0x26d   :  { %v6921_v15 = vpack.c.bf16 %v496_v14, %v494_v13  ;;  %v87_v13 = vld [vmem:[#allocation7 + $0x8] sm:$0xff] }
 0x26e   :  { %v188_v43 = vmul.f32 %v187_v40, %v186_v41  ;;  %v501_v40 = vld [vmem:[#allocation12 + $0x270] sm:$0xff]  ;;  %v503_v41 = vld [vmem:[#allocation12 + $0x288] sm:$0xff] }
 0x270   :  { %v190_v44 = vadd.f32 %v189_v42, %v188_v43  ;;  %v506_v42 = vld [vmem:[#allocation12 + $0x2a8] sm:$0xff]  ;;  %v508_v43 = vld [vmem:[#allocation12 + $0x2c0] sm:$0xff] }
 0x272   :  { %v191_v45 = vmax.f32 %v190_v44, 0.0  ;;  %v6931_v44 = vpack.c.bf16 %v503_v41, %v501_v40 }
 0x274   :  { %193 = vrot.lane.b32.xlu1 %v191_v45, %s7823_s4  ;;  %v6933_v45 = vpack.c.bf16 %v508_v43, %v506_v42  ;;  %v629_v43 = vld [vmem:[#allocation12 + $0x331] ss:$8 sm:$0x3] }
 0x2e6   :  { %v194_v52 = vpop.permute.xlu1 %193 }
 0x2e7   :  { %v197_v53 = vsel %vm196_vm4, %v88_v51, %v194_v52  ;;  %v6935_v51 = vpack.c.bf16 %v507_v47, %v505_v46 }
 0x2e8   :  { %6450 = vmatmul.mubr.msk.f32.vlgmr.msra.gmra.mrb[0].mxu1 %vm207_vm6, %v197_v53  ;;  %v6937_v53 = vpack.c.bf16 %v512_v50, %v510_v49 }
 0x2e9   :  { %6460 = vmatprep.mubr.msk.f32.mxu1 %vm7821_vm0, %v7822_v1  ;;  %6911 = vmatpush3.bf16.msra.mxu1 %v6910_v9  ;;  %vm1931_vm0 = vcmask 130048  }
 0x2ea   :  { %6912 = vmatprep.subr.bf16.mxu1 %v7820_v0 }
 0x2ed   :  { %6914 = vmatpush3.bf16.msra.mxu1 %v6913_v12  ;;  %v6949_v12 = vpack.c.bf16 %v663_v10, %v662_v8  ;;  %v783_v8 = vld [vmem:[#allocation12 + $0x3e0] sm:$0xff] }
 0x2ee   :  { %6922 = vmatprep.subr.bf16.mxu1 %v6921_v15 }
 0x3bb   :  { %v277_v55 = vpop.f32.mrb[0].mxu1 }
 0x3bc   :  { %v278_v56 = vadd.f32 %v277_v55, %v206_v54  ;;  %v6451_v57 = vpop.f32.mrb[1].mxu1  ;;  %v509_v54 = vld [vmem:[#allocation12 + $0x2d0] sm:$0xff]  ;;  %v511_v55 = vld [vmem:[#allocation12 + $0x2e8] sm:$0xff] }
 0x3bd   :  { %v516_v57 = vld [vmem:[#allocation12 + $0x320] sm:$0xff]  ;;  %v6939_v59 = vpack.c.bf16 %v511_v55, %v509_v54 }
 0x3be   :  { %v281_v58 = vsel %vm172_vm3, %v278_v56, 0.0 }
 0x3bf   :  { %282 = vadd.xlane.f32.xlu1 %v281_v58  ;;  %v488_v58 = vld [vmem:[#allocation12 + $0x1f9] ss:$0 sm:$0xff] }
 0x44c   :  { %v283_v61 = vpop.xlane.xlu1 %282 }
 0x44d   :  { %v284_v62 = vmul.f32 0.03125, %v283_v61  ;;  %v513_v61 = vld [vmem:[#allocation12 + $0x300] sm:$0xff] }
 0x44f   :  { %v285_v2 = vsub.f32 %v278_v56, %v284_v62  ;;  %v514_v56 = vld [vmem:[#allocation12 + $0x308] sm:$0xff]  ;;  %v515_v62 = vld [vmem:[#allocation12 + $0x318] sm:$0xff] }
 0x450   :  { %v6941_v60 = vpack.c.bf16 %v516_v57, %v514_v56  ;;  %v1000_v57 = vld [vmem:[#allocation12 + $0x708] sm:$0xff] }
 0x451   :  { %v286_v3 = vmul.f32 %v285_v2, %v285_v2 }
 0x453   :  { %v287_v4 = vsel %vm172_vm3, %v286_v3, 0.0  ;;  %v490_v3 = vld [vmem:[#allocation12 + $0x1fa] ss:$0 sm:$0xff] }
 0x454   :  { %288 = vadd.xlane.f32.xlu0 %v287_v4  ;;  %v6943_v4 = vpack.c.bf16 %v515_v62, %v513_v61 }
 0x458   :  { %482 = vadd.xlane.f32.xlu0 %v481_v6  ;;  %v660_v6 = vld [vmem:[#allocation12 + $0x348] sm:$0xff] }
 0x459   :  { %v6945_v9 = vpack.c.bf16 %v661_v7, %v660_v6  ;;  %v781_v7 = vld [vmem:[#allocation12 + $0x3c8] sm:$0xff] }
 0x45b   :  { %6946 = vmatprep.subr.bf16.mxu0 %v6945_v9 }
 0x45c   :  { %6948 = vmatpush3.bf16.msra.mxu0 %v6945_v9  ;;  %v6953_v9 = vpack.c.bf16 %v783_v8, %v781_v7  ;;  %v772_v8 = vld [vmem:[#allocation12 + $0x3a9] ss:$0 sm:$0xff] }
 0x45d   :  { %6950 = vmatprep.subr.bf16.mxu0 %v6949_v12 }
 0x460   :  { %6952 = vmatpush3.bf16.msra.mxu0 %v6949_v12 }
 0x461   :  { %6954 = vmatprep.subr.bf16.mxu0 %v6953_v9 }
 0x463   :  { %6483 = vmatmul.mubr.msk.f32.vlgmr.msra.gmra.mrb[4].mxu0 %vm196_vm4, %v87_v13 }
 0x464   :  { %887 = vmatprep.mubr.f32.mxu0 %v7822_v1 }
 0x4e1   :  { %v289_v16 = vpop.xlane.xlu0 %288 }
 0x4e2   :  { %v290_v17 = vmul.f32 0.03125, %v289_v16  ;;  %v520_v16 = vlaneseq }
 0x4e4   :  { %v291_v18 = vadd.f32 1e-05, %v290_v17  ;;  %v7980_v17 = vshrl.u32 %v520_v16, 7 }
 0x4e5   :  { %v483_v19 = vpop.xlane.xlu0 %482 }
 0x4e6   :  { %7445 = vrsqrt.f32 %v291_v18  ;;  %v484_v20 = vmul.f32 0.010416667, %v483_v19  ;;  %v7983_v18 = vsub.s32 0, %v7980_v17  ;;  %v518_v19 = vld [vmem:[#allocation12 + $0x330] ss:$8 sm:$0x3] }
 0x4e8   :  { %v485_v24 = vadd.f32 1e-05, %v484_v20  ;;  %v7986_v20 = vsub.s32 1, %v7980_v17 }
 0x4ea   :  { %7447 = vrsqrt.f32 %v485_v24  ;;  %v638_v46 = vrot.slane %v629_v43, %v7986_v20 }
 0x4f0   :  { %v7446_v21 = vpop.eup %7445 }
 0x4f1   :  { %v293_v23 = vmul.f32 %v7446_v21, %v285_v2  ;;  %v523_v21 = vrot.slane %v518_v19, %v7983_v18 }
 0x4f3   :  { %v295_v0 = vmul.f32 %v294_v22, %v293_v23  ;;  %v527_v22 = vrot.slane %v518_v19, %v7986_v20 }
 0x4f4   :  { %v7448_v48 = vpop.eup %7447 }
 0x4f5   :  { %v297_v30 = vadd.f32 %v296_v25, %v295_v0  ;;  %v487_v52 = vmul.f32 %v7448_v48, %v7964_v63 }
 0x4f7   :  { %v298_v32 = vmax.f32 %v297_v30, 0.0  ;;  %v489_v2 = vmul.f32 %v488_v58, %v487_v52  ;;  %v998_v52 = vld [vmem:[#allocation12 + $0x6d8] sm:$0xff]  ;;  %v1001_v58 = vld [vmem:[#allocation12 + $0x720] sm:$0xff] }
 0x4f8   :  { %v6981_v61 = vpack.c.bf16 %v1001_v58, %v1000_v57  ;;  %v803_v57 = vld [vmem:[#allocation12 + $0x4d0] sm:$0xff] }
 0x4f9   :  { %6461 = vmatmul.mubr.msk.f32.vlgmr.msra.gmra.mrb[2].mxu1 %vm196_vm4, %v298_v32  ;;  %v491_v5 = vadd.f32 %v490_v3, %v489_v2  ;;  %v664_v3 = vld [vmem:[#allocation12 + $0x3a8] ss:$0 sm:$0xff] }
 0x4fa   :  { %6924 = vmatpush1.bf16.msra.mxu1 %v6923_v31  ;;  %598 = vmatprep.mubr.f32.mxu1 %v7822_v1 }
 0x4fb   :  { %6926 = vmatprep.subr.bf16.mxu1 %v6925_v33  ;;  %v492_v63 = vmax.f32 %v491_v5, 0.0 }
 0x4fe   :  { %6928 = vmatpush1.bf16.msra.mxu1 %v6927_v38 }
 0x4ff   :  { %6930 = vmatprep.subr.bf16.mxu1 %v6929_v39 }
 0x502   :  { %6932 = vmatpush1.bf16.msra.mxu1 %v6931_v44  ;;  %v644_v44 = vld [vmem:[#allocation12 + $0x332] ss:$8 sm:$0x3] }
 0x503   :  { %6934 = vmatprep.subr.bf16.mxu1 %v6933_v45  ;;  %v634_v45 = vrot.slane %v629_v43, %v7983_v18  ;;  %v649_v49 = vrot.slane %v644_v44, %v7983_v18 }
 0x506   :  { %6936 = vmatpush1.bf16.msra.mxu1 %v6935_v51  ;;  %v653_v51 = vrot.slane %v644_v44, %v7986_v20  ;;  %v793_v44 = vld [vmem:[#allocation12 + $0x458] sm:$0xff] }
 0x507   :  { %6938 = vmatprep.subr.bf16.mxu1 %v6937_v53  ;;  %v999_v53 = vld [vmem:[#allocation12 + $0x6f0] sm:$0xff] }
 0x508   :  { %v6977_v54 = vpack.c.bf16 %v999_v53, %v998_v52  ;;  %v796_v53 = vld [vmem:[#allocation12 + $0x480] sm:$0xff] }
 0x50a   :  { %6940 = vmatpush1.bf16.msra.mxu1 %v6939_v59 }
 0x50b   :  { %6942 = vmatprep.subr.bf16.mxu1 %v6941_v60 }
 0x50e   :  { %6944 = vmatpush1.bf16.msra.mxu1 %v6943_v4 }
 0x50f   :  { %6978 = vmatprep.subr.bf16.mxu1 %v6977_v54 }
 0x511   :  { %5930 = vmatmul.mubr.msk.f32.vlgmr.msra.gmra.mrb[4].mxu1 %vm530_vm7, %v492_v63 }
 0x512   :  { %6980 = vmatpush3.bf16.msra.mxu1 %v6977_v54  ;;  %v798_v54 = vld [vmem:[#allocation12 + $0x498] sm:$0xff] }
 0x513   :  { %6982 = vmatprep.subr.bf16.mxu1 %v6981_v61 }
 0x516   :  { %6984 = vmatpush3.bf16.msra.mxu1 %v6981_v61 }
 0x536   :  { %v6484_v38 = vpop.f32.mrb[4].mxu0 }
 0x537   :  { %v737_v39 = vpop.f32.mrb[5].mxu0  ;;  %v743_v5 = vadd.f32 %v6484_v38, %v664_v3  ;;  %v789_v38 = vld [vmem:[#allocation12 + $0x428] sm:$0xff] }
 0x538   :  { %v738_v4 = vadd.f32 %v737_v39, %v664_v3  ;;  %v791_v39 = vld [vmem:[#allocation12 + $0x440] sm:$0xff] }
 0x539   :  { %v749_v6 = vsel %vm530_vm7, %v743_v5, 0.0 }
 0x53a   :  { %v746_v63 = vsel %vm530_vm7, %v738_v4, 0.0 }
 0x5cc   :  { %v7978_v14 = vpop.f32.mrb[2].mxu1 }
 0x5cd   :  { %v6462_v15 = vpop.f32.mrb[3].mxu1 }
 0x5e4   :  { %v600_v23 = vpop.f32.mrb[4].mxu1 }
 0x5e5   :  { %v601_v24 = vadd.f32 %v600_v23, %v523_v21  ;;  %v602_v25 = vpop.f32.mrb[5].mxu1 }
 0x5e6   :  { %v603_v0 = vadd.f32 %v602_v25, %v527_v22 }
 0x5e7   :  { %v606_v26 = vsel %vm605_vm8, %v601_v24, 0.0 }
 0x5e8   :  { %v608_v27 = vsel %vm607_vm9, %v603_v0, 0.0 }
 0x5e9   :  { %v609_v28 = vadd.f32 %v608_v27, %v606_v26 }
 0x5eb   :  { %610 = vadd.xlane.f32.xlu0 %v609_v28 }
 0x678   :  { %v611_v29 = vpop.xlane.xlu0 %610 }
 0x679   :  { %v613_v30 = vmul.f32 0.0052083335, %v611_v29  ;;  %v780_v29 = vld [vmem:[#allocation12 + $0x3c0] sm:$0xff] }
 0x67b   :  { %v614_v31 = vsub.f32 %v601_v24, %v613_v30  ;;  %v615_v32 = vsub.f32 %v603_v0, %v613_v30  ;;  %v782_v30 = vld [vmem:[#allocation12 + $0x3d8] sm:$0xff] }
 0x67d   :  { %v616_v33 = vmul.f32 %v614_v31, %v614_v31  ;;  %v617_v34 = vmul.f32 %v615_v32, %v615_v32 }
 0x67f   :  { %v618_v35 = vsel %vm605_vm8, %v616_v33, 0.0  ;;  %v619_v36 = vsel %vm607_vm9, %v617_v34, 0.0  ;;  %v787_v33 = vld [vmem:[#allocation12 + $0x410] sm:$0xff] }
 0x680   :  { %v620_v37 = vadd.f32 %v619_v36, %v618_v35  ;;  %v784_v35 = vld [vmem:[#allocation12 + $0x3f0] sm:$0xff]  ;;  %v786_v36 = vld [vmem:[#allocation12 + $0x408] sm:$0xff] }
 0x682   :  { %621 = vadd.xlane.f32.xlu0 %v620_v37  ;;  %v6959_v37 = vpack.c.bf16 %v786_v36, %v784_v35 }
 0x70f   :  { %v622_v40 = vpop.xlane.xlu0 %621 }
 0x710   :  { %v623_v41 = vmul.f32 0.0052083335, %v622_v40  ;;  %v6961_v40 = vpack.c.bf16 %v791_v39, %v789_v38 }
 0x712   :  { %v624_v42 = vadd.f32 1e-05, %v623_v41  ;;  %v788_v41 = vld [vmem:[#allocation12 + $0x420] sm:$0xff] }
 0x714   :  { %7449 = vrsqrt.f32 %v624_v42  ;;  %v790_v42 = vld [vmem:[#allocation12 + $0x438] sm:$0xff] }
 0x715   :  { %v6963_v43 = vpack.c.bf16 %v790_v42, %v788_v41 }
 0x71e   :  { %v7450_v47 = vpop.eup %7449 }
 0x71f   :  { %v626_v48 = vmul.f32 %v7450_v47, %v614_v31  ;;  %v627_v50 = vmul.f32 %v7450_v47, %v615_v32  ;;  %v6955_v31 = vpack.c.bf16 %v782_v30, %v780_v29  ;;  %v785_v32 = vld [vmem:[#allocation12 + $0x3f8] sm:$0xff]  ;;  %v792_v47 = vld [vmem:[#allocation12 + $0x450] sm:$0xff] }
 0x720   :  { %v6957_v34 = vpack.c.bf16 %v787_v33, %v785_v32 }
 0x721   :  { %v641_v55 = vmul.f32 %v634_v45, %v626_v48  ;;  %v642_v56 = vmul.f32 %v638_v46, %v627_v50  ;;  %6956 = vmatpush1.bf16.msra.mxu0 %v6955_v31  ;;  %v795_v45 = vld [vmem:[#allocation12 + $0x470] sm:$0xff]  ;;  %v794_v48 = vld [vmem:[#allocation12 + $0x468] sm:$0xff] }
 0x722   :  { %6958 = vmatprep.subr.bf16.mxu0 %v6957_v34  ;;  %v6965_v46 = vpack.c.bf16 %v795_v45, %v793_v44  ;;  %v797_v50 = vld [vmem:[#allocation12 + $0x488] sm:$0xff] }
 0x723   :  { %v656_v59 = vadd.f32 %v649_v49, %v641_v55  ;;  %v657_v60 = vadd.f32 %v653_v51, %v642_v56  ;;  %v6967_v49 = vpack.c.bf16 %v794_v48, %v792_v47  ;;  %v799_v51 = vld [vmem:[#allocation12 + $0x4a0] sm:$0xff]  ;;  %v6971_v55 = vpack.c.bf16 %v798_v54, %v796_v53  ;;  %v801_v56 = vld [vmem:[#allocation12 + $0x4b8] sm:$0xff] }
 0x724   :  { %v6969_v52 = vpack.c.bf16 %v799_v51, %v797_v50  ;;  %v6973_v58 = vpack.c.bf16 %v803_v57, %v801_v56  ;;  %v8095_v56 = vld [vmem:[#allocation12 + $0x1590] sm:$0xf] }
 0x725   :  { %v658_v62 = vmax.f32 %v656_v59, 0.0  ;;  %v659_v2 = vmax.f32 %v657_v60, 0.0  ;;  %6960 = vmatpush1.bf16.msra.mxu0 %v6959_v37  ;;  %v800_v59 = vld [vmem:[#allocation12 + $0x4b0] sm:$0xff]  ;;  %v802_v60 = vld [vmem:[#allocation12 + $0x4c8] sm:$0xff] }
 0x726   :  { %6962 = vmatprep.subr.bf16.mxu0 %v6961_v40  ;;  %v6975_v61 = vpack.c.bf16 %v802_v60, %v800_v59  ;;  %v8097_v60 = vld [vmem:[#allocation12 + $0x1578] sm:$0xff] }
 0x727   :  { %980 = vrot.lane.b32.xlu1 %v658_v62, %s7824_s9  ;;  %974 = vst.msk [vmem:[#allocation2] sm:$0x3] %vm172_vm3, %v658_v62  ;;  %976 = vrot.lane.b32.xlu0 %v658_v62, %s7825_s10  ;;  %988 = vst.msk [vmem:[#allocation2 + $0x8] sm:$0x3] %vm172_vm3, %v659_v2 }
 0x729   :  { %6964 = vmatpush1.bf16.msra.mxu0 %v6963_v43 }
 0x72a   :  { %6966 = vmatprep.subr.bf16.mxu0 %v6965_v46  ;;  %v805_v46 = vld [vmem:[#allocation12 + $0x4e0] ss:$8 sm:$0x3] }
 0x72b   :  { %984 = vrot.lane.b32.xlu0 %v658_v62, %s7823_s4  ;;  %v8087_v50 = vrot.slane %v805_v46, %v7986_v20 }
 0x72d   :  { %6968 = vmatpush1.bf16.msra.mxu0 %v6967_v49  ;;  %v8084_v49 = vrot.slane %v805_v46, %v7983_v18 }
 0x72e   :  { %6970 = vmatprep.subr.bf16.mxu0 %v6969_v52 }
 0x72f   :  { %990 = vrot.lane.b32.xlu0 %v659_v2, %s7825_s10 }
 0x731   :  { %6972 = vmatpush1.bf16.msra.mxu0 %v6971_v55 }
 0x732   :  { %6974 = vmatprep.subr.bf16.mxu0 %v6973_v58 }
 0x735   :  { %6976 = vmatpush1.bf16.msra.mxu0 %v6975_v61 }
 0x74b   :  { %747 = vadd.xlane.f32.xlu1 %v746_v63 }
 0x74e   :  { %750 = vadd.xlane.f32.xlu0 %v749_v6  ;;  %v1002_v6 = vld [vmem:[#allocation12 + $0x738] ss:$0 sm:$0xff] }
 0x799   :  { %v981_v10 = vpop.permute.xlu1 %980  ;;  %v977_v11 = vpop.permute.xlu0 %976 }
 0x79a   :  { %983 = vst.msk [vmem:[#allocation2 + $0x4] sm:$0x3] %vm172_vm3, %v981_v10  ;;  %979 = vst.msk [vmem:[#allocation2 + $0x2] sm:$0x3] %vm172_vm3, %v977_v11 }
 0x79d   :  { %v985_v12 = vpop.permute.xlu0 %984 }
 0x79e   :  { %987 = vst.msk [vmem:[#allocation2 + $0x6] sm:$0x3] %vm172_vm3, %v985_v12 }
 0x7a1   :  { %v991_v13 = vpop.permute.xlu0 %990 }
 0x7a2   :  { %993 = vst.msk [vmem:[#allocation2 + $0xa] sm:$0x3] %vm172_vm3, %v991_v13  ;;  %v775_v13 = vld [vmem:[#allocation12 + $0x3aa] ss:$0 sm:$0xff] }
 0x7a5   :  { %v8008_v15 = vld [vmem:[#allocation2] sm:$0xff] }
 0x7a6   :  { %6493 = vmatprep.mubr.msk.f32.mxu1 %vm196_vm4, %v8008_v15 }
 0x7a9   :  { %v8012_v16 = vld [vmem:[#allocation2 + $0x8] sm:$0xf] }
 0x7aa   :  { %6494 = vmatmul.mubr.msk.f32.vlgmr.msra.gmra.mrb[6].mxu1 %vm196_vm4, %v8012_v16 }
 0x7d8   :  { %v748_v19 = vpop.xlane.xlu1 %747 }
 0x7d9   :  { %v752_v21 = vmul.f32 0.010416667, %v748_v19 }
 0x7db   :  { %v8016_v22 = vsub.f32 %v738_v4, %v752_v21  ;;  %v751_v23 = vpop.xlane.xlu0 %750 }
 0x7dc   :  { %v753_v24 = vmul.f32 0.010416667, %v751_v23 }
 0x7dd   :  { %v756_v25 = vmul.f32 %v8016_v22, %v8016_v22 }
 0x7de   :  { %v8020_v0 = vsub.f32 %v743_v5, %v753_v24 }
 0x7df   :  { %v758_v26 = vsel %vm530_vm7, %v756_v25, 0.0 }
 0x7e0   :  { %759 = vadd.xlane.f32.xlu0 %v758_v26  ;;  %v757_v27 = vmul.f32 %v8020_v0, %v8020_v0 }
 0x7e2   :  { %v761_v28 = vsel %vm530_vm7, %v757_v27, 0.0 }
 0x7e4   :  { %762 = vadd.xlane.f32.xlu0 %v761_v28 }
 0x86d   :  { %v760_v62 = vpop.xlane.xlu0 %759 }
 0x86e   :  { %v764_v2 = vmul.f32 0.010416667, %v760_v62 }
 0x870   :  { %v766_v3 = vadd.f32 1e-05, %v764_v2 }
 0x871   :  { %v763_v4 = vpop.xlane.xlu0 %762 }
 0x872   :  { %7451 = vrsqrt.f32 %v766_v3  ;;  %v765_v5 = vmul.f32 0.010416667, %v763_v4 }
 0x874   :  { %v767_v63 = vadd.f32 1e-05, %v765_v5 }
 0x876   :  { %7453 = vrsqrt.f32 %v767_v63 }
 0x87c   :  { %v7452_v7 = vpop.eup %7451 }
 0x87d   :  { %v770_v9 = vmul.f32 %v7452_v7, %v8016_v22  ;;  %v6495_v10 = vpop.f32.mrb[6].mxu1 }
 0x87e   :  { %v8027_v11 = vadd.f32 %v6495_v10, %v1002_v6  ;;  %v1075_v12 = vpop.f32.mrb[7].mxu1 }
 0x87f   :  { %v8029_v19 = vadd.f32 %v1075_v12, %v1002_v6  ;;  %v773_v21 = vmul.f32 %v772_v8, %v770_v9 }
 0x880   :  { %v7454_v23 = vpop.eup %7453 }
 0x881   :  { %6500 = vmatprep.mubr.msk.f32.mxu1 %vm1090_vm10, %v8029_v19  ;;  %v8035_v24 = vpack.i.bf16 %v8027_v11, %v8029_v19  ;;  %v776_v25 = vadd.f32 %v775_v13, %v773_v21  ;;  %v771_v22 = vmul.f32 %v7454_v23, %v8020_v0 }
 0x883   :  { %7364 = vrot.lane.b32.xlu1 %v8035_v24, %s7825_s10  ;;  %7369 = vrot.lane.b32.xlu0 %v8035_v24, %s7826_s11  ;;  %v778_v26 = vmax.f32 %v776_v25, 0.0  ;;  %v774_v27 = vmul.f32 %v772_v8, %v771_v22 }
 0x885   :  { %5933 = vmatmul.mubr.msk.f32.vlgmr.msra.gmra.mrb[6].mxu0 %vm530_vm7, %v778_v26  ;;  %v777_v28 = vadd.f32 %v775_v13, %v774_v27 }
 0x886   :  { %893 = vmatprep.mubr.f32.mxu0 %v7822_v1 }
 0x887   :  { %1290 = vrot.lane.b32.xlu1 %v8029_v19, %s7827_s12  ;;  %1495 = vrot.lane.b32.xlu0 %v8029_v19, %s7828_s13  ;;  %v779_v0 = vmax.f32 %v777_v28, 0.0 }
 0x889   :  { %5934 = vmatmul.mubr.msk.f32.gmra.mrb[8].mxu0 %vm530_vm7, %v779_v0 }
 0x88b   :  { %7374 = vrot.lane.b32.xlu1 %v8035_v24, %s7829_s15 }
 0x88f   :  { %1292 = vrot.lane.b32.xlu1 %v8027_v11, %s7827_s12 }
 0x893   :  { %1497 = vrot.lane.b32.xlu1 %v8027_v11, %s7828_s13 }
 0x8f5   :  { %v7370_v29 = vpop.permute.xlu0 %7369  ;;  %v7365_v30 = vpop.permute.xlu1 %7364 }
 0x8f6   :  { %v7372_v31 = vunpack.i.h.bf16 %v7370_v29  ;;  %v7371_v32 = vunpack.i.l.bf16 %v7370_v29  ;;  %v7367_v33 = vunpack.i.h.bf16 %v7365_v30  ;;  %v7366_v34 = vunpack.i.l.bf16 %v7365_v30 }
 0x8f8   :  { %v6997_v36 = vpack.c.bf16 %v7372_v31, %v7371_v32  ;;  %v6985_v37 = vpack.c.bf16 %v7367_v33, %v7366_v34 }
 0x8f9   :  { %v1291_v38 = vpop.permute.xlu1 %1290  ;;  %v1496_v44 = vpop.permute.xlu0 %1495 }
 0x8fa   :  { %6987 = vmatprep.subr.msk.bf16.mxu1 %vm8057_vm11, %v6985_v37  ;;  %6999 = vmatprep.subr.msk.bf16.mxu0 %vm8057_vm11, %v6997_v36 }
 0x8fb   :  { %6514 = vmatprep.mubr.msk.f32.mxu0 %vm1090_vm10, %v1291_v38  ;;  %6990 = vmatpush3.bf16.xpose.msk.msra.mxu1 %vm8057_vm11, %v6985_v37 }
 0x8fc   :  { %7002 = vmatpush3.bf16.xpose.msk.msra.mxu0 %vm8057_vm11, %v6997_v36 }
 0x8fd   :  { %v7375_v39 = vpop.permute.xlu1 %7374 }
 0x8fe   :  { %v7377_v40 = vunpack.i.h.bf16 %v7375_v39  ;;  %v7376_v41 = vunpack.i.l.bf16 %v7375_v39 }
 0x900   :  { %v7009_v42 = vpack.c.bf16 %v7377_v40, %v7376_v41 }
 0x901   :  { %v1293_v43 = vpop.permute.xlu1 %1292 }
 0x902   :  { %6501 = vmatmul.mubr.msk.f32.vlgmr.msra.gmra.mrb[8].mxu1 %vm1090_vm10, %v8027_v11  ;;  %7011 = vmatprep.subr.msk.bf16.mxu0 %vm8057_vm11, %v7009_v42 }
 0x903   :  { %6515 = vmatmul.mubr.msk.f32.vlgmr.msra.gmra.mrb[10].mxu0 %vm1090_vm10, %v1293_v43 }
 0x904   :  { %7014 = vmatpush3.bf16.xpose.msk.msra.mxu0 %vm8057_vm11, %v7009_v42  ;;  %6528 = vmatprep.mubr.msk.f32.mxu0 %vm1090_vm10, %v1496_v44 }
 0x905   :  { %v1498_v45 = vpop.permute.xlu1 %1497 }
 0x90b   :  { %6529 = vmatmul.mubr.msk.f32.vlgmr.msra.gmra.mrb[12].mxu0 %vm1090_vm10, %v1498_v45 }
 0x958   :  { %v8079_v47 = vpop.f32.mrb[6].mxu0 }
 0x959   :  { %v8081_v48 = vpop.f32.mrb[7].mxu0 }
 0x95c   :  { %v895_v51 = vpop.f32.mrb[8].mxu0 }
 0x95d   :  { %v8090_v52 = vadd.f32 %v895_v51, %v8084_v49  ;;  %v897_v53 = vpop.f32.mrb[9].mxu0 }
 0x95e   :  { %v8093_v54 = vadd.f32 %v897_v53, %v8087_v50 }
 0x9d5   :  { %v6502_v55 = vpop.f32.mrb[8].mxu1 }
 0x9d6   :  { %v1175_v57 = vmul.f32 0.35355338, %v6502_v55  ;;  %v6516_v58 = vpop.f32.mrb[10].mxu0  ;;  %v1165_v59 = vpop.f32.mrb[9].mxu1 }
 0x9d7   :  { %v1174_v61 = vmul.f32 0.35355338, %v1165_v59  ;;  %v1372_v62 = vpop.f32.mrb[11].mxu0  ;;  %v1382_v63 = vmul.f32 0.35355338, %v6516_v58 }
 0x9d8   :  { %v1381_v2 = vmul.f32 0.35355338, %v1372_v62  ;;  %v1177_v3 = vadd.f32 %v1175_v57, %v8095_v56 }
 0x9d9   :  { %v1176_v4 = vadd.f32 %v1174_v61, %v8097_v60  ;;  %v1384_v13 = vadd.f32 %v1382_v63, %v8095_v56 }
 0x9da   :  { %v1183_v5 = vsel %vm1182_vm12, %v1177_v3, -inf  ;;  %v1383_v7 = vadd.f32 %v1381_v2, %v8097_v60 }
 0x9db   :  { %1184 = vmax.xlane.f32.xlu1 %v1183_v5  ;;  %v1179_v6 = vsel %vm1178_vm13, %v1176_v4, -inf  ;;  %v1388_v22 = vsel %vm1182_vm12, %v1384_v13, -inf }
 0x9dc   :  { %1180 = vmax.xlane.f32.xlu0 %v1179_v6  ;;  %v1385_v12 = vsel %vm1178_vm13, %v1383_v7, -inf }
 0x9de   :  { %v6530_v8 = vpop.f32.mrb[12].mxu0 }
 0x9df   :  { %v1587_v9 = vmul.f32 0.35355338, %v6530_v8  ;;  %v1577_v10 = vpop.f32.mrb[13].mxu0 }
 0x9e0   :  { %v1586_v21 = vmul.f32 0.35355338, %v1577_v10  ;;  %1386 = vmax.xlane.f32.xlu0 %v1385_v12 }
 0x9e1   :  { %v1589_v23 = vadd.f32 %v1587_v9, %v8095_v56 }
 0x9e2   :  { %v1588_v26 = vadd.f32 %v1586_v21, %v8097_v60 }
 0x9e3   :  { %v1593_v25 = vsel %vm1182_vm12, %v1589_v23, -inf }
 0x9e4   :  { %1594 = vmax.xlane.f32.xlu1 %v1593_v25  ;;  %1389 = vmax.xlane.f32.xlu0 %v1388_v22  ;;  %v1590_v27 = vsel %vm1178_vm13, %v1588_v26, -inf }
 0x9e8   :  { %1591 = vmax.xlane.f32.xlu0 %v1590_v27 }
 0xa68   :  { %v1185_v28 = vpop.xlane.xlu1 %1184 }
 0xa69   :  { %v1187_v0 = vsub.f32 %v1177_v3, %v1185_v28  ;;  %v1181_v29 = vpop.xlane.xlu0 %1180 }
 0xa6a   :  { %v1186_v30 = vsub.f32 %v1176_v4, %v1181_v29 }
 0xa6b   :  { %v1190_v31 = vmul.f32 1.442695, %v1187_v0 }
 0xa6c   :  { %v1188_v32 = vmul.f32 1.442695, %v1186_v30 }
 0xa6d   :  { %7455 = vpow2.f32 %v1190_v31  ;;  %v1387_v33 = vpop.xlane.xlu0 %1386 }
 0xa6e   :  { %7457 = vpow2.f32 %v1188_v32  ;;  %v1391_v34 = vsub.f32 %v1383_v7, %v1387_v33 }
 0xa70   :  { %v1393_v36 = vmul.f32 1.442695, %v1391_v34 }
 0xa71   :  { %v1595_v37 = vpop.xlane.xlu1 %1594  ;;  %v1390_v38 = vpop.xlane.xlu0 %1389 }
 0xa72   :  { %7459 = vpow2.f32 %v1393_v36  ;;  %v1597_v39 = vsub.f32 %v1589_v23, %v1595_v37  ;;  %v1392_v40 = vsub.f32 %v1384_v13, %v1390_v38 }
 0xa74   :  { %v1395_v41 = vmul.f32 1.442695, %v1392_v40  ;;  %v1600_v42 = vmul.f32 1.442695, %v1597_v39 }
 0xa75   :  { %v1592_v43 = vpop.xlane.xlu0 %1591 }
 0xa76   :  { %v1596_v44 = vsub.f32 %v1588_v26, %v1592_v43  ;;  %7461 = vpow2.f32 %v1395_v41 }
 0xa77   :  { %v8111_v45 = vpop.eup %7455  ;;  %7463 = vpow2.f32 %v1600_v42 }
 0xa78   :  { %v7458_v46 = vpop.eup %7457  ;;  %v1598_v51 = vmul.f32 1.442695, %v1596_v44  ;;  %v1195_v53 = vsel %vm1182_vm12, %v8111_v45, 0.0 }
 0xa79   :  { %1196 = vadd.xlane.f32.xlu1 %v1195_v53  ;;  %v1192_v55 = vsel %vm1178_vm13, %v7458_v46, 0.0 }
 0xa7a   :  { %7465 = vpow2.f32 %v1598_v51  ;;  %1193 = vadd.xlane.f32.xlu0 %v1192_v55 }
 0xa7c   :  { %v7460_v57 = vpop.eup %7459 }
 0xa7d   :  { %v1397_v58 = vsel %vm1178_vm13, %v7460_v57, 0.0 }
 0xa7e   :  { %1398 = vadd.xlane.f32.xlu0 %v1397_v58 }
 0xa80   :  { %v8117_v59 = vpop.eup %7461 }
 0xa81   :  { %v1400_v61 = vsel %vm1182_vm12, %v8117_v59, 0.0  ;;  %v8121_v62 = vpop.eup %7463 }
 0xa82   :  { %1401 = vadd.xlane.f32.xlu1 %v1400_v61  ;;  %v1605_v4 = vsel %vm1182_vm12, %v8121_v62, 0.0 }
 0xa84   :  { %v7466_v2 = vpop.eup %7465 }
 0xa85   :  { %v1602_v3 = vsel %vm1178_vm13, %v7466_v2, 0.0 }
 0xa86   :  { %1603 = vadd.xlane.f32.xlu0 %v1602_v3  ;;  %1606 = vadd.xlane.f32.xlu1 %v1605_v4 }
 0xa97   :  { %7384 = vrot.lane.b32.xlu1 %v8035_v24, %s7830_s16 }
 0xa9b   :  { %7389 = vrot.lane.b32.xlu1 %v8035_v24, %s7831_s17 }
 0xa9c   :  { %7379 = vrot.lane.b32.xlu0 %v8035_v24, %s7824_s9 }
 0xa9f   :  { %7394 = vrot.lane.b32.xlu1 %v8035_v24, %s7832_s18 }
 0xaa0   :  { %1700 = vrot.lane.b32.xlu0 %v8029_v19, %s7833_s19 }
 0xaa3   :  { %1702 = vrot.lane.b32.xlu1 %v8027_v11, %s7833_s19  ;;  %v4358_v11 = vld [vmem:[#allocation12 + $0x1500] sm:$0xff] }
 0xb06   :  { %v1197_v63 = vpop.xlane.xlu1 %1196 }
 0xb07   :  { %v1194_v5 = vpop.xlane.xlu0 %1193 }
 0xb08   :  { %7467 = vrcp.f32 %v1194_v5 }
 0xb09   :  { %7469 = vrcp.f32 %v1197_v63 }
 0xb0b   :  { %v1399_v6 = vpop.xlane.xlu0 %1398 }
 0xb0c   :  { %7471 = vrcp.f32 %v1399_v6 }
 0xb0f   :  { %v1402_v7 = vpop.xlane.xlu1 %1401 }
 0xb10   :  { %7473 = vrcp.f32 %v1402_v7 }
 0xb12   :  { %v7468_v8 = vpop.eup %7467 }
 0xb13   :  { %v1604_v9 = vpop.xlane.xlu0 %1603  ;;  %v1200_v10 = vmul.f32 %v7468_v8, %v7458_v46  ;;  %v1607_v12 = vpop.xlane.xlu1 %1606 }
 0xb14   :  { %7475 = vrcp.f32 %v1604_v9  ;;  %v7470_v27 = vpop.eup %7469 }
 0xb15   :  { %6507 = vmatprep.mubr.msk.f32.mxu1 %vm1178_vm13, %v1200_v10  ;;  %7477 = vrcp.f32 %v1607_v12  ;;  %v1201_v32 = vmul.f32 %v7470_v27, %v8111_v45 }
 0xb16   :  { %v7472_v28 = vpop.eup %7471 }
 0xb17   :  { %v7380_v13 = vpop.permute.xlu0 %7379  ;;  %v7385_v19 = vpop.permute.xlu1 %7384  ;;  %v1405_v34 = vmul.f32 %v7472_v28, %v7460_v57 }
 0xb18   :  { %v7382_v21 = vunpack.i.h.bf16 %v7380_v13  ;;  %v7381_v23 = vunpack.i.l.bf16 %v7380_v13  ;;  %v7387_v25 = vunpack.i.h.bf16 %v7385_v19  ;;  %v7386_v22 = vunpack.i.l.bf16 %v7385_v19 }
 0xb1a   :  { %v6991_v26 = vpack.c.bf16 %v7382_v21, %v7381_v23  ;;  %v7003_v0 = vpack.c.bf16 %v7387_v25, %v7386_v22  ;;  %v7474_v33 = vpop.eup %7473 }
 0xb1b   :  { %v7390_v29 = vpop.permute.xlu1 %7389  ;;  %v1406_v41 = vmul.f32 %v7474_v33, %v8117_v59  ;;  %v1701_v46 = vpop.permute.xlu0 %1700  ;;  %v1938_v33 = vld [vmem:[#allocation12 + $0x768] sm:$0xff] }
 0xb1c   :  { %6993 = vmatprep.subr.msk.bf16.mxu1 %vm8140_vm15, %v6991_v26  ;;  %v7392_v30 = vunpack.i.h.bf16 %v7390_v29  ;;  %v7391_v31 = vunpack.i.l.bf16 %v7390_v29 }
 0xb1d   :  { %6996 = vmatpush3.bf16.msk.msra.mxu1 %vm8140_vm15, %v6991_v26 }
 0xb1e   :  { %7005 = vmatprep.subr.msk.bf16.mxu1 %vm8140_vm15, %v7003_v0  ;;  %v7476_v36 = vpop.eup %7475  ;;  %v7015_v37 = vpack.c.bf16 %v7392_v30, %v7391_v31 }
 0xb1f   :  { %v7395_v38 = vpop.permute.xlu1 %7394  ;;  %v7478_v42 = vpop.eup %7477  ;;  %v1610_v43 = vmul.f32 %v7476_v36, %v7466_v2 }
 0xb20   :  { %6508 = vmatmul.mubr.msk.f32.vlgmr.msra.gmra.mrb[10].mxu1 %vm1178_vm13, %v1201_v32  ;;  %v7397_v39 = vunpack.i.h.bf16 %v7395_v38  ;;  %v7396_v40 = vunpack.i.l.bf16 %v7395_v38  ;;  %v1611_v45 = vmul.f32 %v7478_v42, %v8121_v62  ;;  %v1937_v32 = vld [vmem:[#allocation12 + $0x750] sm:$0xff] }
 0xb21   :  { %7008 = vmatpush3.bf16.msk.msra.mxu1 %vm8140_vm15, %v7003_v0  ;;  %6521 = vmatprep.mubr.msk.f32.mxu1 %vm1178_vm13, %v1405_v34  ;;  %v1939_v34 = vld [vmem:[#allocation12 + $0x780] sm:$0xff]  ;;  %v7033_v36 = vpack.c.bf16 %v1938_v33, %v1937_v32  ;;  %v2067_v32 = vld [vmem:[#allocation12 + $0x810] sm:$0xff] }
 0xb22   :  { %7017 = vmatprep.subr.msk.bf16.mxu1 %vm8140_vm15, %v7015_v37  ;;  %v7021_v44 = vpack.c.bf16 %v7397_v39, %v7396_v40 }
 0xb23   :  { %v1703_v51 = vpop.permute.xlu1 %1702 }
 0xb24   :  { %6522 = vmatmul.mubr.msk.f32.vlgmr.msra.gmra.mrb[12].mxu1 %vm1178_vm13, %v1406_v41 }
 0xb25   :  { %7020 = vmatpush3.bf16.msk.msra.mxu1 %vm8140_vm15, %v7015_v37  ;;  %6535 = vmatprep.mubr.msk.f32.mxu1 %vm1178_vm13, %v1610_v43  ;;  %v1940_v37 = vld [vmem:[#allocation12 + $0x798] sm:$0xff] }
 0xb26   :  { %7023 = vmatprep.subr.msk.bf16.mxu1 %vm8057_vm11, %v7021_v44  ;;  %v7037_v38 = vpack.c.bf16 %v1940_v37, %v1939_v34  ;;  %v2069_v37 = vld [vmem:[#allocation12 + $0x820] sm:$0xff] }
 0xb28   :  { %6536 = vmatmul.mubr.msk.f32.vlgmr.msra.gmra.mrb[14].mxu1 %vm1178_vm13, %v1611_v45 }
 0xb29   :  { %6542 = vmatprep.mubr.msk.f32.mxu1 %vm1090_vm10, %v1701_v46 }
 0xb2e   :  { %7026 = vmatpush3.bf16.xpose.msk.msra.mxu1 %vm8057_vm11, %v7021_v44 }
 0xb35   :  { %6543 = vmatmul.mubr.msk.f32.vlgmr.msra.gmra.mrb[16].mxu1 %vm1090_vm10, %v1703_v51 }
 0xb36   :  { %2158 = vmatprep.mubr.f32.mxu1 %v7822_v1 }
 0xbf3   :  { %v8171_v53 = vpop.f32.mrb[10].mxu1 }
 0xbf4   :  { %v8173_v55 = vpop.f32.mrb[11].mxu1 }
 0xbf7   :  { %v6523_v57 = vpop.f32.mrb[12].mxu1 }
 0xbf8   :  { %v1486_v58 = vpop.f32.mrb[13].mxu1 }
 0xbfb   :  { %v6537_v59 = vpop.f32.mrb[14].mxu1 }
 0xbfc   :  { %v1691_v61 = vpop.f32.mrb[15].mxu1 }
 0xc08   :  { %v6544_v62 = vpop.f32.mrb[16].mxu1 }
 0xc09   :  { %v1792_v2 = vmul.f32 0.35355338, %v6544_v62  ;;  %v1782_v3 = vpop.f32.mrb[17].mxu1 }
 0xc0a   :  { %v1791_v4 = vmul.f32 0.35355338, %v1782_v3 }
 0xc0b   :  { %v1794_v5 = vadd.f32 %v1792_v2, %v8095_v56  ;;  %v1941_v2 = vld [vmem:[#allocation12 + $0x7b0] ss:$0 sm:$0xff] }
 0xc0c   :  { %v1793_v63 = vadd.f32 %v1791_v4, %v8097_v60 }
 0xc0d   :  { %v1798_v6 = vsel %vm1182_vm12, %v1794_v5, -inf }
 0xc0e   :  { %1799 = vmax.xlane.f32.xlu1 %v1798_v6  ;;  %v1795_v7 = vsel %vm1178_vm13, %v1793_v63, -inf }
 0xc0f   :  { %1796 = vmax.xlane.f32.xlu0 %v1795_v7 }
 0xc1f   :  { %1907 = vrot.lane.b32.xlu1 %v1486_v58, %s7813_s8 }
 0xc23   :  { %1909 = vrot.lane.b32.xlu1 %v6523_v57, %s7813_s8 }
 0xc27   :  { %1915 = vrot.lane.b32.xlu1 %v1691_v61, %s7835_s20 }
 0xc9b   :  { %v1800_v8 = vpop.xlane.xlu1 %1799 }
 0xc9c   :  { %v1802_v9 = vsub.f32 %v1794_v5, %v1800_v8  ;;  %v1797_v10 = vpop.xlane.xlu0 %1796 }
 0xc9d   :  { %v1801_v12 = vsub.f32 %v1793_v63, %v1797_v10 }
 0xc9e   :  { %v1805_v56 = vmul.f32 1.442695, %v1802_v9 }
 0xc9f   :  { %v1803_v13 = vmul.f32 1.442695, %v1801_v12  ;;  %v1908_v41 = vpop.permute.xlu1 %1907 }
 0xca0   :  { %7479 = vpow2.f32 %v1805_v56  ;;  %v1929_v45 = vsel %vm1090_vm10, %v8173_v55, %v1908_v41 }
 0xca1   :  { %7481 = vpow2.f32 %v1803_v13 }
 0xca3   :  { %v1910_v42 = vpop.permute.xlu1 %1909 }
 0xca4   :  { %v1930_v51 = vsel %vm1090_vm10, %v8171_v53, %v1910_v42  ;;  %v2284_v42 = vld [vmem:[#allocation12 + $0xb40] sm:$0xff] }
 0xca7   :  { %v1916_v44 = vpop.permute.xlu1 %1915 }
 0xca8   :  { %v1932_v57 = vsel %vm1931_vm0, %v1929_v45, %v1916_v44 }
 0xcaa   :  { %v7480_v60 = vpop.eup %7479 }
 0xcab   :  { %v1810_v19 = vsel %vm1182_vm12, %v7480_v60, 0.0  ;;  %v7482_v21 = vpop.eup %7481 }
 0xcac   :  { %1811 = vadd.xlane.f32.xlu0 %v1810_v19  ;;  %v1807_v23 = vsel %vm1178_vm13, %v7482_v21, 0.0 }
 0xcb0   :  { %1808 = vadd.xlane.f32.xlu0 %v1807_v23  ;;  %v2062_v23 = vld [vmem:[#allocation12 + $0x7e8] sm:$0xff] }
 0xcc6   :  { %7399 = vrot.lane.b32.xlu0 %v8035_v24, %s7836_s21 }
 0xcca   :  { %1917 = vrot.lane.b32.xlu0 %v6537_v59, %s7835_s20 }
 0xd39   :  { %v1812_v25 = vpop.xlane.xlu0 %1811 }
 0xd3a   :  { %7483 = vrcp.f32 %v1812_v25 }
 0xd3d   :  { %v1809_v22 = vpop.xlane.xlu0 %1808 }
 0xd3e   :  { %7485 = vrcp.f32 %v1809_v22  ;;  %v2058_v22 = vld [vmem:[#allocation12 + $0x7c8] sm:$0xff] }
 0xd41   :  { %v7400_v26 = vpop.permute.xlu0 %7399 }
 0xd42   :  { %v7402_v27 = vunpack.i.h.bf16 %v7400_v26  ;;  %v7401_v28 = vunpack.i.l.bf16 %v7400_v26  ;;  %v2061_v26 = vld [vmem:[#allocation12 + $0x7e0] sm:$0xff] }
 0xd44   :  { %v7027_v0 = vpack.c.bf16 %v7402_v27, %v7401_v28  ;;  %v7484_v29 = vpop.eup %7483  ;;  %v7043_v27 = vpack.c.bf16 %v2061_v26, %v2058_v22  ;;  %v2065_v28 = vld [vmem:[#allocation12 + $0x800] sm:$0xff] }
 0xd45   :  { %v1816_v24 = vmul.f32 %v7484_v29, %v7480_v60  ;;  %v1918_v43 = vpop.permute.xlu0 %1917  ;;  %v2060_v29 = vld [vmem:[#allocation12 + $0x7d8] sm:$0xff]  ;;  %v2256_v26 = vld [vmem:[#allocation12 + $0x8a0] sm:$0xff] }
 0xd46   :  { %7029 = vmatprep.subr.msk.bf16.mxu0 %vm8140_vm15, %v7027_v0  ;;  %v1933_v59 = vsel %vm1931_vm0, %v1930_v51, %v1918_v43  ;;  %v2285_v43 = vld [vmem:[#allocation12 + $0xb58] sm:$0xff] }
 0xd47   :  { %7032 = vmatpush3.bf16.msk.msra.mxu0 %vm8140_vm15, %v7027_v0  ;;  %v2068_v0 = vld [vmem:[#allocation12 + $0x818] sm:$0xff]  ;;  %v7089_v44 = vpack.c.bf16 %v2285_v43, %v2284_v42  ;;  %v2260_v43 = vld [vmem:[#allocation12 + $0x900] sm:$0xff] }
 0xd48   :  { %v7486_v30 = vpop.eup %7485  ;;  %7034 = vmatprep.subr.bf16.mxu0 %v7033_v36 }
 0xd49   :  { %v1815_v31 = vmul.f32 %v7486_v30, %v7482_v21  ;;  %v7045_v30 = vpack.c.bf16 %v2068_v0, %v2065_v28  ;;  %v2274_v28 = vld [vmem:[#allocation12 + $0xa50] sm:$0xff]  ;;  %v2275_v0 = vld [vmem:[#allocation12 + $0xa68] sm:$0xff] }
 0xd4b   :  { %6549 = vmatprep.mubr.msk.f32.mxu0 %vm1178_vm13, %v1815_v31  ;;  %v2063_v31 = vld [vmem:[#allocation12 + $0x7f0] sm:$0xff] }
 0xd4c   :  { %6550 = vmatmul.mubr.msk.f32.vlgmr.msra.gmra.mrb[14].mxu0 %vm1178_vm13, %v1816_v24  ;;  %v2064_v24 = vld [vmem:[#allocation12 + $0x7f8] sm:$0xff]  ;;  %v7049_v33 = vpack.c.bf16 %v2063_v31, %v2060_v29  ;;  %v2288_v29 = vld [vmem:[#allocation12 + $0xba0] sm:$0xff] }
 0xd4d   :  { %7036 = vmatpush3.bf16.msra.mxu0 %v7033_v36  ;;  %v7047_v34 = vpack.c.bf16 %v2067_v32, %v2064_v24  ;;  %v2066_v36 = vld [vmem:[#allocation12 + $0x808] sm:$0xff]  ;;  %v7069_v24 = vpack.c.bf16 %v2275_v0, %v2274_v28 }
 0xd4e   :  { %7038 = vmatprep.subr.bf16.mxu0 %v7037_v38  ;;  %v2071_v28 = vld [vmem:[#allocation12 + $0x828] ss:$8 sm:$0x7] }
 0xd4f   :  { %v2076_v0 = vrot.slane %v2071_v28, %v7983_v18 }
 0xd51   :  { %7040 = vmatpush3.bf16.msra.mxu0 %v7037_v38  ;;  %v7053_v38 = vpack.c.bf16 %v2069_v37, %v2066_v36  ;;  %v2276_v36 = vld [vmem:[#allocation12 + $0xa80] sm:$0xff]  ;;  %v2277_v37 = vld [vmem:[#allocation12 + $0xa98] sm:$0xff] }
 0xd52   :  { %7050 = vmatprep.subr.bf16.mxu0 %v7049_v33 }
 0xe1f   :  { %v6551_v39 = vpop.f32.mrb[14].mxu0 }
 0xe20   :  { %1925 = vrot.lane.b32.xlu0 %v6551_v39, %s7819_s30  ;;  %v1896_v40 = vpop.f32.mrb[15].mxu0  ;;  %v2268_v39 = vld [vmem:[#allocation12 + $0x9c0] sm:$0xff] }
 0xe21   :  { %1923 = vrot.lane.b32.xlu1 %v1896_v40, %s7819_s30  ;;  %v2269_v40 = vld [vmem:[#allocation12 + $0x9d8] sm:$0xff] }
 0xe22   :  { %v7057_v41 = vpack.c.bf16 %v2269_v40, %v2268_v39  ;;  %v2291_v39 = vld [vmem:[#allocation12 + $0xbe8] sm:$0xff] }
 0xe92   :  { %v1926_v46 = vpop.permute.xlu0 %1925 }
 0xe93   :  { %v1924_v58 = vpop.permute.xlu1 %1923  ;;  %v1936_v62 = vsel %vm1934_vm1, %v1933_v59, %v1926_v46 }
 0xe94   :  { %v1935_v61 = vsel %vm1934_vm1, %v1932_v57, %v1924_v58 }
 0xe95   :  { %6560 = vmatprep.mubr.msk.f32.mxu0 %vm196_vm4, %v1935_v61 }
 0xe96   :  { %6561 = vmatmul.mubr.msk.f32.vlgmr.msra.gmra.mrb[16].mxu0 %vm196_vm4, %v1936_v62  ;;  %v2052_v62 = vld [vmem:[#allocation12 + $0xcc1] ss:$0 sm:$0xff] }
 0xe97   :  { %7052 = vmatpush3.bf16.msra.mxu0 %v7049_v33  ;;  %v2258_v33 = vld [vmem:[#allocation12 + $0x8d0] sm:$0xff] }
 0xe98   :  { %7054 = vmatprep.subr.bf16.mxu0 %v7053_v38 }
 0xe9b   :  { %7056 = vmatpush3.bf16.msra.mxu0 %v7053_v38  ;;  %v2290_v38 = vld [vmem:[#allocation12 + $0xbd0] sm:$0xff] }
 0xe9c   :  { %7090 = vmatprep.subr.bf16.mxu0 %v7089_v44  ;;  %v7101_v42 = vpack.c.bf16 %v2291_v39, %v2290_v38 }
 0xf69   :  { %v6562_v3 = vpop.f32.mrb[16].mxu0 }
 0xf6a   :  { %v2020_v55 = vadd.f32 %v6562_v3, %v1941_v2  ;;  %v2014_v4 = vpop.f32.mrb[17].mxu0  ;;  %v2252_v3 = vld [vmem:[#allocation12 + $0x840] sm:$0xff] }
 0xf6b   :  { %v2015_v5 = vadd.f32 %v2014_v4, %v1941_v2  ;;  %v2055_v4 = vld [vmem:[#allocation12 + $0xcc2] ss:$0 sm:$0xff] }
 0xf6c   :  { %v2024_v53 = vadd.f32 %v2020_v55, %v8012_v16  ;;  %v2253_v55 = vld [vmem:[#allocation12 + $0x858] sm:$0xff] }
 0xf6d   :  { %v2023_v63 = vadd.f32 %v2015_v5, %v8008_v15  ;;  %v2059_v15 = vld [vmem:[#allocation12 + $0x7d0] sm:$0xff] }
 0xf6e   :  { %v2029_v6 = vsel %vm2028_vm2, %v2024_v53, 0.0  ;;  %v7041_v25 = vpack.c.bf16 %v2062_v23, %v2059_v15  ;;  %v2270_v5 = vld [vmem:[#allocation12 + $0x9f0] sm:$0xff]  ;;  %v2287_v15 = vld [vmem:[#allocation12 + $0xb88] sm:$0xff] }
 0xf6f   :  { %2030 = vadd.xlane.f32.xlu0 %v2029_v6  ;;  %v2025_v7 = vsel %vm196_vm4, %v2023_v63, 0.0 }
 0xf70   :  { %2026 = vadd.xlane.f32.xlu1 %v2025_v7  ;;  %7042 = vmatprep.subr.bf16.mxu1 %v7041_v25  ;;  %v7059_v7 = vpack.c.bf16 %v2253_v55, %v2252_v3  ;;  %v2280_v3 = vld [vmem:[#allocation12 + $0xae0] sm:$0xff]  ;;  %v2281_v55 = vld [vmem:[#allocation12 + $0xaf8] sm:$0xff] }
 0xf71   :  { %7044 = vmatpush1.bf16.msra.mxu1 %v7043_v27  ;;  %v2257_v27 = vld [vmem:[#allocation12 + $0x8b8] sm:$0xff] }
 0xf72   :  { %7046 = vmatprep.subr.bf16.mxu1 %v7045_v30  ;;  %v2289_v30 = vld [vmem:[#allocation12 + $0xbb8] sm:$0xff]  ;;  %v7067_v31 = vpack.c.bf16 %v2257_v27, %v2256_v26  ;;  %v2299_v26 = vld [vmem:[#allocation12 + $0xca8] sm:$0xff] }
 0xf73   :  { %v7097_v32 = vpack.c.bf16 %v2289_v30, %v2288_v29  ;;  %v8226_v29 = vsub.s32 2, %v7980_v17  ;;  %v2080_v30 = vrot.slane %v2071_v28, %v7986_v20 }
 0xf75   :  { %7048 = vmatpush1.bf16.msra.mxu1 %v7047_v34  ;;  %v2259_v34 = vld [vmem:[#allocation12 + $0x8e8] sm:$0xff] }
 0xf76   :  { %7058 = vmatprep.subr.bf16.mxu1 %v7057_v41  ;;  %v7071_v40 = vpack.c.bf16 %v2259_v34, %v2258_v33  ;;  %v7073_v41 = vpack.c.bf16 %v2277_v37, %v2276_v36  ;;  %v2084_v33 = vrot.slane %v2071_v28, %v8226_v29  ;;  %v2486_v28 = vld [vmem:[#allocation12 + $0xcf0] sm:$0xff] }
 0xffc   :  { %v2031_v8 = vpop.xlane.xlu0 %2030 }
 0xffd   :  { %v2033_v9 = vmul.f32 0.03125, %v2031_v8  ;;  %v2027_v10 = vpop.xlane.xlu1 %2026 }
 0xffe   :  { %v2032_v12 = vmul.f32 0.03125, %v2027_v10 }
 0xfff   :  { %v2035_v56 = vsub.f32 %v2024_v53, %v2033_v9  ;;  %v2271_v53 = vld [vmem:[#allocation12 + $0xa08] sm:$0xff] }
0x1000   :  { %v2034_v13 = vsub.f32 %v2023_v63, %v2032_v12  ;;  %v7061_v10 = vpack.c.bf16 %v2271_v53, %v2270_v5  ;;  %v2254_v12 = vld [vmem:[#allocation12 + $0x870] sm:$0xff]  ;;  %v2295_v5 = vld [vmem:[#allocation12 + $0xc48] sm:$0xff] }
0x1001   :  { %v2037_v21 = vmul.f32 %v2035_v56, %v2035_v56 }
0x1002   :  { %v2036_v60 = vmul.f32 %v2034_v13, %v2034_v13 }
0x1003   :  { %v2041_v16 = vsel %vm2028_vm2, %v2037_v21, 0.0  ;;  %v2273_v21 = vld [vmem:[#allocation12 + $0xa38] sm:$0xff] }
0x1004   :  { %v2038_v19 = vsel %vm196_vm4, %v2036_v60, 0.0  ;;  %v2255_v60 = vld [vmem:[#allocation12 + $0x888] sm:$0xff] }
0x1005   :  { %2039 = vadd.xlane.f32.xlu0 %v2038_v19  ;;  %v2272_v19 = vld [vmem:[#allocation12 + $0xa20] sm:$0xff]  ;;  %v7063_v23 = vpack.c.bf16 %v2255_v60, %v2254_v12  ;;  %v2282_v12 = vld [vmem:[#allocation12 + $0xb10] sm:$0xff]  ;;  %v2283_v60 = vld [vmem:[#allocation12 + $0xb28] sm:$0xff] }
0x1009   :  { %2042 = vadd.xlane.f32.xlu0 %v2041_v16  ;;  %v2286_v16 = vld [vmem:[#allocation12 + $0xb70] sm:$0xff] }
0x100a   :  { %v7093_v22 = vpack.c.bf16 %v2287_v15, %v2286_v16  ;;  %v2297_v16 = vld [vmem:[#allocation12 + $0xc78] sm:$0xff]  ;;  %v2266_v15 = vld [vmem:[#allocation12 + $0x990] sm:$0xff] }
0x1092   :  { %v2040_v45 = vpop.xlane.xlu0 %2039 }
0x1093   :  { %v2044_v46 = vmul.f32 0.03125, %v2040_v45  ;;  %v2278_v45 = vld [vmem:[#allocation12 + $0xab0] sm:$0xff] }
0x1095   :  { %v2046_v51 = vadd.f32 1e-05, %v2044_v46  ;;  %v2279_v46 = vld [vmem:[#allocation12 + $0xac8] sm:$0xff] }
0x1096   :  { %v2043_v57 = vpop.xlane.xlu0 %2042 }
0x1097   :  { %7487 = vrsqrt.f32 %v2046_v51  ;;  %v2045_v58 = vmul.f32 0.03125, %v2043_v57  ;;  %v2292_v51 = vld [vmem:[#allocation12 + $0xc00] sm:$0xff]  ;;  %v2293_v57 = vld [vmem:[#allocation12 + $0xc18] sm:$0xff] }
0x1099   :  { %v2047_v59 = vadd.f32 1e-05, %v2045_v58 }
0x109b   :  { %7489 = vrsqrt.f32 %v2047_v59  ;;  %v7077_v59 = vpack.c.bf16 %v2279_v46, %v2278_v45 }
0x10a1   :  { %v7488_v61 = vpop.eup %7487 }
0x10a2   :  { %v2050_v2 = vmul.f32 %v7488_v61, %v2034_v13  ;;  %v7105_v61 = vpack.c.bf16 %v2293_v57, %v2292_v51 }
0x10a4   :  { %v2053_v63 = vmul.f32 %v2052_v62, %v2050_v2  ;;  %v2263_v2 = vld [vmem:[#allocation12 + $0x948] sm:$0xff] }
0x10a5   :  { %v7490_v6 = vpop.eup %7489 }
0x10a6   :  { %v8211_v8 = vadd.f32 %v2055_v4, %v2053_v63  ;;  %v2051_v9 = vmul.f32 %v7490_v6, %v2035_v56  ;;  %v7065_v56 = vpack.c.bf16 %v2273_v21, %v2272_v19  ;;  %v7081_v63 = vpack.c.bf16 %v2281_v55, %v2280_v3  ;;  %v2296_v19 = vld [vmem:[#allocation12 + $0xc60] sm:$0xff] }
0x10a7   :  { %v7085_v21 = vpack.c.bf16 %v2283_v60, %v2282_v12 }
0x10a8   :  { %5967 = vmatmul.mubr.msk.f32.vlgmr.msra.gmra.mrb[18].mxu1 %vm196_vm4, %v8211_v8  ;;  %6571 = vmatprep.mubr.msk.f32.mxu0 %vm196_vm4, %v8211_v8  ;;  %v2054_v13 = vmul.f32 %v2052_v62, %v2051_v9  ;;  %v2262_v62 = vld [vmem:[#allocation12 + $0x930] sm:$0xff]  ;;  %v2265_v9 = vld [vmem:[#allocation12 + $0x978] sm:$0xff] }
0x10a9   :  { %2164 = vmatprep.mubr.f32.mxu1 %v7822_v1  ;;  %7060 = vmatpush3.bf16.msra.mxu1 %v7059_v7  ;;  %v7079_v53 = vpack.c.bf16 %v2263_v2, %v2262_v62  ;;  %v2264_v7 = vld [vmem:[#allocation12 + $0x960] sm:$0xff] }
0x10aa   :  { %v8218_v25 = vadd.f32 %v2055_v4, %v2054_v13  ;;  %7062 = vmatprep.subr.bf16.mxu1 %v7061_v10  ;;  %v2294_v4 = vld [vmem:[#allocation12 + $0xc30] sm:$0xff]  ;;  %v7083_v10 = vpack.c.bf16 %v2265_v9, %v2264_v7  ;;  %v2267_v13 = vld [vmem:[#allocation12 + $0x9a8] sm:$0xff] }
0x10ab   :  { %v7109_v6 = vpack.c.bf16 %v2295_v5, %v2294_v4 }
0x10ac   :  { %5968 = vmatmul.mubr.msk.f32.gmra.mrb[20].mxu1 %vm196_vm4, %v8218_v25  ;;  %6572 = vmatmul.mubr.msk.f32.vlgmr.msra.gmra.mrb[18].mxu0 %vm196_vm4, %v8218_v25 }
0x10ad   :  { %7064 = vmatpush3.bf16.msra.mxu1 %v7063_v23  ;;  %7092 = vmatpush3.bf16.msra.mxu0 %v7089_v44  ;;  %v2261_v44 = vld [vmem:[#allocation12 + $0x918] sm:$0xff]  ;;  %v7113_v23 = vpack.c.bf16 %v2297_v16, %v2296_v19 }
0x10ae   :  { %7066 = vmatprep.subr.bf16.mxu1 %v7065_v56  ;;  %7094 = vmatprep.subr.bf16.mxu0 %v7093_v22  ;;  %v7075_v58 = vpack.c.bf16 %v2261_v44, %v2260_v43  ;;  %v7087_v56 = vpack.c.bf16 %v2267_v13, %v2266_v15 }
0x10b1   :  { %7068 = vmatpush3.bf16.msra.mxu1 %v7067_v31  ;;  %7096 = vmatpush3.bf16.msra.mxu0 %v7093_v22  ;;  %v2298_v22 = vld [vmem:[#allocation12 + $0xc90] sm:$0xff] }
0x10b2   :  { %7070 = vmatprep.subr.bf16.mxu1 %v7069_v24  ;;  %7098 = vmatprep.subr.bf16.mxu0 %v7097_v32  ;;  %v7117_v27 = vpack.c.bf16 %v2299_v26, %v2298_v22 }
0x10b5   :  { %7072 = vmatpush3.bf16.msra.mxu1 %v7071_v40  ;;  %7100 = vmatpush3.bf16.msra.mxu0 %v7097_v32 }
0x10b6   :  { %7074 = vmatprep.subr.bf16.mxu1 %v7073_v41  ;;  %7102 = vmatprep.subr.bf16.mxu0 %v7101_v42 }
0x10b9   :  { %7076 = vmatpush3.bf16.msra.mxu1 %v7075_v58  ;;  %7104 = vmatpush3.bf16.msra.mxu0 %v7101_v42 }
0x10ba   :  { %7078 = vmatprep.subr.bf16.mxu1 %v7077_v59  ;;  %7106 = vmatprep.subr.bf16.mxu0 %v7105_v61 }
0x10bd   :  { %7080 = vmatpush3.bf16.msra.mxu1 %v7079_v53  ;;  %7108 = vmatpush3.bf16.msra.mxu0 %v7105_v61  ;;  %v2300_v61 = vld [vmem:[#allocation12 + $0xcc0] ss:$0 sm:$0xff] }
0x10be   :  { %7082 = vmatprep.subr.bf16.mxu1 %v7081_v63  ;;  %7110 = vmatprep.subr.bf16.mxu0 %v7109_v6 }
0x10c1   :  { %7112 = vmatpush3.bf16.msra.mxu0 %v7109_v6  ;;  %7084 = vmatpush3.bf16.msra.mxu1 %v7083_v10 }
0x10c2   :  { %7086 = vmatprep.subr.bf16.mxu1 %v7085_v21  ;;  %7114 = vmatprep.subr.bf16.mxu0 %v7113_v23 }
0x10c5   :  { %7088 = vmatpush3.bf16.msra.mxu1 %v7087_v56  ;;  %7116 = vmatpush3.bf16.msra.mxu0 %v7113_v23 }
0x10c6   :  { %7118 = vmatprep.subr.bf16.mxu0 %v7117_v27 }
0x10c9   :  { %7120 = vmatpush3.bf16.msra.mxu0 %v7117_v27  ;;  %v2485_v27 = vld [vmem:[#allocation12 + $0xcd8] sm:$0xff] }
0x117b   :  { %v2160_v31 = vpop.f32.mrb[18].mxu1 }
0x117c   :  { %v2161_v24 = vadd.f32 %v2160_v31, %v2076_v0  ;;  %v2162_v32 = vpop.f32.mrb[19].mxu1 }
0x117d   :  { %v2163_v34 = vadd.f32 %v2162_v32, %v2080_v30 }
0x117e   :  { %v2246_v39 = vmax.f32 %v2161_v24, 0.0 }
0x117f   :  { %v2247_v36 = vmax.f32 %v2163_v34, 0.0  ;;  %v2166_v37 = vpop.f32.mrb[20].mxu1  ;;  %v6573_v38 = vpop.f32.mrb[18].mxu0 }
0x1180   :  { %v2167_v40 = vadd.f32 %v2166_v37, %v2076_v0  ;;  %v2243_v41 = vadd.f32 %v6573_v38, %v2084_v33  ;;  %v2168_v42 = vpop.f32.mrb[21].mxu1  ;;  %v2237_v43 = vpop.f32.mrb[19].mxu0  ;;  %v7121_v0 = vpack.c.bf16 %v2486_v28, %v2485_v27 }
0x1181   :  { %v2169_v44 = vadd.f32 %v2168_v42, %v2080_v30  ;;  %v2238_v45 = vadd.f32 %v2237_v43, %v2084_v33  ;;  %2365 = vmatprep.mubr.f32.mxu1 %v2247_v36  ;;  %v2488_v30 = vld [vmem:[#allocation12 + $0xd20] sm:$0xff] }
0x1182   :  { %2366 = vmatmul.mubr.f32.vlgmr.msra.gmra.mrb[22].mxu1 %v2246_v39  ;;  %v2249_v51 = vmax.f32 %v2167_v40, 0.0  ;;  %v2251_v57 = vmax.f32 %v2243_v41, 0.0  ;;  %7122 = vmatprep.subr.bf16.mxu1 %v7121_v0  ;;  %v2479_v39 = vld [vmem:[#allocation12 + $0xcc3] ss:$0 sm:$0xff]  ;;  %v2482_v41 = vld [vmem:[#allocation12 + $0xcc4] ss:$0 sm:$0xff] }
0x1183   :  { %v2250_v17 = vmax.f32 %v2169_v44, 0.0  ;;  %v2248_v46 = vmax.f32 %v2238_v45, 0.0  ;;  %7124 = vmatpush3.bf16.msra.mxu1 %v7121_v0 }
0x1185   :  { %2370 = vmatprep.mubr.f32.mxu1 %v2250_v17  ;;  %6606 = vmatprep.mubr.f32.mxu0 %v2248_v46 }
0x1186   :  { %2371 = vmatmul.mubr.f32.gmra.mrb[24].mxu1 %v2249_v51  ;;  %6607 = vmatmul.mubr.f32.vlgmr.msra.gmra.mrb[20].mxu0 %v2251_v57  ;;  %v2489_v51 = vld [vmem:[#allocation12 + $0xd38] ss:$0 sm:$0xff] }
0x1255   :  { %v6197_v58 = vpop.f32.mrb[22].mxu1 }
0x1256   :  { %v6198_v59 = vpop.f32.mrb[23].mxu1 }
0x1257   :  { %v6199_v62 = vadd.f32 %v6198_v59, %v6197_v58 }
0x1259   :  { %v6200_v2 = vpop.f32.mrb[24].mxu1  ;;  %v6608_v3 = vpop.f32.mrb[20].mxu0  ;;  %v2368_v55 = vadd.f32 %v6199_v62, %v2300_v61 }
0x125a   :  { %v6201_v4 = vpop.f32.mrb[25].mxu1  ;;  %v2442_v5 = vpop.f32.mrb[21].mxu0 }
0x125b   :  { %v6202_v53 = vadd.f32 %v6201_v4, %v6200_v2  ;;  %v2443_v63 = vadd.f32 %v2442_v5, %v2368_v55 }
0x125d   :  { %v2373_v6 = vadd.f32 %v6202_v53, %v2300_v61  ;;  %v2451_v7 = vadd.f32 %v2443_v63, %v8211_v8 }
0x125f   :  { %v2453_v9 = vsel %vm196_vm4, %v2451_v7, 0.0  ;;  %v2448_v10 = vadd.f32 %v6608_v3, %v2373_v6 }
0x1260   :  { %2454 = vadd.xlane.f32.xlu1 %v2453_v9 }
0x1261   :  { %v2452_v12 = vadd.f32 %v2448_v10, %v8218_v25  ;;  %v2487_v25 = vld [vmem:[#allocation12 + $0xd08] sm:$0xff] }
0x1262   :  { %v7125_v31 = vpack.c.bf16 %v2488_v30, %v2487_v25 }
0x1263   :  { %v2456_v60 = vsel %vm2028_vm2, %v2452_v12, 0.0 }
0x1264   :  { %2457 = vadd.xlane.f32.xlu0 %v2456_v60  ;;  %7126 = vmatprep.subr.bf16.mxu1 %v7125_v31  ;;  %v8272_v60 = vld [vmem:[#allocation12 + $0x1578] sm:$0xff] }
0x1265   :  { %7128 = vmatpush3.bf16.msra.mxu1 %v7125_v31 }
0x12ed   :  { %v2455_v19 = vpop.xlane.xlu1 %2454 }
0x12ee   :  { %v2459_v21 = vmul.f32 0.03125, %v2455_v19 }
0x12f0   :  { %v2461_v16 = vsub.f32 %v2451_v7, %v2459_v21 }
0x12f1   :  { %v2458_v15 = vpop.xlane.xlu0 %2457 }
0x12f2   :  { %v2460_v13 = vmul.f32 0.03125, %v2458_v15  ;;  %v2463_v23 = vmul.f32 %v2461_v16, %v2461_v16 }
0x12f4   :  { %v2462_v56 = vsub.f32 %v2452_v12, %v2460_v13  ;;  %v2465_v22 = vsel %vm196_vm4, %v2463_v23, 0.0 }
0x12f5   :  { %2466 = vadd.xlane.f32.xlu1 %v2465_v22 }
0x12f6   :  { %v2464_v8 = vmul.f32 %v2462_v56, %v2462_v56 }
0x12f8   :  { %v2468_v26 = vsel %vm2028_vm2, %v2464_v8, 0.0 }
0x12f9   :  { %2469 = vadd.xlane.f32.xlu0 %v2468_v26 }
0x1382   :  { %v2467_v24 = vpop.xlane.xlu1 %2466 }
0x1383   :  { %v2471_v32 = vmul.f32 0.03125, %v2467_v24 }
0x1385   :  { %v2473_v33 = vadd.f32 1e-05, %v2471_v32 }
0x1386   :  { %v2470_v34 = vpop.xlane.xlu0 %2469 }
0x1387   :  { %7491 = vrsqrt.f32 %v2473_v33  ;;  %v2472_v36 = vmul.f32 0.03125, %v2470_v34 }
0x1389   :  { %v2474_v37 = vadd.f32 1e-05, %v2472_v36 }
0x138b   :  { %7493 = vrsqrt.f32 %v2474_v37 }
0x1391   :  { %v7492_v38 = vpop.eup %7491 }
0x1392   :  { %v2477_v40 = vmul.f32 %v7492_v38, %v2461_v16  ;;  %v8276_v16 = vld [vmem:[#allocation12 + $0x1590] sm:$0xf] }
0x1394   :  { %v2480_v42 = vmul.f32 %v2479_v39, %v2477_v40 }
0x1395   :  { %v7494_v43 = vpop.eup %7493 }
0x1396   :  { %v2478_v44 = vmul.f32 %v7494_v43, %v2462_v56  ;;  %v8236_v45 = vadd.f32 %v2482_v41, %v2480_v42 }
0x1398   :  { %v2481_v17 = vmul.f32 %v2479_v39, %v2478_v44  ;;  %6617 = vmatprep.mubr.msk.f32.mxu1 %vm196_vm4, %v8236_v45 }
0x139a   :  { %v8240_v46 = vadd.f32 %v2482_v41, %v2481_v17 }
0x139c   :  { %6618 = vmatmul.mubr.msk.f32.vlgmr.msra.gmra.mrb[26].mxu1 %vm196_vm4, %v8240_v46 }
0x146f   :  { %v6619_v57 = vpop.f32.mrb[26].mxu1 }
0x1470   :  { %v8244_v58 = vadd.f32 %v6619_v57, %v2489_v51  ;;  %v2562_v59 = vpop.f32.mrb[27].mxu1 }
0x1471   :  { %v8246_v61 = vadd.f32 %v2562_v59, %v2489_v51 }
0x1473   :  { %6624 = vmatprep.mubr.msk.f32.mxu0 %vm1090_vm10, %v8246_v61  ;;  %v8252_v62 = vpack.i.bf16 %v8244_v58, %v8246_v61 }
0x1475   :  { %7404 = vrot.lane.b32.xlu1 %v8252_v62, %s7825_s10 }
0x1479   :  { %7409 = vrot.lane.b32.xlu1 %v8252_v62, %s7824_s9 }
0x147d   :  { %2774 = vrot.lane.b32.xlu1 %v8246_v61, %s7827_s12 }
0x1481   :  { %2776 = vrot.lane.b32.xlu1 %v8244_v58, %s7827_s12 }
0x14e7   :  { %v7405_v2 = vpop.permute.xlu1 %7404 }
0x14e8   :  { %v7407_v3 = vunpack.i.h.bf16 %v7405_v2  ;;  %v7406_v55 = vunpack.i.l.bf16 %v7405_v2 }
0x14ea   :  { %v7129_v4 = vpack.c.bf16 %v7407_v3, %v7406_v55 }
0x14eb   :  { %v7410_v5 = vpop.permute.xlu1 %7409 }
0x14ec   :  { %v7412_v53 = vunpack.i.h.bf16 %v7410_v5  ;;  %v7411_v63 = vunpack.i.l.bf16 %v7410_v5  ;;  %7131 = vmatprep.subr.msk.bf16.mxu0 %vm8057_vm11, %v7129_v4 }
0x14ed   :  { %7134 = vmatpush3.bf16.xpose.msk.msra.mxu0 %vm8057_vm11, %v7129_v4 }
0x14ee   :  { %v7135_v6 = vpack.c.bf16 %v7412_v53, %v7411_v63 }
0x14ef   :  { %v2775_v41 = vpop.permute.xlu1 %2774 }
0x14f0   :  { %7137 = vmatprep.subr.msk.bf16.mxu1 %vm8140_vm15, %v7135_v6 }
0x14f1   :  { %7140 = vmatpush3.bf16.msk.msra.mxu1 %vm8140_vm15, %v7135_v6 }
0x14f3   :  { %v2777_v42 = vpop.permute.xlu1 %2776 }
0x14f4   :  { %6625 = vmatmul.mubr.msk.f32.vlgmr.msra.gmra.mrb[22].mxu0 %vm1090_vm10, %v8244_v58 }
0x15c7   :  { %v6626_v7 = vpop.f32.mrb[22].mxu0 }
0x15c8   :  { %v2651_v9 = vpop.f32.mrb[23].mxu0  ;;  %v2661_v10 = vmul.f32 0.35355338, %v6626_v7 }
0x15c9   :  { %v2660_v12 = vmul.f32 0.35355338, %v2651_v9 }
0x15ca   :  { %v2663_v15 = vadd.f32 %v8276_v16, %v2661_v10 }
0x15cb   :  { %v2662_v19 = vadd.f32 %v8272_v60, %v2660_v12 }
0x15cc   :  { %v2667_v13 = vsel %vm1182_vm12, %v2663_v15, -inf }
0x15cd   :  { %v2664_v21 = vsel %vm1178_vm13, %v2662_v19, -inf }
0x15ce   :  { %2665 = vmax.xlane.f32.xlu0 %v2664_v21 }
0x15d2   :  { %2668 = vmax.xlane.f32.xlu0 %v2667_v13 }
0x165b   :  { %v2666_v23 = vpop.xlane.xlu0 %2665 }
0x165c   :  { %v2670_v56 = vsub.f32 %v2662_v19, %v2666_v23 }
0x165e   :  { %v2672_v26 = vmul.f32 1.442695, %v2670_v56 }
0x165f   :  { %v2669_v22 = vpop.xlane.xlu0 %2668 }
0x1660   :  { %v2671_v8 = vsub.f32 %v2663_v15, %v2669_v22 }
0x1662   :  { %v2674_v27 = vmul.f32 1.442695, %v2671_v8 }
0x1664   :  { %7495 = vpow2.f32 %v2674_v27 }
0x1665   :  { %7497 = vpow2.f32 %v2672_v26 }
0x166e   :  { %v7496_v28 = vpop.eup %7495 }
0x166f   :  { %v2679_v25 = vsel %vm1182_vm12, %v7496_v28, 0.0  ;;  %v7498_v0 = vpop.eup %7497 }
0x1670   :  { %2680 = vadd.xlane.f32.xlu0 %v2679_v25  ;;  %v2676_v30 = vsel %vm1178_vm13, %v7498_v0, 0.0 }
0x1674   :  { %2677 = vadd.xlane.f32.xlu0 %v2676_v30 }
0x168a   :  { %7414 = vrot.lane.b32.xlu0 %v8252_v62, %s7826_s11 }
0x16fd   :  { %v2681_v31 = vpop.xlane.xlu0 %2680 }
0x16fe   :  { %7499 = vrcp.f32 %v2681_v31 }
0x1701   :  { %v2678_v24 = vpop.xlane.xlu0 %2677 }
0x1702   :  { %7501 = vrcp.f32 %v2678_v24 }
0x1705   :  { %v7415_v32 = vpop.permute.xlu0 %7414 }
0x1706   :  { %v7417_v33 = vunpack.i.h.bf16 %v7415_v32  ;;  %v7416_v34 = vunpack.i.l.bf16 %v7415_v32 }
0x1708   :  { %v7141_v36 = vpack.c.bf16 %v7417_v33, %v7416_v34  ;;  %v7500_v37 = vpop.eup %7499 }
0x1709   :  { %v2685_v40 = vmul.f32 %v7500_v37, %v7496_v28 }
0x170a   :  { %7143 = vmatprep.subr.msk.bf16.mxu1 %vm8057_vm11, %v7141_v36 }
0x170c   :  { %v7502_v38 = vpop.eup %7501 }
0x170d   :  { %v2684_v39 = vmul.f32 %v7502_v38, %v7498_v0 }
0x170f   :  { %6631 = vmatprep.mubr.msk.f32.mxu1 %vm1178_vm13, %v2684_v39 }
0x1710   :  { %6632 = vmatmul.mubr.msk.f32.vlgmr.msra.gmra.mrb[28].mxu1 %vm1178_vm13, %v2685_v40 }
0x1711   :  { %7146 = vmatpush3.bf16.xpose.msk.msra.mxu1 %vm8057_vm11, %v7141_v36  ;;  %6638 = vmatprep.mubr.msk.f32.mxu1 %vm1090_vm10, %v2775_v41 }
0x1718   :  { %6639 = vmatmul.mubr.msk.f32.vlgmr.msra.gmra.mrb[30].mxu1 %vm1090_vm10, %v2777_v42 }
0x17e3   :  { %v8292_v43 = vpop.f32.mrb[28].mxu1 }
0x17e4   :  { %v8294_v44 = vpop.f32.mrb[29].mxu1 }
0x17eb   :  { %v6640_v17 = vpop.f32.mrb[30].mxu1 }
0x17ec   :  { %v2866_v51 = vmul.f32 0.35355338, %v6640_v17  ;;  %v2856_v57 = vpop.f32.mrb[31].mxu1 }
0x17ed   :  { %v2865_v59 = vmul.f32 0.35355338, %v2856_v57 }
0x17ee   :  { %v2868_v2 = vadd.f32 %v8276_v16, %v2866_v51 }
0x17ef   :  { %v2867_v3 = vadd.f32 %v8272_v60, %v2865_v59 }
0x17f0   :  { %v2872_v55 = vsel %vm1182_vm12, %v2868_v2, -inf }
0x17f1   :  { %2873 = vmax.xlane.f32.xlu0 %v2872_v55  ;;  %v2869_v4 = vsel %vm1178_vm13, %v2867_v3, -inf }
0x17f2   :  { %2870 = vmax.xlane.f32.xlu1 %v2869_v4 }
0x1803   :  { %7424 = vrot.lane.b32.xlu1 %v8252_v62, %s7829_s15 }
0x1807   :  { %7419 = vrot.lane.b32.xlu0 %v8252_v62, %s7830_s16  ;;  %2979 = vrot.lane.b32.xlu1 %v8246_v61, %s7828_s13 }
0x187e   :  { %v2874_v5 = vpop.xlane.xlu0 %2873 }
0x187f   :  { %v2876_v53 = vsub.f32 %v2868_v2, %v2874_v5  ;;  %v2871_v63 = vpop.xlane.xlu1 %2870 }
0x1880   :  { %v2875_v6 = vsub.f32 %v2867_v3, %v2871_v63 }
0x1881   :  { %v2879_v7 = vmul.f32 1.442695, %v2876_v53 }
0x1882   :  { %v2877_v9 = vmul.f32 1.442695, %v2875_v6  ;;  %v7420_v10 = vpop.permute.xlu0 %7419 }
0x1883   :  { %7503 = vpow2.f32 %v2879_v7  ;;  %v7422_v12 = vunpack.i.h.bf16 %v7420_v10  ;;  %v7421_v19 = vunpack.i.l.bf16 %v7420_v10  ;;  %v7425_v21 = vpop.permute.xlu1 %7424 }
0x1884   :  { %v7427_v15 = vunpack.i.h.bf16 %v7425_v21  ;;  %v7426_v13 = vunpack.i.l.bf16 %v7425_v21  ;;  %7505 = vpow2.f32 %v2877_v9 }
0x1885   :  { %v7147_v23 = vpack.c.bf16 %v7422_v12, %v7421_v19 }
0x1886   :  { %v7153_v56 = vpack.c.bf16 %v7427_v15, %v7426_v13 }
0x1887   :  { %7149 = vmatprep.subr.msk.bf16.mxu0 %vm8140_vm15, %v7147_v23  ;;  %v2980_v28 = vpop.permute.xlu1 %2979 }
0x1888   :  { %7152 = vmatpush3.bf16.msk.msra.mxu0 %vm8140_vm15, %v7147_v23 }
0x1889   :  { %7155 = vmatprep.subr.msk.bf16.mxu0 %vm8057_vm11, %v7153_v56 }
0x188d   :  { %v7504_v22 = vpop.eup %7503 }
0x188e   :  { %v2884_v8 = vsel %vm1182_vm12, %v7504_v22, 0.0  ;;  %v7506_v26 = vpop.eup %7505 }
0x188f   :  { %2885 = vadd.xlane.f32.xlu1 %v2884_v8  ;;  %v2881_v27 = vsel %vm1178_vm13, %v7506_v26, 0.0 }
0x1893   :  { %2882 = vadd.xlane.f32.xlu1 %v2881_v27 }
0x18a4   :  { %2981 = vrot.lane.b32.xlu1 %v8244_v58, %s7828_s13 }
0x191c   :  { %v2886_v25 = vpop.xlane.xlu1 %2885 }
0x191d   :  { %7507 = vrcp.f32 %v2886_v25 }
0x1920   :  { %v2883_v0 = vpop.xlane.xlu1 %2882 }
0x1921   :  { %7509 = vrcp.f32 %v2883_v0 }
0x1924   :  { %v2982_v33 = vpop.permute.xlu1 %2981 }
0x1927   :  { %v7508_v30 = vpop.eup %7507 }
0x1928   :  { %v2890_v32 = vmul.f32 %v7508_v30, %v7504_v22 }
0x192b   :  { %v7510_v31 = vpop.eup %7509 }
0x192c   :  { %v2889_v24 = vmul.f32 %v7510_v31, %v7506_v26 }
0x192e   :  { %6645 = vmatprep.mubr.msk.f32.mxu0 %vm1178_vm13, %v2889_v24 }
0x192f   :  { %6646 = vmatmul.mubr.msk.f32.vlgmr.msra.gmra.mrb[24].mxu0 %vm1178_vm13, %v2890_v32 }
0x1930   :  { %7158 = vmatpush3.bf16.xpose.msk.msra.mxu0 %vm8057_vm11, %v7153_v56  ;;  %6652 = vmatprep.mubr.msk.f32.mxu0 %vm1090_vm10, %v2980_v28 }
0x1937   :  { %6653 = vmatmul.mubr.msk.f32.vlgmr.msra.gmra.mrb[26].mxu0 %vm1090_vm10, %v2982_v33 }
0x1a02   :  { %v8322_v34 = vpop.f32.mrb[24].mxu0 }
0x1a03   :  { %v8324_v36 = vpop.f32.mrb[25].mxu0 }
0x1a0a   :  { %v6654_v37 = vpop.f32.mrb[26].mxu0 }
0x1a0b   :  { %v3071_v38 = vmul.f32 0.35355338, %v6654_v37  ;;  %v3061_v39 = vpop.f32.mrb[27].mxu0 }
0x1a0c   :  { %v3070_v40 = vmul.f32 0.35355338, %v3061_v39 }
0x1a0d   :  { %v3073_v41 = vadd.f32 %v8276_v16, %v3071_v38 }
0x1a0e   :  { %v3072_v42 = vadd.f32 %v8272_v60, %v3070_v40 }
0x1a0f   :  { %v3077_v17 = vsel %vm1182_vm12, %v3073_v41, -inf }
0x1a10   :  { %3078 = vmax.xlane.f32.xlu1 %v3077_v17  ;;  %v3074_v51 = vsel %vm1178_vm13, %v3072_v42, -inf }
0x1a11   :  { %3075 = vmax.xlane.f32.xlu0 %v3074_v51 }
0x1a21   :  { %7434 = vrot.lane.b32.xlu1 %v8252_v62, %s7832_s18 }
0x1a25   :  { %3184 = vrot.lane.b32.xlu1 %v8246_v61, %s7833_s19 }
0x1a29   :  { %3186 = vrot.lane.b32.xlu1 %v8244_v58, %s7833_s19 }
0x1a9d   :  { %v3079_v57 = vpop.xlane.xlu1 %3078 }
0x1a9e   :  { %v3081_v59 = vsub.f32 %v3073_v41, %v3079_v57  ;;  %v3076_v2 = vpop.xlane.xlu0 %3075 }
0x1a9f   :  { %v3080_v3 = vsub.f32 %v3072_v42, %v3076_v2 }
0x1aa0   :  { %v3084_v55 = vmul.f32 1.442695, %v3081_v59 }
0x1aa1   :  { %v3082_v4 = vmul.f32 1.442695, %v3080_v3  ;;  %v7435_v7 = vpop.permute.xlu1 %7434 }
0x1aa2   :  { %7511 = vpow2.f32 %v3084_v55  ;;  %v7437_v10 = vunpack.i.h.bf16 %v7435_v7  ;;  %v7436_v12 = vunpack.i.l.bf16 %v7435_v7  ;;  %v3422_v7 = vld [vmem:[#allocation12 + $0xd98] sm:$0xff] }
0x1aa3   :  { %7513 = vpow2.f32 %v3082_v4 }
0x1aa4   :  { %v7165_v13 = vpack.c.bf16 %v7437_v10, %v7436_v12 }
0x1aa5   :  { %v3185_v26 = vpop.permute.xlu1 %3184 }
0x1aa9   :  { %v3187_v27 = vpop.permute.xlu1 %3186 }
0x1aac   :  { %v7512_v5 = vpop.eup %7511 }
0x1aad   :  { %v3089_v53 = vsel %vm1182_vm12, %v7512_v5, 0.0  ;;  %v7514_v63 = vpop.eup %7513 }
0x1aae   :  { %3090 = vadd.xlane.f32.xlu0 %v3089_v53  ;;  %v3086_v6 = vsel %vm1178_vm13, %v7514_v63, 0.0 }
0x1ab2   :  { %3087 = vadd.xlane.f32.xlu0 %v3086_v6  ;;  %v3420_v6 = vld [vmem:[#allocation12 + $0xd68] sm:$0xff] }
0x1ac8   :  { %7429 = vrot.lane.b32.xlu0 %v8252_v62, %s7831_s17 }
0x1b3b   :  { %v3091_v58 = vpop.xlane.xlu0 %3090 }
0x1b3c   :  { %7515 = vrcp.f32 %v3091_v58  ;;  %v3421_v58 = vld [vmem:[#allocation12 + $0xd80] sm:$0xff] }
0x1b3f   :  { %v3088_v61 = vpop.xlane.xlu0 %3087 }
0x1b40   :  { %7517 = vrcp.f32 %v3088_v61 }
0x1b43   :  { %v7430_v9 = vpop.permute.xlu0 %7429 }
0x1b44   :  { %v7432_v19 = vunpack.i.h.bf16 %v7430_v9  ;;  %v7431_v21 = vunpack.i.l.bf16 %v7430_v9  ;;  %v7181_v9 = vpack.c.bf16 %v3422_v7, %v3421_v58  ;;  %v3547_v58 = vld [vmem:[#allocation12 + $0xe08] sm:$0xff] }
0x1b46   :  { %v7159_v15 = vpack.c.bf16 %v7432_v19, %v7431_v21  ;;  %v7516_v23 = vpop.eup %7515 }
0x1b47   :  { %v3095_v8 = vmul.f32 %v7516_v23, %v7512_v5 }
0x1b48   :  { %7161 = vmatprep.subr.msk.bf16.mxu1 %vm8140_vm15, %v7159_v15 }
0x1b49   :  { %7164 = vmatpush3.bf16.msk.msra.mxu1 %vm8140_vm15, %v7159_v15 }
0x1b4a   :  { %v7518_v56 = vpop.eup %7517  ;;  %7167 = vmatprep.subr.msk.bf16.mxu1 %vm8057_vm11, %v7165_v13 }
0x1b4b   :  { %v3094_v22 = vmul.f32 %v7518_v56, %v7514_v63  ;;  %v3419_v63 = vld [vmem:[#allocation12 + $0xd50] sm:$0xff] }
0x1b4c   :  { %v7177_v61 = vpack.c.bf16 %v3420_v6, %v3419_v63 }
0x1b4d   :  { %6659 = vmatprep.mubr.msk.f32.mxu1 %vm1178_vm13, %v3094_v22 }
0x1b4e   :  { %6660 = vmatmul.mubr.msk.f32.vlgmr.msra.gmra.mrb[32].mxu1 %vm1178_vm13, %v3095_v8 }
0x1b4f   :  { %6666 = vmatprep.mubr.msk.f32.mxu1 %vm1090_vm10, %v3185_v26 }
0x1b52   :  { %7170 = vmatpush3.bf16.xpose.msk.msra.mxu1 %vm8057_vm11, %v7165_v13 }
0x1b59   :  { %6667 = vmatmul.mubr.msk.f32.vlgmr.msra.gmra.mrb[34].mxu1 %vm1090_vm10, %v3187_v27 }
0x1b5a   :  { %3639 = vmatprep.mubr.f32.mxu1 %v7822_v1 }
0x1c21   :  { %v6661_v28 = vpop.f32.mrb[32].mxu1 }
0x1c22   :  { %v3175_v25 = vpop.f32.mrb[33].mxu1 }
0x1c2c   :  { %v6668_v0 = vpop.f32.mrb[34].mxu1 }
0x1c2d   :  { %v3276_v30 = vmul.f32 0.35355338, %v6668_v0  ;;  %v3266_v31 = vpop.f32.mrb[35].mxu1  ;;  %v3423_v0 = vld [vmem:[#allocation12 + $0xdb0] ss:$0 sm:$0xff] }
0x1c2e   :  { %v3275_v24 = vmul.f32 0.35355338, %v3266_v31 }
0x1c2f   :  { %v3278_v32 = vadd.f32 %v8276_v16, %v3276_v30 }
0x1c30   :  { %v3277_v33 = vadd.f32 %v8272_v60, %v3275_v24 }
0x1c31   :  { %v3282_v37 = vsel %vm1182_vm12, %v3278_v32, -inf }
0x1c32   :  { %3283 = vmax.xlane.f32.xlu1 %v3282_v37  ;;  %v3279_v35 = vsel %vm1178_vm13, %v3277_v33, -inf }
0x1c33   :  { %3280 = vmax.xlane.f32.xlu0 %v3279_v35 }
0x1c43   :  { %3391 = vrot.lane.b32.xlu1 %v8324_v36, %s7813_s8 }
0x1c47   :  { %3393 = vrot.lane.b32.xlu1 %v8322_v34, %s7813_s8 }
0x1c4b   :  { %3399 = vrot.lane.b32.xlu1 %v3175_v25, %s7835_s20 }
0x1cbf   :  { %v3284_v38 = vpop.xlane.xlu1 %3283 }
0x1cc0   :  { %v3286_v39 = vsub.f32 %v3278_v32, %v3284_v38  ;;  %v3281_v40 = vpop.xlane.xlu0 %3280 }
0x1cc1   :  { %v3285_v16 = vsub.f32 %v3277_v33, %v3281_v40 }
0x1cc2   :  { %v3289_v41 = vmul.f32 1.442695, %v3286_v39 }
0x1cc3   :  { %v3287_v60 = vmul.f32 1.442695, %v3285_v16  ;;  %v3392_v19 = vpop.permute.xlu1 %3391 }
0x1cc4   :  { %7519 = vpow2.f32 %v3289_v41  ;;  %v3413_v23 = vsel %vm1090_vm10, %v8294_v44, %v3392_v19  ;;  %v3765_v19 = vld [vmem:[#allocation12 + $0x1140] sm:$0xff] }
0x1cc5   :  { %7521 = vpow2.f32 %v3287_v60 }
0x1cc7   :  { %v3394_v21 = vpop.permute.xlu1 %3393 }
0x1cc8   :  { %v3414_v22 = vsel %vm1090_vm10, %v8292_v43, %v3394_v21  ;;  %v3766_v21 = vld [vmem:[#allocation12 + $0x1158] sm:$0xff] }
0x1ccb   :  { %v3400_v13 = vpop.permute.xlu1 %3399 }
0x1ccc   :  { %v3415_v8 = vsel %vm1931_vm0, %v3413_v23, %v3400_v13 }
0x1cce   :  { %v7520_v42 = vpop.eup %7519 }
0x1ccf   :  { %v3294_v17 = vsel %vm1182_vm12, %v7520_v42, 0.0  ;;  %v7522_v51 = vpop.eup %7521 }
0x1cd0   :  { %3295 = vadd.xlane.f32.xlu0 %v3294_v17  ;;  %v3291_v36 = vsel %vm1178_vm13, %v7522_v51, 0.0 }
0x1cd4   :  { %3292 = vadd.xlane.f32.xlu0 %v3291_v36 }
0x1cea   :  { %7439 = vrot.lane.b32.xlu0 %v8252_v62, %s7836_s21 }
0x1cee   :  { %3401 = vrot.lane.b32.xlu0 %v6661_v28, %s7835_s20 }
0x1d5d   :  { %v3296_v34 = vpop.xlane.xlu0 %3295 }
0x1d5e   :  { %7523 = vrcp.f32 %v3296_v34  ;;  %v3539_v34 = vld [vmem:[#allocation12 + $0xdc8] sm:$0xff] }
0x1d61   :  { %v3293_v57 = vpop.xlane.xlu0 %3292 }
0x1d62   :  { %7525 = vrcp.f32 %v3293_v57  ;;  %v3542_v57 = vld [vmem:[#allocation12 + $0xde0] sm:$0xff] }
0x1d65   :  { %v7440_v59 = vpop.permute.xlu0 %7439 }
0x1d66   :  { %v7442_v2 = vunpack.i.h.bf16 %v7440_v59  ;;  %v7441_v3 = vunpack.i.l.bf16 %v7440_v59  ;;  %v7187_v59 = vpack.c.bf16 %v3542_v57, %v3539_v34  ;;  %v3737_v34 = vld [vmem:[#allocation12 + $0xea0] sm:$0xff]  ;;  %v3738_v57 = vld [vmem:[#allocation12 + $0xeb8] sm:$0xff] }
0x1d68   :  { %v7171_v55 = vpack.c.bf16 %v7442_v2, %v7441_v3  ;;  %v7524_v4 = vpop.eup %7523  ;;  %v3546_v2 = vld [vmem:[#allocation12 + $0xe00] sm:$0xff]  ;;  %v3549_v3 = vld [vmem:[#allocation12 + $0xe18] sm:$0xff] }
0x1d69   :  { %v3300_v62 = vmul.f32 %v7524_v4, %v7520_v42  ;;  %v3402_v15 = vpop.permute.xlu0 %3401  ;;  %v7189_v4 = vpack.c.bf16 %v3549_v3, %v3546_v2  ;;  %v3756_v2 = vld [vmem:[#allocation12 + $0x1068] sm:$0xff]  ;;  %v3769_v3 = vld [vmem:[#allocation12 + $0x11a0] sm:$0xff] }
0x1d6a   :  { %7173 = vmatprep.subr.msk.bf16.mxu0 %vm8140_vm15, %v7171_v55  ;;  %v3416_v27 = vsel %vm1931_vm0, %v3414_v22, %v3402_v15  ;;  %v7233_v15 = vpack.c.bf16 %v3766_v21, %v3765_v19  ;;  %v3741_v19 = vld [vmem:[#allocation12 + $0xf00] sm:$0xff]  ;;  %v3742_v21 = vld [vmem:[#allocation12 + $0xf18] sm:$0xff] }
0x1d6b   :  { %7176 = vmatpush3.bf16.msk.msra.mxu0 %vm8140_vm15, %v7171_v55  ;;  %v3541_v55 = vld [vmem:[#allocation12 + $0xdd8] sm:$0xff] }
0x1d6c   :  { %v7526_v5 = vpop.eup %7525  ;;  %7178 = vmatprep.subr.bf16.mxu0 %v7177_v61 }
0x1d6d   :  { %v3299_v53 = vmul.f32 %v7526_v5, %v7522_v51  ;;  %v3543_v51 = vld [vmem:[#allocation12 + $0xde8] sm:$0xff]  ;;  %v3544_v5 = vld [vmem:[#allocation12 + $0xdf0] sm:$0xff] }
0x1d6e   :  { %v7193_v63 = vpack.c.bf16 %v3544_v5, %v3541_v55  ;;  %v3770_v55 = vld [vmem:[#allocation12 + $0x11b8] sm:$0xff] }
0x1d6f   :  { %6673 = vmatprep.mubr.msk.f32.mxu0 %vm1178_vm13, %v3299_v53  ;;  %v3545_v53 = vld [vmem:[#allocation12 + $0xdf8] sm:$0xff] }
0x1d70   :  { %6674 = vmatmul.mubr.msk.f32.vlgmr.msra.gmra.mrb[28].mxu0 %vm1178_vm13, %v3300_v62  ;;  %v3548_v62 = vld [vmem:[#allocation12 + $0xe10] sm:$0xff] }
0x1d71   :  { %7180 = vmatpush3.bf16.msra.mxu0 %v7177_v61  ;;  %v7191_v6 = vpack.c.bf16 %v3548_v62, %v3545_v53  ;;  %v3550_v61 = vld [vmem:[#allocation12 + $0xe20] sm:$0xff]  ;;  %v7241_v53 = vpack.c.bf16 %v3770_v55, %v3769_v3  ;;  %v3739_v62 = vld [vmem:[#allocation12 + $0xed0] sm:$0xff] }
0x1d72   :  { %7182 = vmatprep.subr.bf16.mxu0 %v7181_v9  ;;  %v7197_v7 = vpack.c.bf16 %v3550_v61, %v3547_v58  ;;  %v3758_v58 = vld [vmem:[#allocation12 + $0x1098] sm:$0xff]  ;;  %v3771_v61 = vld [vmem:[#allocation12 + $0x11d0] sm:$0xff] }
0x1d75   :  { %7184 = vmatpush3.bf16.msra.mxu0 %v7181_v9  ;;  %v3749_v9 = vld [vmem:[#allocation12 + $0xfc0] sm:$0xff] }
0x1d76   :  { %7194 = vmatprep.subr.bf16.mxu0 %v7193_v63 }
0x1e43   :  { %v6675_v10 = vpop.f32.mrb[28].mxu0 }
0x1e44   :  { %3409 = vrot.lane.b32.xlu0 %v6675_v10, %s7819_s30  ;;  %v3380_v12 = vpop.f32.mrb[29].mxu0  ;;  %v3750_v10 = vld [vmem:[#allocation12 + $0xfd8] sm:$0xff] }
0x1e45   :  { %3407 = vrot.lane.b32.xlu1 %v3380_v12, %s7819_s30  ;;  %v7201_v12 = vpack.c.bf16 %v3750_v10, %v3749_v9 }
0x1eb6   :  { %v3410_v56 = vpop.permute.xlu0 %3409 }
0x1eb7   :  { %v3408_v26 = vpop.permute.xlu1 %3407  ;;  %v3418_v25 = vsel %vm1934_vm1, %v3416_v27, %v3410_v56 }
0x1eb8   :  { %v3417_v28 = vsel %vm1934_vm1, %v3415_v8, %v3408_v26 }
0x1eb9   :  { %6684 = vmatprep.mubr.msk.f32.mxu0 %vm196_vm4, %v3417_v28  ;;  %v3533_v28 = vld [vmem:[#allocation12 + $0x12c1] ss:$0 sm:$0xff] }
0x1eba   :  { %6685 = vmatmul.mubr.msk.f32.vlgmr.msra.gmra.mrb[30].mxu0 %vm196_vm4, %v3418_v25 }
0x1ebb   :  { %7196 = vmatpush3.bf16.msra.mxu0 %v7193_v63  ;;  %v3740_v63 = vld [vmem:[#allocation12 + $0xee8] sm:$0xff] }
0x1ebc   :  { %7198 = vmatprep.subr.bf16.mxu0 %v7197_v7  ;;  %v7215_v9 = vpack.c.bf16 %v3740_v63, %v3739_v62 }
0x1ebf   :  { %7200 = vmatpush3.bf16.msra.mxu0 %v7197_v7  ;;  %v3772_v7 = vld [vmem:[#allocation12 + $0x11e8] sm:$0xff] }
0x1ec0   :  { %7234 = vmatprep.subr.bf16.mxu0 %v7233_v15 }
0x1f8d   :  { %v6686_v30 = vpop.f32.mrb[30].mxu0 }
0x1f8e   :  { %v3502_v44 = vadd.f32 %v6686_v30, %v3423_v0  ;;  %v3496_v31 = vpop.f32.mrb[31].mxu0  ;;  %v3734_v30 = vld [vmem:[#allocation12 + $0xe58] sm:$0xff] }
0x1f8f   :  { %v3497_v24 = vadd.f32 %v3496_v31, %v3423_v0  ;;  %v3733_v0 = vld [vmem:[#allocation12 + $0xe40] sm:$0xff]  ;;  %v3751_v31 = vld [vmem:[#allocation12 + $0xff0] sm:$0xff] }
0x1f90   :  { %v3506_v43 = vadd.f32 %v3502_v44, %v8240_v46  ;;  %v3536_v44 = vld [vmem:[#allocation12 + $0x12c2] ss:$0 sm:$0xff] }
0x1f91   :  { %v3505_v32 = vadd.f32 %v3497_v24, %v8236_v45  ;;  %v3540_v45 = vld [vmem:[#allocation12 + $0xdd0] sm:$0xff]  ;;  %v3752_v24 = vld [vmem:[#allocation12 + $0x1008] sm:$0xff] }
0x1f92   :  { %v3510_v33 = vsel %vm2028_vm2, %v3506_v43, 0.0  ;;  %v7185_v36 = vpack.c.bf16 %v3543_v51, %v3540_v45 }
0x1f93   :  { %3511 = vadd.xlane.f32.xlu0 %v3510_v33  ;;  %v3507_v37 = vsel %vm196_vm4, %v3505_v32, 0.0  ;;  %v7203_v33 = vpack.c.bf16 %v3734_v30, %v3733_v0  ;;  %v3762_v0 = vld [vmem:[#allocation12 + $0x10f8] sm:$0xff]  ;;  %v3775_v30 = vld [vmem:[#allocation12 + $0x1230] sm:$0xff] }
0x1f94   :  { %3508 = vadd.xlane.f32.xlu1 %v3507_v37  ;;  %7186 = vmatprep.subr.bf16.mxu1 %v7185_v36 }
0x1f95   :  { %7188 = vmatpush1.bf16.msra.mxu1 %v7187_v59  ;;  %v3755_v59 = vld [vmem:[#allocation12 + $0x1050] sm:$0xff] }
0x1f96   :  { %7190 = vmatprep.subr.bf16.mxu1 %v7189_v4  ;;  %v7211_v4 = vpack.c.bf16 %v3738_v57, %v3737_v34  ;;  %v7213_v5 = vpack.c.bf16 %v3756_v2, %v3755_v59  ;;  %v3552_v57 = vld [vmem:[#allocation12 + $0xe28] ss:$8 sm:$0x7] }
0x1f97   :  { %v3557_v59 = vrot.slane %v3552_v57, %v7983_v18  ;;  %v3561_v2 = vrot.slane %v3552_v57, %v7986_v20 }
0x1f99   :  { %7192 = vmatpush1.bf16.msra.mxu1 %v7191_v6  ;;  %v3757_v6 = vld [vmem:[#allocation12 + $0x1080] sm:$0xff] }
0x1f9a   :  { %7202 = vmatprep.subr.bf16.mxu1 %v7201_v12  ;;  %v7217_v10 = vpack.c.bf16 %v3758_v58, %v3757_v6  ;;  %v7245_v12 = vpack.c.bf16 %v3772_v7, %v3771_v61 }
0x2020   :  { %v3512_v35 = vpop.xlane.xlu0 %3511 }
0x2021   :  { %v3514_v38 = vmul.f32 0.03125, %v3512_v35  ;;  %v3509_v39 = vpop.xlane.xlu1 %3508 }
0x2022   :  { %v3513_v40 = vmul.f32 0.03125, %v3509_v39  ;;  %v3735_v39 = vld [vmem:[#allocation12 + $0xe70] sm:$0xff] }
0x2023   :  { %v3516_v16 = vsub.f32 %v3506_v43, %v3514_v38  ;;  %v7205_v38 = vpack.c.bf16 %v3752_v24, %v3751_v31 }
0x2024   :  { %v3515_v41 = vsub.f32 %v3505_v32, %v3513_v40  ;;  %v3736_v40 = vld [vmem:[#allocation12 + $0xe88] sm:$0xff] }
0x2025   :  { %v3518_v17 = vmul.f32 %v3516_v16, %v3516_v16  ;;  %v7207_v45 = vpack.c.bf16 %v3736_v40, %v3735_v39  ;;  %v3764_v39 = vld [vmem:[#allocation12 + $0x1128] sm:$0xff]  ;;  %v3777_v40 = vld [vmem:[#allocation12 + $0x1260] sm:$0xff] }
0x2026   :  { %v3517_v60 = vmul.f32 %v3515_v41, %v3515_v41 }
0x2027   :  { %v3522_v46 = vsel %vm2028_vm2, %v3518_v17, 0.0  ;;  %v3767_v17 = vld [vmem:[#allocation12 + $0x1170] sm:$0xff] }
0x2028   :  { %v3519_v42 = vsel %vm196_vm4, %v3517_v60, 0.0  ;;  %v3753_v60 = vld [vmem:[#allocation12 + $0x1020] sm:$0xff] }
0x2029   :  { %3520 = vadd.xlane.f32.xlu0 %v3519_v42  ;;  %v3754_v42 = vld [vmem:[#allocation12 + $0x1038] sm:$0xff] }
0x202d   :  { %3523 = vadd.xlane.f32.xlu0 %v3522_v46  ;;  %v3768_v46 = vld [vmem:[#allocation12 + $0x1188] sm:$0xff] }
0x202e   :  { %v7237_v36 = vpack.c.bf16 %v3768_v46, %v3767_v17  ;;  %v3747_v17 = vld [vmem:[#allocation12 + $0xf90] sm:$0xff]  ;;  %v3748_v46 = vld [vmem:[#allocation12 + $0xfa8] sm:$0xff] }
0x20b6   :  { %v3521_v13 = vpop.xlane.xlu0 %3520 }
0x20b7   :  { %v3525_v23 = vmul.f32 0.03125, %v3521_v13  ;;  %v3760_v13 = vld [vmem:[#allocation12 + $0x10c8] sm:$0xff] }
0x20b9   :  { %v3527_v56 = vadd.f32 1e-05, %v3525_v23  ;;  %v3773_v23 = vld [vmem:[#allocation12 + $0x1200] sm:$0xff] }
0x20ba   :  { %v3524_v22 = vpop.xlane.xlu0 %3523 }
0x20bb   :  { %7527 = vrsqrt.f32 %v3527_v56  ;;  %v3526_v8 = vmul.f32 0.03125, %v3524_v22  ;;  %v3774_v56 = vld [vmem:[#allocation12 + $0x1218] sm:$0xff]  ;;  %v7219_v22 = vpack.c.bf16 %v3742_v21, %v3741_v19 }
0x20bd   :  { %v3528_v26 = vadd.f32 1e-05, %v3526_v8 }
0x20bf   :  { %7529 = vrsqrt.f32 %v3528_v26  ;;  %v7249_v26 = vpack.c.bf16 %v3774_v56, %v3773_v23 }
0x20c5   :  { %v7528_v27 = vpop.eup %7527 }
0x20c6   :  { %v3531_v25 = vmul.f32 %v7528_v27, %v3515_v41  ;;  %v3743_v27 = vld [vmem:[#allocation12 + $0xf30] sm:$0xff] }
0x20c8   :  { %v3534_v43 = vmul.f32 %v3533_v28, %v3531_v25  ;;  %v3761_v25 = vld [vmem:[#allocation12 + $0x10e0] sm:$0xff] }
0x20c9   :  { %v7530_v32 = vpop.eup %7529  ;;  %v7225_v24 = vpack.c.bf16 %v3762_v0, %v3761_v25 }
0x20ca   :  { %v8391_v37 = vadd.f32 %v3536_v44, %v3534_v43  ;;  %v3532_v35 = vmul.f32 %v7530_v32, %v3516_v16  ;;  %v7209_v16 = vpack.c.bf16 %v3754_v42, %v3753_v60  ;;  %v3745_v32 = vld [vmem:[#allocation12 + $0xf60] sm:$0xff]  ;;  %v3778_v42 = vld [vmem:[#allocation12 + $0x1278] sm:$0xff] }
0x20cc   :  { %6003 = vmatmul.mubr.msk.f32.vlgmr.msra.gmra.mrb[36].mxu1 %vm196_vm4, %v8391_v37  ;;  %6695 = vmatprep.mubr.msk.f32.mxu0 %vm196_vm4, %v8391_v37  ;;  %v3535_v41 = vmul.f32 %v3533_v28, %v3532_v35  ;;  %v3744_v28 = vld [vmem:[#allocation12 + $0xf48] sm:$0xff] }
0x20cd   :  { %3645 = vmatprep.mubr.f32.mxu1 %v7822_v1  ;;  %7204 = vmatpush3.bf16.msra.mxu1 %v7203_v33  ;;  %v7223_v31 = vpack.c.bf16 %v3744_v28, %v3743_v27  ;;  %v3746_v33 = vld [vmem:[#allocation12 + $0xf78] sm:$0xff] }
0x20ce   :  { %v8398_v51 = vadd.f32 %v3536_v44, %v3535_v41  ;;  %7206 = vmatprep.subr.bf16.mxu1 %v7205_v38  ;;  %v3776_v44 = vld [vmem:[#allocation12 + $0x1248] sm:$0xff]  ;;  %v7227_v35 = vpack.c.bf16 %v3746_v33, %v3745_v32  ;;  %v3763_v38 = vld [vmem:[#allocation12 + $0x1110] sm:$0xff]  ;;  %v7257_v41 = vpack.c.bf16 %v3778_v42, %v3777_v40 }
0x20cf   :  { %v7253_v43 = vpack.c.bf16 %v3776_v44, %v3775_v30  ;;  %v7229_v60 = vpack.c.bf16 %v3764_v39, %v3763_v38 }
0x20d0   :  { %6004 = vmatmul.mubr.msk.f32.gmra.mrb[38].mxu1 %vm196_vm4, %v8398_v51  ;;  %6696 = vmatmul.mubr.msk.f32.vlgmr.msra.gmra.mrb[32].mxu0 %vm196_vm4, %v8398_v51 }
0x20d1   :  { %7208 = vmatpush3.bf16.msra.mxu1 %v7207_v45  ;;  %7236 = vmatpush3.bf16.msra.mxu0 %v7233_v15  ;;  %v3759_v15 = vld [vmem:[#allocation12 + $0x10b0] sm:$0xff]  ;;  %v7231_v45 = vpack.c.bf16 %v3748_v46, %v3747_v17 }
0x20d2   :  { %7210 = vmatprep.subr.bf16.mxu1 %v7209_v16  ;;  %7238 = vmatprep.subr.bf16.mxu0 %v7237_v36  ;;  %v7221_v8 = vpack.c.bf16 %v3760_v13, %v3759_v15  ;;  %v3779_v16 = vld [vmem:[#allocation12 + $0x1290] sm:$0xff] }
0x20d5   :  { %7212 = vmatpush3.bf16.msra.mxu1 %v7211_v4  ;;  %7240 = vmatpush3.bf16.msra.mxu0 %v7237_v36  ;;  %v3780_v36 = vld [vmem:[#allocation12 + $0x12a8] sm:$0xff] }
0x20d6   :  { %7214 = vmatprep.subr.bf16.mxu1 %v7213_v5  ;;  %7242 = vmatprep.subr.bf16.mxu0 %v7241_v53  ;;  %v7261_v34 = vpack.c.bf16 %v3780_v36, %v3779_v16  ;;  %v3565_v5 = vrot.slane %v3552_v57, %v8226_v29  ;;  %v3966_v36 = vld [vmem:[#allocation12 + $0x4f8] sm:$0xff]  ;;  %v3968_v57 = vld [vmem:[#allocation12 + $0x528] sm:$0xff] }
0x20d9   :  { %7216 = vmatpush3.bf16.msra.mxu1 %v7215_v9  ;;  %7244 = vmatpush3.bf16.msra.mxu0 %v7241_v53 }
0x20da   :  { %7218 = vmatprep.subr.bf16.mxu1 %v7217_v10  ;;  %7246 = vmatprep.subr.bf16.mxu0 %v7245_v12 }
0x20dd   :  { %7220 = vmatpush3.bf16.msra.mxu1 %v7219_v22  ;;  %7248 = vmatpush3.bf16.msra.mxu0 %v7245_v12 }
0x20de   :  { %7222 = vmatprep.subr.bf16.mxu1 %v7221_v8  ;;  %7250 = vmatprep.subr.bf16.mxu0 %v7249_v26  ;;  %v3781_v8 = vld [vmem:[#allocation12 + $0x12c0] ss:$0 sm:$0xff] }
0x20e1   :  { %7224 = vmatpush3.bf16.msra.mxu1 %v7223_v31  ;;  %7252 = vmatpush3.bf16.msra.mxu0 %v7249_v26 }
0x20e2   :  { %7226 = vmatprep.subr.bf16.mxu1 %v7225_v24  ;;  %7254 = vmatprep.subr.bf16.mxu0 %v7253_v43 }
0x20e5   :  { %7256 = vmatpush3.bf16.msra.mxu0 %v7253_v43  ;;  %7228 = vmatpush3.bf16.msra.mxu1 %v7227_v35 }
0x20e6   :  { %7230 = vmatprep.subr.bf16.mxu1 %v7229_v60  ;;  %7258 = vmatprep.subr.bf16.mxu0 %v7257_v41 }
0x20e9   :  { %7232 = vmatpush3.bf16.msra.mxu1 %v7231_v45  ;;  %7260 = vmatpush3.bf16.msra.mxu0 %v7257_v41 }
0x20ea   :  { %7262 = vmatprep.subr.bf16.mxu0 %v7261_v34 }
0x20ed   :  { %7264 = vmatpush3.bf16.msra.mxu0 %v7261_v34  ;;  %v3967_v34 = vld [vmem:[#allocation12 + $0x510] sm:$0xff] }
0x219f   :  { %v3641_v3 = vpop.f32.mrb[36].mxu1 }
0x21a0   :  { %v3642_v55 = vadd.f32 %v3641_v3, %v3557_v59  ;;  %v3643_v4 = vpop.f32.mrb[37].mxu1 }
0x21a1   :  { %v3644_v53 = vadd.f32 %v3643_v4, %v3561_v2 }
0x21a2   :  { %v3727_v58 = vmax.f32 %v3642_v55, 0.0 }
0x21a3   :  { %v3728_v62 = vmax.f32 %v3644_v53, 0.0  ;;  %v3647_v63 = vpop.f32.mrb[38].mxu1  ;;  %v6697_v6 = vpop.f32.mrb[32].mxu0 }
0x21a4   :  { %v3648_v61 = vadd.f32 %v3647_v63, %v3557_v59  ;;  %v3724_v7 = vadd.f32 %v6697_v6, %v3565_v5  ;;  %v3649_v9 = vpop.f32.mrb[39].mxu1  ;;  %v3718_v10 = vpop.f32.mrb[33].mxu0  ;;  %v3969_v59 = vld [vmem:[#allocation12 + $0x540] sm:$0xff] }
0x21a5   :  { %v3650_v12 = vadd.f32 %v3649_v9, %v3561_v2  ;;  %v3719_v19 = vadd.f32 %v3718_v10, %v3565_v5  ;;  %3846 = vmatprep.mubr.f32.mxu1 %v3728_v62  ;;  %v7269_v2 = vpack.c.bf16 %v3969_v59, %v3968_v57  ;;  %v3960_v6 = vld [vmem:[#allocation12 + $0x12c3] ss:$0 sm:$0xff] }
0x21a6   :  { %3847 = vmatmul.mubr.f32.vlgmr.msra.gmra.mrb[40].mxu1 %v3727_v58  ;;  %v3730_v13 = vmax.f32 %v3648_v61, 0.0  ;;  %v3732_v23 = vmax.f32 %v3724_v7, 0.0  ;;  %v3963_v61 = vld [vmem:[#allocation12 + $0x12c4] ss:$0 sm:$0xff] }
0x21a7   :  { %v3731_v21 = vmax.f32 %v3650_v12, 0.0  ;;  %v3729_v15 = vmax.f32 %v3719_v19, 0.0 }
0x21a9   :  { %3851 = vmatprep.mubr.f32.mxu1 %v3731_v21  ;;  %6730 = vmatprep.mubr.f32.mxu0 %v3729_v15  ;;  %v3970_v15 = vld [vmem:[#allocation12 + $0x558] ss:$0 sm:$0xff] }
0x21aa   :  { %3852 = vmatmul.mubr.f32.gmra.mrb[42].mxu1 %v3730_v13  ;;  %6731 = vmatmul.mubr.f32.vlgmr.msra.gmra.mrb[34].mxu0 %v3732_v23 }
0x2279   :  { %v6303_v56 = vpop.f32.mrb[40].mxu1 }
0x227a   :  { %v6304_v22 = vpop.f32.mrb[41].mxu1 }
0x227b   :  { %v6305_v26 = vadd.f32 %v6304_v22, %v6303_v56 }
0x227d   :  { %v6306_v27 = vpop.f32.mrb[42].mxu1  ;;  %v6732_v28 = vpop.f32.mrb[34].mxu0  ;;  %v3849_v25 = vadd.f32 %v6305_v26, %v3781_v8 }
0x227e   :  { %v6307_v0 = vpop.f32.mrb[43].mxu1  ;;  %v3923_v30 = vpop.f32.mrb[35].mxu0 }
0x227f   :  { %v6308_v44 = vadd.f32 %v6307_v0, %v6306_v27  ;;  %v3924_v31 = vadd.f32 %v3923_v30, %v3849_v25 }
0x2281   :  { %v3854_v24 = vadd.f32 %v6308_v44, %v3781_v8  ;;  %v3932_v43 = vadd.f32 %v3924_v31, %v8391_v37  ;;  %v303_v31 = vld [vmem:[#allocation12 + $0x180] ss:$0 sm:$0xff] }
0x2283   :  { %v3929_v32 = vadd.f32 %v6732_v28, %v3854_v24  ;;  %v3934_v33 = vsel %vm196_vm4, %v3932_v43, 0.0 }
0x2284   :  { %3935 = vadd.xlane.f32.xlu1 %v3934_v33  ;;  %v374_v33 = vadd.f32 %v7978_v14, %v303_v31 }
0x2285   :  { %v3933_v35 = vadd.f32 %v3929_v32, %v8398_v51  ;;  %v7265_v51 = vpack.c.bf16 %v3967_v34, %v3966_v36 }
0x2287   :  { %v3937_v38 = vsel %vm2028_vm2, %v3933_v35, 0.0  ;;  %7266 = vmatprep.subr.bf16.mxu1 %v7265_v51 }
0x2288   :  { %3938 = vadd.xlane.f32.xlu0 %v3937_v38  ;;  %7268 = vmatpush3.bf16.msra.mxu1 %v7265_v51 }
0x2289   :  { %7270 = vmatprep.subr.bf16.mxu1 %v7269_v2 }
0x228c   :  { %7272 = vmatpush3.bf16.msra.mxu1 %v7269_v2  ;;  %v904_v2 = vsel %vm207_vm6, %v8093_v54, 0.0 }
0x2311   :  { %v3936_v39 = vpop.xlane.xlu1 %3935 }
0x2312   :  { %v3940_v40 = vmul.f32 0.03125, %v3936_v39 }
0x2314   :  { %v3942_v60 = vsub.f32 %v3932_v43, %v3940_v40  ;;  %v377_v40 = vsel %vm172_vm3, %v374_v33, 0.0 }
0x2315   :  { %v3939_v42 = vpop.xlane.xlu0 %3938 }
0x2316   :  { %v3941_v17 = vmul.f32 0.03125, %v3939_v42  ;;  %v3944_v46 = vmul.f32 %v3942_v60, %v3942_v60  ;;  %v4086_v42 = vld [vmem:[#allocation12 + $0x570] sm:$0xff] }
0x2318   :  { %v3943_v41 = vsub.f32 %v3933_v35, %v3941_v17  ;;  %v3946_v45 = vsel %vm196_vm4, %v3944_v46, 0.0  ;;  %v8427_v35 = vadd.f32 %v8081_v48, %v8087_v50  ;;  %v4087_v48 = vld [vmem:[#allocation12 + $0x588] sm:$0xff]  ;;  %v4088_v17 = vld [vmem:[#allocation12 + $0x5a0] sm:$0xff]  ;;  %v4089_v46 = vld [vmem:[#allocation12 + $0x5b8] sm:$0xff] }
0x2319   :  { %3947 = vadd.xlane.f32.xlu1 %v3946_v45  ;;  %v7273_v50 = vpack.c.bf16 %v4087_v48, %v4086_v42 }
0x231a   :  { %v3945_v37 = vmul.f32 %v3943_v41, %v3943_v41  ;;  %v900_v39 = vsel %vm207_vm6, %v8427_v35, 0.0 }
0x231b   :  { %7274 = vmatprep.subr.bf16.mxu0 %v7273_v50 }
0x231c   :  { %v3949_v16 = vsel %vm2028_vm2, %v3945_v37, 0.0  ;;  %7276 = vmatpush3.bf16.msra.mxu0 %v7273_v50 }
0x231d   :  { %3950 = vadd.xlane.f32.xlu0 %v3949_v16 }
0x23a6   :  { %v3948_v3 = vpop.xlane.xlu1 %3947 }
0x23a7   :  { %v3952_v55 = vmul.f32 0.03125, %v3948_v3 }
0x23a9   :  { %v3954_v4 = vadd.f32 1e-05, %v3952_v55 }
0x23aa   :  { %v3951_v5 = vpop.xlane.xlu0 %3950 }
0x23ab   :  { %7531 = vrsqrt.f32 %v3954_v4  ;;  %v3953_v53 = vmul.f32 0.03125, %v3951_v5  ;;  %v905_v4 = vadd.f32 %v904_v2, %v8090_v52  ;;  %v4078_v5 = vld [vmem:[#allocation12 + $0x559] ss:$0 sm:$0xff] }
0x23ad   :  { %v3955_v62 = vadd.f32 1e-05, %v3953_v53 }
0x23af   :  { %7533 = vrsqrt.f32 %v3955_v62 }
0x23b5   :  { %v7532_v63 = vpop.eup %7531 }
0x23b6   :  { %v3958_v58 = vmul.f32 %v7532_v63, %v3942_v60  ;;  %v8435_v60 = vadd.f32 %v8079_v47, %v8084_v49 }
0x23b8   :  { %v3961_v7 = vmul.f32 %v3960_v6, %v3958_v58  ;;  %v901_v14 = vadd.f32 %v900_v39, %v8435_v60  ;;  %v4360_v39 = vld [vmem:[#allocation12 + $0x1530] sm:$0xff] }
0x23b9   :  { %v7534_v9 = vpop.eup %7533 }
0x23ba   :  { %v3959_v10 = vmul.f32 %v7534_v9, %v3943_v41  ;;  %v8413_v12 = vadd.f32 %v3963_v61, %v3961_v7  ;;  %v7277_v41 = vpack.c.bf16 %v4089_v46, %v4088_v17 }
0x23bc   :  { %v3962_v19 = vmul.f32 %v3960_v6, %v3959_v10  ;;  %6741 = vmatprep.mubr.msk.f32.mxu1 %vm196_vm4, %v8413_v12  ;;  %7278 = vmatprep.subr.bf16.mxu0 %v7277_v41  ;;  %v4081_v6 = vld [vmem:[#allocation12 + $0x55a] ss:$0 sm:$0xff] }
0x23bd   :  { %7280 = vmatpush3.bf16.msra.mxu0 %v7277_v41 }
0x23be   :  { %v8417_v21 = vadd.f32 %v3963_v61, %v3962_v19 }
0x23c0   :  { %6742 = vmatmul.mubr.msk.f32.vlgmr.msra.gmra.mrb[44].mxu1 %vm196_vm4, %v8417_v21 }
0x2493   :  { %v6743_v13 = vpop.f32.mrb[44].mxu1 }
0x2494   :  { %v4049_v23 = vadd.f32 %v6743_v13, %v3970_v15  ;;  %v4043_v56 = vpop.f32.mrb[45].mxu1 }
0x2495   :  { %v4044_v22 = vadd.f32 %v4043_v56, %v3970_v15  ;;  %v4351_v15 = vld [vmem:[#allocation12 + $0x1458] sm:$0xff] }
0x2496   :  { %v4055_v8 = vsel %vm2028_vm2, %v4049_v23, 0.0 }
0x2497   :  { %4056 = vadd.xlane.f32.xlu0 %v4055_v8  ;;  %v4052_v26 = vsel %vm196_vm4, %v4044_v22, 0.0  ;;  %v390_v8 = vld [vmem:[#allocation12 + $0x181] ss:$0 sm:$0xff] }
0x2498   :  { %4053 = vadd.xlane.f32.xlu1 %v4052_v26 }
0x2524   :  { %v4057_v27 = vpop.xlane.xlu0 %4056 }
0x2525   :  { %v4059_v28 = vmul.f32 0.03125, %v4057_v27  ;;  %v4054_v25 = vpop.xlane.xlu1 %4053  ;;  %v392_v27 = vld [vmem:[#allocation12 + $0x182] ss:$0 sm:$0xff] }
0x2526   :  { %v4058_v0 = vmul.f32 0.03125, %v4054_v25 }
0x2527   :  { %v4061_v30 = vsub.f32 %v4049_v23, %v4059_v28 }
0x2528   :  { %v4060_v44 = vsub.f32 %v4044_v22, %v4058_v0 }
0x2529   :  { %v4063_v24 = vmul.f32 %v4061_v30, %v4061_v30 }
0x252a   :  { %v4062_v43 = vmul.f32 %v4060_v44, %v4060_v44 }
0x252b   :  { %v4067_v32 = vsel %vm2028_vm2, %v4063_v24, 0.0  ;;  %v4352_v24 = vld [vmem:[#allocation12 + $0x1470] sm:$0xff] }
0x252c   :  { %4068 = vadd.xlane.f32.xlu0 %v4067_v32  ;;  %v4064_v38 = vsel %vm196_vm4, %v4062_v43, 0.0  ;;  %v4353_v43 = vld [vmem:[#allocation12 + $0x1488] sm:$0xff]  ;;  %v4354_v32 = vld [vmem:[#allocation12 + $0x14a0] sm:$0xff] }
0x252d   :  { %4065 = vadd.xlane.f32.xlu1 %v4064_v38  ;;  %v4359_v38 = vld [vmem:[#allocation12 + $0x1518] sm:$0xff] }
0x2531   :  { %378 = vadd.xlane.f32.xlu1 %v377_v40  ;;  %v4361_v40 = vld [vmem:[#allocation12 + $0x1548] sm:$0xff] }
0x2535   :  { %902 = vadd.xlane.f32.xlu1 %v901_v14  ;;  %v4362_v14 = vld [vmem:[#allocation12 + $0x1560] sm:$0xff] }
0x25b9   :  { %v4069_v45 = vpop.xlane.xlu0 %4068 }
0x25ba   :  { %v4071_v37 = vmul.f32 0.03125, %v4069_v45  ;;  %v4066_v16 = vpop.xlane.xlu1 %4065 }
0x25bb   :  { %v4070_v36 = vmul.f32 0.03125, %v4066_v16 }
0x25bc   :  { %v4073_v47 = vadd.f32 1e-05, %v4071_v37  ;;  %v4090_v37 = vld [vmem:[#allocation12 + $0x5d0] ss:$0 sm:$0xff] }
0x25bd   :  { %v4072_v49 = vadd.f32 1e-05, %v4070_v36 }
0x25be   :  { %7535 = vrsqrt.f32 %v4073_v47  ;;  %v379_v34 = vpop.xlane.xlu1 %378 }
0x25bf   :  { %7537 = vrsqrt.f32 %v4072_v49  ;;  %v380_v51 = vmul.f32 0.03125, %v379_v34 }
0x25c1   :  { %v381_v57 = vsub.f32 %v374_v33, %v380_v51  ;;  %v4355_v33 = vld [vmem:[#allocation12 + $0x14b8] sm:$0xff] }
0x25c2   :  { %v903_v48 = vpop.xlane.xlu1 %902 }
0x25c3   :  { %v382_v59 = vmul.f32 %v381_v57, %v381_v57  ;;  %v908_v17 = vmul.f32 0.0052083335, %v903_v48 }
0x25c5   :  { %v383_v3 = vsel %vm172_vm3, %v382_v59, 0.0  ;;  %v911_v41 = vsub.f32 %v8427_v35, %v908_v17  ;;  %v910_v16 = vsub.f32 %v8435_v60, %v908_v17  ;;  %vm4294_vm3 = vcmask 3072  }
0x25c6   :  { %384 = vadd.xlane.f32.xlu0 %v383_v3 }
0x25c7   :  { %v915_v47 = vmul.f32 %v911_v41, %v911_v41  ;;  %v914_v2 = vmul.f32 %v910_v16, %v910_v16 }
0x25c8   :  { %v7536_v55 = vpop.eup %7535 }
0x25c9   :  { %v7538_v53 = vpop.eup %7537  ;;  %v4077_v62 = vmul.f32 %v7536_v55, %v4061_v30 }
0x25ca   :  { %906 = vadd.xlane.f32.xlu0 %v905_v4  ;;  %v4076_v63 = vmul.f32 %v7538_v53, %v4060_v44 }
0x25cb   :  { %v4080_v58 = vmul.f32 %v4078_v5, %v4077_v62 }
0x25cc   :  { %v4079_v61 = vmul.f32 %v4078_v5, %v4076_v63 }
0x25cd   :  { %v4083_v7 = vadd.f32 %v4081_v6, %v4080_v58 }
0x25ce   :  { %v4082_v9 = vadd.f32 %v4081_v6, %v4079_v61 }
0x25cf   :  { %v4085_v19 = vmax.f32 %v4083_v7, 0.0 }
0x25d0   :  { %v4084_v10 = vmax.f32 %v4082_v9, 0.0 }
0x25d2   :  { %6752 = vmatprep.mubr.msk.f32.mxu0 %vm196_vm4, %v4084_v10 }
0x25d3   :  { %6753 = vmatmul.mubr.msk.f32.vlgmr.msra.gmra.mrb[36].mxu0 %vm196_vm4, %v4085_v19 }
0x25d4   :  { %6770 = vmatprep.mubr.msk.f32.mxu0 %vm1178_vm13, %v4351_v15 }
0x2653   :  { %v385_v13 = vpop.xlane.xlu0 %384 }
0x2654   :  { %v386_v23 = vmul.f32 0.03125, %v385_v13 }
0x2656   :  { %v387_v56 = vadd.f32 1e-05, %v386_v23 }
0x2657   :  { %v907_v42 = vpop.xlane.xlu0 %906 }
0x2658   :  { %7539 = vrsqrt.f32 %v387_v56  ;;  %v909_v50 = vmul.f32 0.0052083335, %v907_v42 }
0x265a   :  { %v913_v46 = vsub.f32 %v8093_v54, %v909_v50  ;;  %v912_v45 = vsub.f32 %v8090_v52, %v909_v50  ;;  %v918_v52 = vsel %vm207_vm6, %v915_v47, 0.0 }
0x265b   :  { %v919_v60 = vadd.f32 %v918_v52, %v914_v2  ;;  %v4208_v2 = vld [vmem:[#allocation12 + $0x1308] sm:$0xff] }
0x265c   :  { %v917_v36 = vmul.f32 %v913_v46, %v913_v46  ;;  %v4539_v52 = vld [vmem:[#allocation12 + $0x5e8] sm:$0xff] }
0x265e   :  { %v922_v55 = vsel %vm207_vm6, %v917_v36, 0.0  ;;  %vm5440_vm6 = vcmask 326656  }
0x2662   :  { %v7540_v22 = vpop.eup %7539 }
0x2663   :  { %v389_v26 = vmul.f32 %v7540_v22, %v381_v57  ;;  %v916_v57 = vmul.f32 %v912_v45, %v912_v45  ;;  %v937_v22 = vld [vmem:[#allocation12 + $0x4e1] ss:$8 sm:$0x3] }
0x2665   :  { %v391_v28 = vmul.f32 %v390_v8, %v389_v26  ;;  %v923_v35 = vadd.f32 %v922_v55, %v916_v57  ;;  %v954_v26 = vld [vmem:[#allocation12 + $0x4e2] ss:$8 sm:$0x3]  ;;  %v4207_v57 = vld [vmem:[#allocation12 + $0x12f0] sm:$0xff] }
0x2667   :  { %v393_v25 = vadd.f32 %v392_v27, %v391_v28  ;;  %v942_v28 = vrot.slane %v937_v22, %v7983_v18 }
0x2669   :  { %v394_v0 = vmax.f32 %v393_v25, 0.0  ;;  %v946_v25 = vrot.slane %v937_v22, %v7986_v20  ;;  %v4198_v22 = vld [vmem:[#allocation12 + $0x5d1] ss:$0 sm:$0xff] }
0x266b   :  { %v4336_v30 = vsel %vm605_vm8, %v394_v0, 0.0 }
0x266c   :  { %v4337_v44 = vadd.f32 %v4336_v30, %v8413_v12  ;;  %v4356_v12 = vld [vmem:[#allocation12 + $0x14d0] sm:$0xff] }
0x266e   :  { %v7289_v31 = vpack.c.bf16 %v8417_v21, %v4337_v44  ;;  %v4357_v21 = vld [vmem:[#allocation12 + $0x14e8] sm:$0xff]  ;;  %v959_v44 = vrot.slane %v954_v26, %v7983_v18 }
0x2670   :  { %7291 = vmatprep.subr.msk.bf16.mxu0 %vm8140_vm15, %v7289_v31 }
0x2671   :  { %7294 = vmatpush3.bf16.msk.msra.mxu0 %vm8140_vm15, %v7289_v31  ;;  %v963_v31 = vrot.slane %v954_v26, %v7986_v20 }
0x2674   :  { %6771 = vmatmul.mubr.msk.f32.vlgmr.msra.gmra.mrb[38].mxu0 %vm1178_vm13, %v4352_v24 }
0x2675   :  { %6773 = vmatprep.mubr.msk.f32.mxu0 %vm1178_vm13, %v4353_v43 }
0x2678   :  { %6774 = vmatmul.mubr.msk.f32.gmra.mrb[40].mxu0 %vm1178_vm13, %v4354_v32 }
0x2679   :  { %6776 = vmatprep.mubr.msk.f32.mxu0 %vm1178_vm13, %v4355_v33 }
0x267c   :  { %6777 = vmatmul.mubr.msk.f32.gmra.mrb[42].mxu0 %vm1178_vm13, %v4356_v12 }
0x267d   :  { %6779 = vmatprep.mubr.msk.f32.mxu0 %vm1178_vm13, %v4357_v21 }
0x2680   :  { %6780 = vmatmul.mubr.msk.f32.gmra.mrb[44].mxu0 %vm1178_vm13, %v4358_v11 }
0x2681   :  { %6782 = vmatprep.mubr.msk.f32.mxu0 %vm1178_vm13, %v4359_v38 }
0x2684   :  { %6783 = vmatmul.mubr.msk.f32.gmra.mrb[46].mxu0 %vm1178_vm13, %v4360_v39 }
0x2685   :  { %6785 = vmatprep.mubr.msk.f32.mxu0 %vm1178_vm13, %v4361_v40 }
0x2688   :  { %6786 = vmatmul.mubr.msk.f32.gmra.mrb[48].mxu0 %vm1178_vm13, %v4362_v14 }
0x26a6   :  { %v6754_v49 = vpop.f32.mrb[36].mxu0 }
0x26a7   :  { %v4169_v34 = vadd.f32 %v6754_v49, %v4090_v37  ;;  %v4163_v51 = vpop.f32.mrb[37].mxu0 }
0x26a8   :  { %v4164_v59 = vadd.f32 %v4163_v51, %v4090_v37  ;;  %v4206_v51 = vld [vmem:[#allocation12 + $0x12d8] sm:$0xff] }
0x26a9   :  { %v4175_v3 = vsel %vm2028_vm2, %v4169_v34, 0.0 }
0x26aa   :  { %4176 = vadd.xlane.f32.xlu0 %v4175_v3  ;;  %v4172_v54 = vsel %vm196_vm4, %v4164_v59, 0.0  ;;  %v4209_v3 = vld [vmem:[#allocation12 + $0x1320] sm:$0xff] }
0x26ab   :  { %4173 = vadd.xlane.f32.xlu1 %v4172_v54  ;;  %v7285_v55 = vpack.c.bf16 %v4209_v3, %v4208_v2 }
0x26ae   :  { %924 = vadd.xlane.f32.xlu0 %v923_v35  ;;  %v4540_v35 = vld [vmem:[#allocation12 + $0x600] sm:$0xff] }
0x26af   :  { %920 = vadd.xlane.f32.xlu1 %v919_v60  ;;  %v7295_v60 = vpack.c.bf16 %v4540_v35, %v4539_v52 }
0x2737   :  { %v4177_v4 = vpop.xlane.xlu0 %4176 }
0x2738   :  { %v4179_v5 = vmul.f32 0.03125, %v4177_v4  ;;  %v4174_v53 = vpop.xlane.xlu1 %4173 }
0x2739   :  { %v4178_v62 = vmul.f32 0.03125, %v4174_v53 }
0x273a   :  { %v8471_v63 = vsub.f32 %v4169_v34, %v4179_v5 }
0x273b   :  { %v8473_v6 = vsub.f32 %v4164_v59, %v4178_v62  ;;  %v925_v58 = vpop.xlane.xlu0 %924  ;;  %v7281_v59 = vpack.c.bf16 %v4207_v57, %v4206_v51 }
0x273c   :  { %v927_v61 = vmul.f32 0.0052083335, %v925_v58  ;;  %v921_v7 = vpop.xlane.xlu1 %920  ;;  %v4183_v9 = vmul.f32 %v8471_v63, %v8471_v63 }
0x273d   :  { %v926_v10 = vmul.f32 0.0052083335, %v921_v7  ;;  %v4182_v19 = vmul.f32 %v8473_v6, %v8473_v6  ;;  %7282 = vmatprep.subr.bf16.mxu1 %v7281_v59 }
0x273e   :  { %v929_v15 = vadd.f32 1e-05, %v927_v61  ;;  %v4187_v13 = vsel %vm2028_vm2, %v4183_v9, 0.0  ;;  %7284 = vmatpush3.bf16.msra.mxu1 %v7281_v59 }
0x273f   :  { %v928_v23 = vadd.f32 1e-05, %v926_v10  ;;  %4188 = vadd.xlane.f32.xlu0 %v4187_v13  ;;  %v4184_v56 = vsel %vm196_vm4, %v4182_v19, 0.0  ;;  %7286 = vmatprep.subr.bf16.mxu1 %v7285_v55 }
0x2740   :  { %7541 = vrsqrt.f32 %v929_v15  ;;  %4185 = vadd.xlane.f32.xlu1 %v4184_v56 }
0x2741   :  { %7543 = vrsqrt.f32 %v928_v23 }
0x2742   :  { %7288 = vmatpush3.bf16.msra.mxu1 %v7285_v55 }
0x2743   :  { %7296 = vmatprep.subr.bf16.mxu1 %v7295_v60 }
0x2747   :  { %v8481_v8 = vpop.f32.mrb[38].mxu0 }
0x2748   :  { %v8483_v27 = vpop.f32.mrb[39].mxu0 }
0x274a   :  { %v7542_v0 = vpop.eup %7541 }
0x274b   :  { %v7544_v30 = vpop.eup %7543  ;;  %v934_v24 = vmul.f32 %v7542_v0, %v912_v45  ;;  %v935_v43 = vmul.f32 %v7542_v0, %v913_v46  ;;  %v8489_v32 = vpop.f32.mrb[40].mxu0 }
0x274c   :  { %v932_v33 = vmul.f32 %v7544_v30, %v910_v16  ;;  %v933_v12 = vmul.f32 %v7544_v30, %v911_v41  ;;  %v8491_v21 = vpop.f32.mrb[41].mxu0  ;;  %v4201_v30 = vld [vmem:[#allocation12 + $0x5d2] ss:$0 sm:$0xff] }
0x274d   :  { %v951_v11 = vmul.f32 %v942_v28, %v934_v24  ;;  %v952_v38 = vmul.f32 %v946_v25, %v935_v43 }
0x274e   :  { %v949_v39 = vmul.f32 %v942_v28, %v932_v33  ;;  %v950_v40 = vmul.f32 %v946_v25, %v933_v12  ;;  %v4541_v12 = vld [vmem:[#allocation12 + $0x618] sm:$0xff] }
0x274f   :  { %v968_v14 = vadd.f32 %v959_v44, %v951_v11  ;;  %v969_v42 = vadd.f32 %v963_v31, %v952_v38  ;;  %v8493_v48 = vpop.f32.mrb[42].mxu0  ;;  %v4542_v11 = vld [vmem:[#allocation12 + $0x630] sm:$0xff] }
0x2750   :  { %v966_v50 = vadd.f32 %v959_v44, %v949_v39  ;;  %v967_v17 = vadd.f32 %v963_v31, %v950_v40  ;;  %v8495_v37 = vpop.f32.mrb[43].mxu0 }
0x2751   :  { %v972_v45 = vmax.f32 %v968_v14, 0.0  ;;  %v973_v46 = vmax.f32 %v969_v42, 0.0  ;;  %v7299_v14 = vpack.c.bf16 %v4542_v11, %v4541_v12 }
0x2752   :  { %v970_v36 = vmax.f32 %v966_v50, 0.0  ;;  %v971_v47 = vmax.f32 %v967_v17, 0.0 }
0x2753   :  { %4297 = vst.msk [vmem:[#allocation3 + $0x8] sm:$0xff] %vm196_vm4, %v972_v45  ;;  %4325 = vst.msk [vmem:[#allocation3 + $0x48] sm:$0xff] %vm196_vm4, %v973_v46  ;;  %v8499_v41 = vpop.f32.mrb[44].mxu0 }
0x2754   :  { %4296 = vst.msk [vmem:[#allocation3] sm:$0xff] %vm196_vm4, %v970_v36  ;;  %4324 = vst.msk [vmem:[#allocation3 + $0x40] sm:$0xff] %vm196_vm4, %v971_v47  ;;  %4300 = vrot.lane.b32.xlu1 %v970_v36, %s7825_s10  ;;  %v8504_v16 = vpop.f32.mrb[45].mxu0 }
0x2755   :  { %4302 = vrot.lane.b32.xlu0 %v972_v45, %s7825_s10 }
0x2757   :  { %v8507_v49 = vpop.f32.mrb[46].mxu0 }
0x2758   :  { %4308 = vrot.lane.b32.xlu1 %v970_v36, %s7824_s9  ;;  %v8510_v34 = vpop.f32.mrb[47].mxu0 }
0x2759   :  { %4318 = vrot.lane.b32.xlu0 %v972_v45, %s7823_s4 }
0x275a   :  { %v4348_v2 = vld [vmem:[#allocation3 + $0x48] sm:$0xff] }
0x275b   :  { %v8516_v54 = vpop.f32.mrb[48].mxu0  ;;  %v4339_v38 = vld [vmem:[#allocation3] sm:$0xff] }
0x275c   :  { %4310 = vrot.lane.b32.xlu1 %v972_v45, %s7824_s9  ;;  %v8519_v4 = vpop.f32.mrb[49].mxu0  ;;  %v4347_v59 = vld [vmem:[#allocation3 + $0x40] sm:$0xff] }
0x275d   :  { %4330 = vrot.lane.b32.xlu0 %v973_v46, %s7825_s10 }
0x2760   :  { %4316 = vrot.lane.b32.xlu1 %v970_v36, %s7823_s4 }
0x2764   :  { %4328 = vrot.lane.b32.xlu1 %v971_v47, %s7825_s10 }
0x27cc   :  { %v4189_v5 = vpop.xlane.xlu0 %4188 }
0x27cd   :  { %v4191_v53 = vmul.f32 0.03125, %v4189_v5  ;;  %v4186_v62 = vpop.xlane.xlu1 %4185 }
0x27ce   :  { %v4190_v58 = vmul.f32 0.03125, %v4186_v62 }
0x27cf   :  { %v4193_v61 = vadd.f32 1e-05, %v4191_v53 }
0x27d0   :  { %v4192_v7 = vadd.f32 1e-05, %v4190_v58  ;;  %v4303_v9 = vpop.permute.xlu0 %4302 }
0x27d1   :  { %7545 = vrsqrt.f32 %v4193_v61  ;;  %4307 = vst.msk [vmem:[#allocation3 + $0x18] sm:$0xff] %vm196_vm4, %v4303_v9  ;;  %v4301_v10 = vpop.permute.xlu1 %4300 }
0x27d2   :  { %7547 = vrsqrt.f32 %v4192_v7  ;;  %4306 = vst.msk [vmem:[#allocation3 + $0x10] sm:$0xff] %vm196_vm4, %v4301_v10 }
0x27d4   :  { %v4319_v19 = vpop.permute.xlu0 %4318 }
0x27d5   :  { %4323 = vst.msk [vmem:[#allocation3 + $0x38] sm:$0xff] %vm196_vm4, %v4319_v19  ;;  %v4309_v15 = vpop.permute.xlu1 %4308 }
0x27d6   :  { %4314 = vst.msk [vmem:[#allocation3 + $0x20] sm:$0xff] %vm196_vm4, %v4309_v15 }
0x27d8   :  { %v4331_v13 = vpop.permute.xlu0 %4330  ;;  %v4342_v45 = vld [vmem:[#allocation3 + $0x18] sm:$0xff] }
0x27d9   :  { %4335 = vst.msk [vmem:[#allocation3 + $0x58] sm:$0xff] %vm196_vm4, %v4331_v13  ;;  %v4311_v23 = vpop.permute.xlu1 %4310  ;;  %v4341_v42 = vld [vmem:[#allocation3 + $0x10] sm:$0xff] }
0x27da   :  { %4315 = vst.msk [vmem:[#allocation3 + $0x28] sm:$0xff] %vm196_vm4, %v4311_v23  ;;  %v4529_v17 = vadd.f32 %v8491_v21, %v4341_v42 }
0x27db   :  { %v7546_v56 = vpop.eup %7545 }
0x27dc   :  { %v7548_v26 = vpop.eup %7547  ;;  %v4197_v28 = vmul.f32 %v7546_v56, %v8471_v63  ;;  %v4527_v63 = vadd.f32 %v8483_v27, %v4339_v38  ;;  %v4530_v27 = vadd.f32 %v8489_v32, %v4342_v45  ;;  %v4346_v57 = vld [vmem:[#allocation3 + $0x38] sm:$0xff] }
0x27dd   :  { %v4317_v25 = vpop.permute.xlu1 %4316  ;;  %v4196_v0 = vmul.f32 %v7548_v26, %v8473_v6  ;;  %v4340_v6 = vld [vmem:[#allocation3 + $0x8] sm:$0xff]  ;;  %v4343_v46 = vld [vmem:[#allocation3 + $0x20] sm:$0xff]  ;;  %v4534_v32 = vadd.f32 %v8499_v41, %v4346_v57 }
0x27de   :  { %4322 = vst.msk [vmem:[#allocation3 + $0x30] sm:$0xff] %vm196_vm4, %v4317_v25  ;;  %v4200_v44 = vmul.f32 %v4198_v22, %v4197_v28  ;;  %v4528_v50 = vadd.f32 %v8481_v8, %v4340_v6  ;;  %v4531_v36 = vadd.f32 %v8495_v37, %v4343_v46  ;;  %v4535_v37 = vadd.f32 %v8510_v34, %v4347_v59  ;;  %v4210_v41 = vld [vmem:[#allocation12 + $0x1338] ss:$0 sm:$0xff] }
0x27df   :  { %v4199_v31 = vmul.f32 %v4198_v22, %v4196_v0 }
0x27e0   :  { %v4203_v24 = vadd.f32 %v4201_v30, %v4200_v44  ;;  %v4350_v55 = vld [vmem:[#allocation3 + $0x58] sm:$0xff] }
0x27e1   :  { %v4329_v43 = vpop.permute.xlu1 %4328  ;;  %v4202_v33 = vadd.f32 %v4201_v30, %v4199_v31  ;;  %v4344_v47 = vld [vmem:[#allocation3 + $0x28] sm:$0xff]  ;;  %v4538_v52 = vadd.f32 %v8516_v54, %v4350_v55 }
0x27e2   :  { %4334 = vst.msk [vmem:[#allocation3 + $0x50] sm:$0xff] %vm196_vm4, %v4329_v43  ;;  %v4205_v40 = vmax.f32 %v4203_v24, 0.0  ;;  %v4532_v8 = vadd.f32 %v8493_v48, %v4344_v47  ;;  %v4536_v48 = vadd.f32 %v8507_v49, %v4348_v2  ;;  %v4543_v49 = vld [vmem:[#allocation12 + $0x648] ss:$0 sm:$0xff] }
0x27e3   :  { %v4204_v39 = vmax.f32 %v4202_v33, 0.0 }
0x27e5   :  { %6763 = vmatprep.mubr.msk.f32.mxu1 %vm196_vm4, %v4204_v39  ;;  %v4345_v51 = vld [vmem:[#allocation3 + $0x30] sm:$0xff] }
0x27e6   :  { %6764 = vmatmul.mubr.msk.f32.vlgmr.msra.gmra.mrb[46].mxu1 %vm196_vm4, %v4205_v40  ;;  %v4533_v21 = vadd.f32 %v8504_v16, %v4345_v51 }
0x27e7   :  { %7298 = vmatpush3.bf16.msra.mxu1 %v7295_v60  ;;  %6796 = vmatprep.mubr.msk.f32.mxu1 %vm196_vm4, %v4527_v63 }
0x27e8   :  { %7300 = vmatprep.subr.bf16.mxu1 %v7299_v14 }
0x27e9   :  { %v4349_v3 = vld [vmem:[#allocation3 + $0x50] sm:$0xff] }
0x27ea   :  { %v4537_v16 = vadd.f32 %v8519_v4, %v4349_v3 }
0x27eb   :  { %7302 = vmatpush3.bf16.msra.mxu1 %v7299_v14 }
0x27ee   :  { %6797 = vmatmul.mubr.msk.f32.vlgmr.msra.gmra.mrb[48].mxu1 %vm196_vm4, %v4528_v50 }
0x27ef   :  { %6799 = vmatprep.mubr.msk.f32.mxu1 %vm196_vm4, %v4529_v17 }
0x27f2   :  { %6800 = vmatmul.mubr.msk.f32.gmra.mrb[50].mxu1 %vm196_vm4, %v4530_v27 }
0x27f3   :  { %6802 = vmatprep.mubr.msk.f32.mxu1 %vm196_vm4, %v4531_v36 }
0x27f6   :  { %6803 = vmatmul.mubr.msk.f32.gmra.mrb[52].mxu1 %vm196_vm4, %v4532_v8 }
0x27f7   :  { %6805 = vmatprep.mubr.msk.f32.mxu1 %vm196_vm4, %v4533_v21 }
0x27fa   :  { %6806 = vmatmul.mubr.msk.f32.gmra.mrb[54].mxu1 %vm196_vm4, %v4534_v32 }
0x27fb   :  { %6808 = vmatprep.mubr.msk.f32.mxu1 %vm196_vm4, %v4535_v37 }
0x27fe   :  { %6809 = vmatmul.mubr.msk.f32.gmra.mrb[56].mxu1 %vm196_vm4, %v4536_v48 }
0x27ff   :  { %6811 = vmatprep.mubr.msk.f32.mxu1 %vm196_vm4, %v4537_v16 }
0x2802   :  { %6812 = vmatmul.mubr.msk.f32.gmra.mrb[58].mxu1 %vm196_vm4, %v4538_v52 }
0x28b9   :  { %v6765_v34 = vpop.f32.mrb[46].mxu1 }
0x28ba   :  { %v4289_v35 = vadd.f32 %v6765_v34, %v4210_v41  ;;  %v4283_v60 = vpop.f32.mrb[47].mxu1 }
0x28bb   :  { %v4284_v5 = vadd.f32 %v4283_v60, %v4210_v41 }
0x28bc   :  { %4295 = vst.msk [vmem:[%s9078_s5 + $0x8] sm:$0xf] %vm4294_vm3, %v4289_v35 }
0x28bd   :  { %4293 = vst.msk [vmem:[%s9078_s5] sm:$0xff] %vm4292_vm5, %v4284_v5  ;;  %s7838_s5 = smov [#allocation13]  }
0x28be   :  { %s5909_s22 = sshll.u32 %s7838_s5, 4  ;;  %s5910_s22 = int_to_ptr.vmem [resolvable:$true] %s5909_s22 }
0x28bf   :  { %s7781_s23 = scalar_lea.vmem %s5910_s22, 4608  ;;  %p7786_p13 = scmp.lt.s32.totalorder %s5910_s22, %s5910_s22 }
0x28c0   :  { %p7782_p12 = scmp.ne.s32.totalorder %s5910_s22, %s7781_s23  ;;  %p7787_p0 = scmp.lt.s32.totalorder %s7781_s23, %s7781_s23 }
0x28c1   :  { %v6798_v4 = vpop.f32.mrb[48].mxu1 }
0x28c2   :  { %v4652_v54 = vadd.f32 %v6798_v4, %v4543_v49  ;;  %v4646_v53 = vpop.f32.mrb[49].mxu1  ;;  %p7788_p1 = por %p7787_p0, %p7786_p13 }
0x28c3   :  { %v4647_v62 = vadd.f32 %v4646_v53, %v4543_v49 }
0x28c4   :  { %v4708_v58 = vsel %vm196_vm4, %v4652_v54, 0.0  ;;  %p7789_p2 = pnand %p7788_p1, %p7782_p12 }
0x28c5   :  { %4709 = vadd.xlane.f32.xlu0 %v4708_v58  ;;  %v6801_v61 = vpop.f32.mrb[50].mxu1  ;;  %v4705_v7 = vsel %vm196_vm4, %v4647_v62, 0.0 }
0x28c6   :  { %4706 = vadd.xlane.f32.xlu1 %v4705_v7  ;;  %v4656_v9 = vpop.f32.mrb[51].mxu1  ;;  %v4662_v19 = vadd.f32 %v6801_v61, %v4543_v49 }
0x28c7   :  { %v4657_v10 = vadd.f32 %v4656_v9, %v4543_v49 }
0x28c8   :  { %v4714_v28 = vsel %vm196_vm4, %v4662_v19, 0.0 }
0x28c9   :  { %v6804_v15 = vpop.f32.mrb[52].mxu1  ;;  %v4711_v13 = vsel %vm196_vm4, %v4657_v10, 0.0 }
0x28ca   :  { %4712 = vadd.xlane.f32.xlu0 %v4711_v13  ;;  %v4666_v23 = vpop.f32.mrb[53].mxu1  ;;  %v4672_v22 = vadd.f32 %v6804_v15, %v4543_v49 }
0x28cb   :  { %v4667_v56 = vadd.f32 %v4666_v23, %v4543_v49 }
0x28cc   :  { %v4720_v24 = vsel %vm196_vm4, %v4672_v22, 0.0 }
0x28cd   :  { %v6807_v26 = vpop.f32.mrb[54].mxu1  ;;  %v4717_v25 = vsel %vm196_vm4, %v4667_v56, 0.0 }
0x28ce   :  { %4715 = vadd.xlane.f32.xlu0 %v4714_v28  ;;  %4718 = vadd.xlane.f32.xlu1 %v4717_v25  ;;  %v4676_v0 = vpop.f32.mrb[55].mxu1  ;;  %v8568_v44 = vadd.f32 %v6807_v26, %v4543_v49 }
0x28cf   :  { %v4677_v30 = vadd.f32 %v4676_v0, %v4543_v49 }
0x28d0   :  { %v4726_v39 = vsel %vm196_vm4, %v8568_v44, 0.0 }
0x28d1   :  { %v6810_v31 = vpop.f32.mrb[56].mxu1  ;;  %v4723_v43 = vsel %vm196_vm4, %v4677_v30, 0.0 }
0x28d2   :  { %4721 = vadd.xlane.f32.xlu0 %v4720_v24  ;;  %v4686_v33 = vpop.f32.mrb[57].mxu1  ;;  %4724 = vadd.xlane.f32.xlu1 %v4723_v43  ;;  %v8572_v11 = vadd.f32 %v6810_v31, %v4543_v49 }
0x28d3   :  { %v4687_v12 = vadd.f32 %v4686_v33, %v4543_v49 }
0x28d4   :  { %v4732_v42 = vsel %vm196_vm4, %v8572_v11, 0.0 }
0x28d5   :  { %v6813_v38 = vpop.f32.mrb[58].mxu1  ;;  %v4729_v40 = vsel %vm196_vm4, %v4687_v12, 0.0 }
0x28d6   :  { %4727 = vadd.xlane.f32.xlu0 %v4726_v39  ;;  %4730 = vadd.xlane.f32.xlu1 %v4729_v40  ;;  %v4696_v14 = vpop.f32.mrb[59].mxu1  ;;  %v8579_v6 = vadd.f32 %v6813_v38, %v4543_v49 }
0x28d7   :  { %v8577_v63 = vadd.f32 %v4696_v14, %v4543_v49 }
0x28d8   :  { %v4738_v17 = vsel %vm196_vm4, %v8579_v6, 0.0 }
0x28d9   :  { %v4735_v50 = vsel %vm196_vm4, %v8577_v63, 0.0 }
0x28da   :  { %4733 = vadd.xlane.f32.xlu0 %v4732_v42  ;;  %4736 = vadd.xlane.f32.xlu1 %v4735_v50 }
0x28de   :  { %4739 = vadd.xlane.f32.xlu0 %v4738_v17 }
0x2952   :  { %v4710_v45 = vpop.xlane.xlu0 %4709 }
0x2953   :  { %v4742_v46 = vmul.f32 0.03125, %v4710_v45  ;;  %v4707_v27 = vpop.xlane.xlu1 %4706 }
0x2954   :  { %v4741_v36 = vmul.f32 0.03125, %v4707_v27  ;;  %v4900_v27 = vld [vmem:[#allocation12 + $0x678] sm:$0xff] }
0x2955   :  { %v8587_v47 = vsub.f32 %v4652_v54, %v4742_v46  ;;  %v4899_v46 = vld [vmem:[#allocation12 + $0x660] sm:$0xff] }
0x2956   :  { %v8589_v51 = vsub.f32 %v4647_v62, %v4741_v36  ;;  %v7303_v36 = vpack.c.bf16 %v4900_v27, %v4899_v46 }
0x2957   :  { %v4713_v8 = vpop.xlane.xlu0 %4712  ;;  %v4766_v21 = vmul.f32 %v8587_v47, %v8587_v47 }
0x2958   :  { %v4743_v57 = vmul.f32 0.03125, %v4713_v8  ;;  %v4765_v59 = vmul.f32 %v8589_v51, %v8589_v51  ;;  %7304 = vmatprep.subr.bf16.mxu0 %v7303_v36  ;;  %v4901_v8 = vld [vmem:[#allocation12 + $0x690] sm:$0xff] }
0x2959   :  { %v4780_v32 = vsel %vm196_vm4, %v4766_v21, 0.0  ;;  %7306 = vmatpush3.bf16.msra.mxu0 %v7303_v36 }
0x295a   :  { %v8596_v2 = vsub.f32 %v4657_v10, %v4743_v57  ;;  %4781 = vadd.xlane.f32.xlu0 %v4780_v32  ;;  %v4777_v37 = vsel %vm196_vm4, %v4765_v59, 0.0 }
0x295b   :  { %v4716_v3 = vpop.xlane.xlu0 %4715  ;;  %4778 = vadd.xlane.f32.xlu1 %v4777_v37  ;;  %v4719_v48 = vpop.xlane.xlu1 %4718 }
0x295c   :  { %v4744_v55 = vmul.f32 0.03125, %v4716_v3  ;;  %v4745_v16 = vmul.f32 0.03125, %v4719_v48  ;;  %v4767_v52 = vmul.f32 %v8596_v2, %v8596_v2 }
0x295e   :  { %v8601_v41 = vsub.f32 %v4662_v19, %v4744_v55  ;;  %v8603_v34 = vsub.f32 %v4667_v56, %v4745_v16  ;;  %v4783_v35 = vsel %vm196_vm4, %v4767_v52, 0.0 }
0x295f   :  { %v4722_v60 = vpop.xlane.xlu0 %4721  ;;  %4784 = vadd.xlane.f32.xlu1 %v4783_v35  ;;  %v4725_v5 = vpop.xlane.xlu1 %4724 }
0x2960   :  { %v4746_v49 = vmul.f32 0.03125, %v4722_v60  ;;  %v4747_v4 = vmul.f32 0.03125, %v4725_v5  ;;  %v4768_v54 = vmul.f32 %v8601_v41, %v8601_v41  ;;  %v4769_v53 = vmul.f32 %v8603_v34, %v8603_v34 }
0x2962   :  { %v8610_v62 = vsub.f32 %v4672_v22, %v4746_v49  ;;  %v8612_v58 = vsub.f32 %v4677_v30, %v4747_v4  ;;  %v4786_v61 = vsel %vm196_vm4, %v4768_v54, 0.0  ;;  %v4789_v7 = vsel %vm196_vm4, %v4769_v53, 0.0 }
0x2963   :  { %v4728_v9 = vpop.xlane.xlu0 %4727  ;;  %4787 = vadd.xlane.f32.xlu0 %v4786_v61  ;;  %4790 = vadd.xlane.f32.xlu1 %v4789_v7  ;;  %v4731_v10 = vpop.xlane.xlu1 %4730 }
0x2964   :  { %v4748_v19 = vmul.f32 0.03125, %v4728_v9  ;;  %v4749_v15 = vmul.f32 0.03125, %v4731_v10  ;;  %v4770_v13 = vmul.f32 %v8610_v62, %v8610_v62  ;;  %v4771_v23 = vmul.f32 %v8612_v58, %v8612_v58 }
0x2966   :  { %v8621_v56 = vsub.f32 %v8568_v44, %v4748_v19  ;;  %v8623_v22 = vsub.f32 %v4687_v12, %v4749_v15  ;;  %v4792_v26 = vsel %vm196_vm4, %v4770_v13, 0.0  ;;  %v4795_v28 = vsel %vm196_vm4, %v4771_v23, 0.0  ;;  %v8651_v19 = vld [vmem:[#allocation12 + $0x649] ss:$0 sm:$0xff] }
0x2967   :  { %v4734_v25 = vpop.xlane.xlu0 %4733  ;;  %4793 = vadd.xlane.f32.xlu0 %v4792_v26  ;;  %4796 = vadd.xlane.f32.xlu1 %v4795_v28  ;;  %v4737_v0 = vpop.xlane.xlu1 %4736  ;;  %v8654_v28 = vld [vmem:[#allocation12 + $0x64a] ss:$0 sm:$0xff] }
0x2968   :  { %v4750_v30 = vmul.f32 0.03125, %v4734_v25  ;;  %v4751_v31 = vmul.f32 0.03125, %v4737_v0  ;;  %v4772_v24 = vmul.f32 %v8621_v56, %v8621_v56  ;;  %v4773_v43 = vmul.f32 %v8623_v22, %v8623_v22 }
0x296a   :  { %v8632_v44 = vsub.f32 %v8572_v11, %v4750_v30  ;;  %v8635_v33 = vsub.f32 %v8577_v63, %v4751_v31  ;;  %v4798_v12 = vsel %vm196_vm4, %v4772_v24, 0.0  ;;  %v4801_v38 = vsel %vm196_vm4, %v4773_v43, 0.0 }
0x296b   :  { %4799 = vadd.xlane.f32.xlu0 %v4798_v12  ;;  %v4740_v39 = vpop.xlane.xlu0 %4739  ;;  %4802 = vadd.xlane.f32.xlu1 %v4801_v38 }
0x296c   :  { %v4752_v40 = vmul.f32 0.03125, %v4740_v39  ;;  %v4774_v14 = vmul.f32 %v8632_v44, %v8632_v44  ;;  %v4775_v42 = vmul.f32 %v8635_v33, %v8635_v33 }
0x296e   :  { %v8644_v11 = vsub.f32 %v8579_v6, %v4752_v40  ;;  %v4804_v63 = vsel %vm196_vm4, %v4774_v14, 0.0  ;;  %v4807_v50 = vsel %vm196_vm4, %v4775_v42, 0.0  ;;  %v4902_v6 = vld [vmem:[#allocation12 + $0x6a8] sm:$0xff] }
0x296f   :  { %4805 = vadd.xlane.f32.xlu0 %v4804_v63  ;;  %4808 = vadd.xlane.f32.xlu1 %v4807_v50  ;;  %v7307_v21 = vpack.c.bf16 %v4902_v6, %v4901_v8 }
0x2970   :  { %v4776_v17 = vmul.f32 %v8644_v11, %v8644_v11 }
0x2971   :  { %7308 = vmatprep.subr.bf16.mxu0 %v7307_v21 }
0x2972   :  { %v4810_v45 = vsel %vm196_vm4, %v4776_v17, 0.0  ;;  %7310 = vmatpush3.bf16.msra.mxu0 %v7307_v21 }
0x2973   :  { %4811 = vadd.xlane.f32.xlu0 %v4810_v45 }
0x29e7   :  { %v4782_v57 = vpop.xlane.xlu0 %4781 }
0x29e8   :  { %v4814_v59 = vmul.f32 0.03125, %v4782_v57  ;;  %v4779_v32 = vpop.xlane.xlu1 %4778 }
0x29e9   :  { %v4813_v37 = vmul.f32 0.03125, %v4779_v32 }
0x29ea   :  { %v4826_v3 = vadd.f32 1e-05, %v4814_v59 }
0x29eb   :  { %v4825_v48 = vadd.f32 1e-05, %v4813_v37 }
0x29ec   :  { %7549 = vrsqrt.f32 %v4826_v3  ;;  %v4785_v55 = vpop.xlane.xlu1 %4784 }
0x29ed   :  { %7551 = vrsqrt.f32 %v4825_v48  ;;  %v4815_v16 = vmul.f32 0.03125, %v4785_v55 }
0x29ef   :  { %v4827_v52 = vadd.f32 1e-05, %v4815_v16 }
0x29f0   :  { %v4788_v35 = vpop.xlane.xlu0 %4787  ;;  %v4791_v60 = vpop.xlane.xlu1 %4790 }
0x29f1   :  { %7553 = vrsqrt.f32 %v4827_v52  ;;  %v4816_v5 = vmul.f32 0.03125, %v4788_v35  ;;  %v4817_v49 = vmul.f32 0.03125, %v4791_v60 }
0x29f3   :  { %v4828_v4 = vadd.f32 1e-05, %v4816_v5  ;;  %v4829_v54 = vadd.f32 1e-05, %v4817_v49 }
0x29f4   :  { %v4794_v53 = vpop.xlane.xlu0 %4793  ;;  %v4797_v61 = vpop.xlane.xlu1 %4796 }
0x29f5   :  { %7555 = vrsqrt.f32 %v4828_v4  ;;  %v4818_v7 = vmul.f32 0.03125, %v4794_v53  ;;  %v4819_v9 = vmul.f32 0.03125, %v4797_v61 }
0x29f6   :  { %v7550_v10 = vpop.eup %7549  ;;  %7557 = vrsqrt.f32 %v4829_v54 }
0x29f7   :  { %v7552_v15 = vpop.eup %7551  ;;  %v4850_v13 = vmul.f32 %v7550_v10, %v8587_v47  ;;  %v4830_v23 = vadd.f32 1e-05, %v4818_v7  ;;  %v4831_v26 = vadd.f32 1e-05, %v4819_v9 }
0x29f8   :  { %v4800_v25 = vpop.xlane.xlu0 %4799  ;;  %v4803_v0 = vpop.xlane.xlu1 %4802  ;;  %v4849_v30 = vmul.f32 %v7552_v15, %v8589_v51 }
0x29f9   :  { %v4863_v31 = vmul.f32 %v8651_v19, %v4850_v13  ;;  %7559 = vrsqrt.f32 %v4830_v23  ;;  %v4820_v24 = vmul.f32 0.03125, %v4800_v25  ;;  %v4821_v43 = vmul.f32 0.03125, %v4803_v0 }
0x29fa   :  { %7561 = vrsqrt.f32 %v4831_v26  ;;  %v4862_v12 = vmul.f32 %v8651_v19, %v4849_v30 }
0x29fb   :  { %v7554_v38 = vpop.eup %7553  ;;  %v4876_v39 = vadd.f32 %v8654_v28, %v4863_v31  ;;  %v4832_v47 = vadd.f32 1e-05, %v4820_v24  ;;  %v4833_v40 = vadd.f32 1e-05, %v4821_v43 }
0x29fc   :  { %v4806_v14 = vpop.xlane.xlu0 %4805  ;;  %v4809_v42 = vpop.xlane.xlu1 %4808  ;;  %v4875_v63 = vadd.f32 %v8654_v28, %v4862_v12  ;;  %v4851_v50 = vmul.f32 %v7554_v38, %v8596_v2 }
0x29fd   :  { %7563 = vrsqrt.f32 %v4832_v47  ;;  %v4822_v51 = vmul.f32 0.03125, %v4806_v14  ;;  %v4823_v17 = vmul.f32 0.03125, %v4809_v42  ;;  %v4888_v36 = vmax.f32 %v4876_v39, 0.0 }
0x29fe   :  { %7565 = vrsqrt.f32 %v4833_v40  ;;  %v4887_v45 = vmax.f32 %v4875_v63, 0.0  ;;  %v4864_v46 = vmul.f32 %v8651_v19, %v4851_v50 }
0x29ff   :  { %v7556_v27 = vpop.eup %7555  ;;  %v4834_v8 = vadd.f32 1e-05, %v4822_v51  ;;  %v4835_v6 = vadd.f32 1e-05, %v4823_v17 }
0x2a00   :  { %v7558_v21 = vpop.eup %7557  ;;  %v4812_v57 = vpop.xlane.xlu0 %4811  ;;  %6822 = vmatprep.mubr.msk.f32.mxu0 %vm196_vm4, %v4887_v45  ;;  %v4877_v59 = vadd.f32 %v8654_v28, %v4864_v46  ;;  %v4852_v32 = vmul.f32 %v7556_v27, %v8601_v41 }
0x2a01   :  { %7567 = vrsqrt.f32 %v4834_v8  ;;  %v4824_v2 = vmul.f32 0.03125, %v4812_v57  ;;  %6823 = vmatmul.mubr.msk.f32.vlgmr.msra.gmra.mrb[50].mxu0 %vm196_vm4, %v4888_v36  ;;  %v4853_v37 = vmul.f32 %v7558_v21, %v8603_v34 }
0x2a02   :  { %7569 = vrsqrt.f32 %v4835_v6  ;;  %v4889_v3 = vmax.f32 %v4877_v59, 0.0  ;;  %v4865_v48 = vmul.f32 %v8651_v19, %v4852_v32 }
0x2a03   :  { %v7560_v55 = vpop.eup %7559  ;;  %v4836_v16 = vadd.f32 1e-05, %v4824_v2  ;;  %v4866_v52 = vmul.f32 %v8651_v19, %v4853_v37 }
0x2a04   :  { %v7562_v35 = vpop.eup %7561  ;;  %6825 = vmatprep.mubr.msk.f32.mxu0 %vm196_vm4, %v4889_v3  ;;  %v4878_v60 = vadd.f32 %v8654_v28, %v4865_v48  ;;  %v4854_v41 = vmul.f32 %v7560_v55, %v8610_v62 }
0x2a05   :  { %7571 = vrsqrt.f32 %v4836_v16  ;;  %v4879_v5 = vadd.f32 %v8654_v28, %v4866_v52  ;;  %v4855_v34 = vmul.f32 %v7562_v35, %v8612_v58 }
0x2a06   :  { %v4890_v49 = vmax.f32 %v4878_v60, 0.0  ;;  %v4867_v4 = vmul.f32 %v8651_v19, %v4854_v41 }
0x2a07   :  { %v7564_v54 = vpop.eup %7563  ;;  %v4891_v53 = vmax.f32 %v4879_v5, 0.0  ;;  %v4868_v61 = vmul.f32 %v8651_v19, %v4855_v34 }
0x2a08   :  { %v7566_v7 = vpop.eup %7565  ;;  %6826 = vmatmul.mubr.msk.f32.gmra.mrb[52].mxu0 %vm196_vm4, %v4890_v49  ;;  %v4880_v9 = vadd.f32 %v8654_v28, %v4867_v4  ;;  %v4856_v10 = vmul.f32 %v7564_v54, %v8621_v56 }
0x2a09   :  { %6828 = vmatprep.mubr.msk.f32.mxu0 %vm196_vm4, %v4891_v53  ;;  %v4881_v62 = vadd.f32 %v8654_v28, %v4868_v61  ;;  %v4857_v58 = vmul.f32 %v7566_v7, %v8623_v22 }
0x2a0a   :  { %v4892_v15 = vmax.f32 %v4880_v9, 0.0  ;;  %v4869_v13 = vmul.f32 %v8651_v19, %v4856_v10 }
0x2a0b   :  { %v7568_v23 = vpop.eup %7567  ;;  %v4893_v26 = vmax.f32 %v4881_v62, 0.0  ;;  %v4870_v25 = vmul.f32 %v8651_v19, %v4857_v58 }
0x2a0c   :  { %v7570_v0 = vpop.eup %7569  ;;  %6829 = vmatmul.mubr.msk.f32.gmra.mrb[54].mxu0 %vm196_vm4, %v4892_v15  ;;  %v4882_v30 = vadd.f32 %v8654_v28, %v4869_v13  ;;  %v4858_v56 = vmul.f32 %v7568_v23, %v8632_v44 }
0x2a0d   :  { %6831 = vmatprep.mubr.msk.f32.mxu0 %vm196_vm4, %v4893_v26  ;;  %v4883_v31 = vadd.f32 %v8654_v28, %v4870_v25  ;;  %v4859_v22 = vmul.f32 %v7570_v0, %v8635_v33 }
0x2a0e   :  { %v4894_v24 = vmax.f32 %v4882_v30, 0.0  ;;  %v4871_v43 = vmul.f32 %v8651_v19, %v4858_v56 }
0x2a0f   :  { %v7572_v12 = vpop.eup %7571  ;;  %v4895_v38 = vmax.f32 %v4883_v31, 0.0  ;;  %v4872_v39 = vmul.f32 %v8651_v19, %v4859_v22 }
0x2a10   :  { %6832 = vmatmul.mubr.msk.f32.gmra.mrb[56].mxu0 %vm196_vm4, %v4894_v24  ;;  %v4884_v47 = vadd.f32 %v8654_v28, %v4871_v43  ;;  %v4860_v40 = vmul.f32 %v7572_v12, %v8644_v11  ;;  %v4903_v11 = vld [vmem:[#allocation12 + $0x6c0] ss:$0 sm:$0xff] }
0x2a11   :  { %6834 = vmatprep.mubr.msk.f32.mxu0 %vm196_vm4, %v4895_v38  ;;  %v4885_v44 = vadd.f32 %v8654_v28, %v4872_v39 }
0x2a12   :  { %v4896_v14 = vmax.f32 %v4884_v47, 0.0  ;;  %v4873_v33 = vmul.f32 %v8651_v19, %v4860_v40 }
0x2a13   :  { %v4897_v42 = vmax.f32 %v4885_v44, 0.0 }
0x2a14   :  { %6835 = vmatmul.mubr.msk.f32.gmra.mrb[58].mxu0 %vm196_vm4, %v4896_v14  ;;  %v4886_v63 = vadd.f32 %v8654_v28, %v4873_v33 }
0x2a15   :  { %6837 = vmatprep.mubr.msk.f32.mxu0 %vm196_vm4, %v4897_v42 }
0x2a16   :  { %v4898_v50 = vmax.f32 %v4886_v63, 0.0 }
0x2a18   :  { %6838 = vmatmul.mubr.msk.f32.gmra.mrb[60].mxu0 %vm196_vm4, %v4898_v50 }
0x2a19   :  { %5541 = vmatprep.mubr.f32.mxu0 %v7822_v1 }
0x2ad4   :  { %v6824_v51 = vpop.f32.mrb[50].mxu0 }
0x2ad5   :  { %v5012_v17 = vadd.f32 %v6824_v51, %v4903_v11  ;;  %v5006_v45 = vpop.f32.mrb[51].mxu0 }
0x2ad6   :  { %v5007_v46 = vadd.f32 %v5006_v45, %v4903_v11 }
0x2ad7   :  { %v5068_v27 = vsel %vm196_vm4, %v5012_v17, 0.0 }
0x2ad8   :  { %5069 = vadd.xlane.f32.xlu0 %v5068_v27  ;;  %v5065_v19 = vsel %vm196_vm4, %v5007_v46, 0.0 }
0x2ad9   :  { %5066 = vadd.xlane.f32.xlu1 %v5065_v19 }
0x2adb   :  { %v6827_v36 = vpop.f32.mrb[52].mxu0 }
0x2adc   :  { %v5022_v28 = vadd.f32 %v6827_v36, %v4903_v11  ;;  %v5016_v8 = vpop.f32.mrb[53].mxu0 }
0x2add   :  { %v5017_v6 = vadd.f32 %v5016_v8, %v4903_v11 }
0x2ade   :  { %v5074_v21 = vsel %vm196_vm4, %v5022_v28, 0.0 }
0x2adf   :  { %5075 = vadd.xlane.f32.xlu0 %v5074_v21  ;;  %v6830_v57 = vpop.f32.mrb[54].mxu0  ;;  %v5071_v59 = vsel %vm196_vm4, %v5017_v6, 0.0 }
0x2ae0   :  { %v5032_v32 = vadd.f32 %v6830_v57, %v4903_v11  ;;  %5072 = vadd.xlane.f32.xlu1 %v5071_v59  ;;  %v5026_v2 = vpop.f32.mrb[55].mxu0 }
0x2ae1   :  { %v5027_v37 = vadd.f32 %v5026_v2, %v4903_v11 }
0x2ae2   :  { %v5080_v3 = vsel %vm196_vm4, %v5032_v32, 0.0 }
0x2ae3   :  { %5081 = vadd.xlane.f32.xlu0 %v5080_v3  ;;  %v6833_v48 = vpop.f32.mrb[56].mxu0  ;;  %v5077_v55 = vsel %vm196_vm4, %v5027_v37, 0.0 }
0x2ae4   :  { %v5042_v16 = vadd.f32 %v6833_v48, %v4903_v11  ;;  %5078 = vadd.xlane.f32.xlu1 %v5077_v55  ;;  %v5036_v52 = vpop.f32.mrb[57].mxu0 }
0x2ae5   :  { %v5037_v35 = vadd.f32 %v5036_v52, %v4903_v11 }
0x2ae6   :  { %v5086_v60 = vsel %vm196_vm4, %v5042_v16, 0.0 }
0x2ae7   :  { %5087 = vadd.xlane.f32.xlu0 %v5086_v60  ;;  %v6836_v41 = vpop.f32.mrb[58].mxu0  ;;  %v5083_v5 = vsel %vm196_vm4, %v5037_v35, 0.0 }
0x2ae8   :  { %v8712_v34 = vadd.f32 %v6836_v41, %v4903_v11  ;;  %5084 = vadd.xlane.f32.xlu1 %v5083_v5  ;;  %v5046_v49 = vpop.f32.mrb[59].mxu0 }
0x2ae9   :  { %v8714_v4 = vadd.f32 %v5046_v49, %v4903_v11 }
0x2aea   :  { %v5092_v54 = vsel %vm196_vm4, %v8712_v34, 0.0 }
0x2aeb   :  { %5093 = vadd.xlane.f32.xlu0 %v5092_v54  ;;  %v6839_v53 = vpop.f32.mrb[60].mxu0  ;;  %v5089_v61 = vsel %vm196_vm4, %v8714_v4, 0.0 }
0x2aec   :  { %v8720_v7 = vadd.f32 %v6839_v53, %v4903_v11  ;;  %5090 = vadd.xlane.f32.xlu1 %v5089_v61  ;;  %v5056_v9 = vpop.f32.mrb[61].mxu0 }
0x2aed   :  { %v8722_v10 = vadd.f32 %v5056_v9, %v4903_v11 }
0x2aee   :  { %v5098_v62 = vsel %vm196_vm4, %v8720_v7, 0.0 }
0x2aef   :  { %5099 = vadd.xlane.f32.xlu0 %v5098_v62  ;;  %v5095_v58 = vsel %vm196_vm4, %v8722_v10, 0.0 }
0x2af0   :  { %5096 = vadd.xlane.f32.xlu1 %v5095_v58 }
0x2b65   :  { %v5070_v15 = vpop.xlane.xlu0 %5069 }
0x2b66   :  { %v5102_v13 = vmul.f32 0.03125, %v5070_v15  ;;  %v5067_v23 = vpop.xlane.xlu1 %5066 }
0x2b67   :  { %v5101_v26 = vmul.f32 0.03125, %v5067_v23  ;;  %v5260_v23 = vld [vmem:[#allocation12 + $0x1368] sm:$0xff] }
0x2b68   :  { %v8728_v25 = vsub.f32 %v5012_v17, %v5102_v13  ;;  %v5259_v13 = vld [vmem:[#allocation12 + $0x1350] sm:$0xff] }
0x2b69   :  { %v8730_v0 = vsub.f32 %v5007_v46, %v5101_v26  ;;  %v5261_v26 = vld [vmem:[#allocation12 + $0x1380] sm:$0xff] }
0x2b6a   :  { %v5126_v30 = vmul.f32 %v8728_v25, %v8728_v25 }
0x2b6b   :  { %v5125_v56 = vmul.f32 %v8730_v0, %v8730_v0 }
0x2b6c   :  { %v5076_v31 = vpop.xlane.xlu0 %5075  ;;  %v5140_v22 = vsel %vm196_vm4, %v5126_v30, 0.0  ;;  %v5262_v30 = vld [vmem:[#allocation12 + $0x1398] sm:$0xff] }
0x2b6d   :  { %v5104_v24 = vmul.f32 0.03125, %v5076_v31  ;;  %5141 = vadd.xlane.f32.xlu0 %v5140_v22  ;;  %v5073_v43 = vpop.xlane.xlu1 %5072  ;;  %v5137_v12 = vsel %vm196_vm4, %v5125_v56, 0.0  ;;  %v7315_v56 = vpack.c.bf16 %v5262_v30, %v5261_v26  ;;  %v5426_v31 = vld [vmem:[#allocation12 + $0x13d0] sm:$0xff]  ;;  %v5429_v22 = vld [vmem:[#allocation12 + $0x13e8] sm:$0xff] }
0x2b6e   :  { %v5103_v38 = vmul.f32 0.03125, %v5073_v43  ;;  %5138 = vadd.xlane.f32.xlu1 %v5137_v12  ;;  %v7319_v43 = vpack.c.bf16 %v5429_v22, %v5426_v31  ;;  %v5428_v12 = vld [vmem:[#allocation12 + $0x13e0] sm:$0xff] }
0x2b6f   :  { %v8738_v39 = vsub.f32 %v5022_v28, %v5104_v24  ;;  %v5425_v24 = vld [vmem:[#allocation12 + $0x13c8] sm:$0xff] }
0x2b70   :  { %v8740_v47 = vsub.f32 %v5017_v6, %v5103_v38  ;;  %v5082_v40 = vpop.xlane.xlu0 %5081  ;;  %v5432_v38 = vld [vmem:[#allocation12 + $0x1400] sm:$0xff]  ;;  %7320 = vmatprep.subr.bf16.mxu0 %v7319_v43 }
0x2b71   :  { %v5106_v44 = vmul.f32 0.03125, %v5082_v40  ;;  %v5079_v14 = vpop.xlane.xlu1 %5078  ;;  %v5128_v33 = vmul.f32 %v8738_v39, %v8738_v39  ;;  %v5435_v40 = vld [vmem:[#allocation12 + $0x1418] sm:$0xff] }
0x2b72   :  { %v5105_v42 = vmul.f32 0.03125, %v5079_v14  ;;  %v5127_v63 = vmul.f32 %v8740_v47, %v8740_v47  ;;  %v7323_v14 = vpack.c.bf16 %v5435_v40, %v5432_v38  ;;  %v5436_v38 = vld [vmem:[#allocation12 + $0x1420] sm:$0xff] }
0x2b73   :  { %v8746_v50 = vsub.f32 %v5032_v32, %v5106_v44  ;;  %v5146_v11 = vsel %vm196_vm4, %v5128_v33, 0.0  ;;  %v7321_v44 = vpack.c.bf16 %v5428_v12, %v5425_v24  ;;  %v5431_v33 = vld [vmem:[#allocation12 + $0x13f8] sm:$0xff]  ;;  %v5433_v12 = vld [vmem:[#allocation12 + $0x1408] sm:$0xff] }
0x2b74   :  { %v8749_v51 = vsub.f32 %v5027_v37, %v5105_v42  ;;  %v5088_v17 = vpop.xlane.xlu0 %5087  ;;  %5147 = vadd.xlane.f32.xlu0 %v5146_v11  ;;  %v5143_v45 = vsel %vm196_vm4, %v5127_v63, 0.0  ;;  %v5434_v42 = vld [vmem:[#allocation12 + $0x1410] sm:$0xff]  ;;  %v5427_v63 = vld [vmem:[#allocation12 + $0x13d8] sm:$0xff] }
0x2b75   :  { %v5108_v46 = vmul.f32 0.03125, %v5088_v17  ;;  %5144 = vadd.xlane.f32.xlu1 %v5143_v45  ;;  %v5085_v27 = vpop.xlane.xlu1 %5084  ;;  %v5130_v19 = vmul.f32 %v8746_v50, %v8746_v50  ;;  %v5430_v11 = vld [vmem:[#allocation12 + $0x13f0] sm:$0xff]  ;;  %7322 = vmatpush1.bf16.msra.mxu0 %v7321_v44  ;;  %v7325_v17 = vpack.c.bf16 %v5434_v42, %v5431_v33 }
0x2b76   :  { %v5107_v36 = vmul.f32 0.03125, %v5085_v27  ;;  %v5129_v28 = vmul.f32 %v8749_v51, %v8749_v51  ;;  %v8792_v45 = vpack.c.bf16 %v5430_v11, %v5427_v63  ;;  %7324 = vmatprep.subr.bf16.mxu0 %v7323_v14  ;;  %v5437_v27 = vld [vmem:[#allocation12 + $0x1428] sm:$0xff] }
0x2b77   :  { %v8756_v8 = vsub.f32 %v5042_v16, %v5108_v46  ;;  %v5152_v6 = vsel %vm196_vm4, %v5130_v19, 0.0  ;;  %v5438_v46 = vld [vmem:[#allocation12 + $0x1430] sm:$0xff] }
0x2b78   :  { %v8759_v21 = vsub.f32 %v5037_v35, %v5107_v36  ;;  %v5094_v57 = vpop.xlane.xlu0 %5093  ;;  %5153 = vadd.xlane.f32.xlu0 %v5152_v6  ;;  %v5149_v59 = vsel %vm196_vm4, %v5129_v28, 0.0 }
0x2b79   :  { %v5110_v32 = vmul.f32 0.03125, %v5094_v57  ;;  %5150 = vadd.xlane.f32.xlu1 %v5149_v59  ;;  %v5091_v2 = vpop.xlane.xlu1 %5090  ;;  %v5132_v37 = vmul.f32 %v8756_v8, %v8756_v8  ;;  %7326 = vmatpush1.bf16.msra.mxu0 %v7325_v17 }
0x2b7a   :  { %v5109_v3 = vmul.f32 0.03125, %v5091_v2  ;;  %v5131_v48 = vmul.f32 %v8759_v21, %v8759_v21  ;;  %5485 = vmatprep.subr.mxu0 %v5438_v46  ;;  %v7331_v46 = vpack.c.bf16 %v5436_v38, %v5433_v12 }
0x2b7b   :  { %v8767_v55 = vsub.f32 %v8712_v34, %v5110_v32  ;;  %v5158_v16 = vsel %vm196_vm4, %v5132_v37, 0.0 }
0x2b7c   :  { %v8771_v52 = vsub.f32 %v8714_v4, %v5109_v3  ;;  %5159 = vadd.xlane.f32.xlu0 %v5158_v16  ;;  %v5100_v35 = vpop.xlane.xlu0 %5099  ;;  %v5155_v60 = vsel %vm196_vm4, %v5131_v48, 0.0 }
0x2b7d   :  { %v5112_v41 = vmul.f32 0.03125, %v5100_v35  ;;  %5156 = vadd.xlane.f32.xlu1 %v5155_v60  ;;  %v5097_v5 = vpop.xlane.xlu1 %5096  ;;  %v5134_v49 = vmul.f32 %v8767_v55, %v8767_v55  ;;  %5486 = vmatpush1.msra.mxu0 %v5437_v27 }
0x2b7e   :  { %v5111_v54 = vmul.f32 0.03125, %v5097_v5  ;;  %v5133_v34 = vmul.f32 %v8771_v52, %v8771_v52 }
0x2b7f   :  { %v8779_v53 = vsub.f32 %v8720_v7, %v5112_v41  ;;  %v5164_v4 = vsel %vm196_vm4, %v5134_v49, 0.0 }
0x2b80   :  { %v8783_v61 = vsub.f32 %v8722_v10, %v5111_v54  ;;  %5165 = vadd.xlane.f32.xlu0 %v5164_v4  ;;  %v5161_v9 = vsel %vm196_vm4, %v5133_v34, 0.0  ;;  %v7311_v10 = vpack.c.bf16 %v5260_v23, %v5259_v13  ;;  %v8795_v34 = vld [vmem:[#allocation12 + $0x6c1] ss:$0 sm:$0xff]  ;;  %v8798_v13 = vld [vmem:[#allocation12 + $0x6c2] ss:$0 sm:$0xff] }
0x2b81   :  { %5162 = vadd.xlane.f32.xlu1 %v5161_v9  ;;  %v5136_v62 = vmul.f32 %v8779_v53, %v8779_v53 }
0x2b82   :  { %v5135_v58 = vmul.f32 %v8783_v61, %v8783_v61  ;;  %7312 = vmatprep.subr.bf16.mxu1 %v7311_v10 }
0x2b83   :  { %v5170_v15 = vsel %vm196_vm4, %v5136_v62, 0.0  ;;  %7314 = vmatpush3.bf16.msra.mxu1 %v7311_v10 }
0x2b84   :  { %5171 = vadd.xlane.f32.xlu0 %v5170_v15  ;;  %v5167_v7 = vsel %vm196_vm4, %v5135_v58, 0.0  ;;  %7316 = vmatprep.subr.bf16.mxu1 %v7315_v56 }
0x2b85   :  { %5168 = vadd.xlane.f32.xlu1 %v5167_v7 }
0x2b87   :  { %7318 = vmatpush3.bf16.msra.mxu1 %v7315_v56 }
0x2b88   :  { %7328 = vmatprep.subr.bf16.mxu1 %v8792_v45 }
0x2bfa   :  { %v5142_v19 = vpop.xlane.xlu0 %5141 }
0x2bfb   :  { %v5174_v36 = vmul.f32 0.03125, %v5142_v19  ;;  %v5139_v28 = vpop.xlane.xlu1 %5138 }
0x2bfc   :  { %v5173_v6 = vmul.f32 0.03125, %v5139_v28 }
0x2bfd   :  { %v5186_v57 = vadd.f32 1e-05, %v5174_v36 }
0x2bfe   :  { %v5185_v59 = vadd.f32 1e-05, %v5173_v6 }
0x2bff   :  { %7573 = vrsqrt.f32 %v5186_v57 }
0x2c00   :  { %7575 = vrsqrt.f32 %v5185_v59 }
0x2c01   :  { %v5148_v32 = vpop.xlane.xlu0 %5147 }
0x2c02   :  { %v5176_v2 = vmul.f32 0.03125, %v5148_v32  ;;  %v5145_v37 = vpop.xlane.xlu1 %5144 }
0x2c03   :  { %v5175_v3 = vmul.f32 0.03125, %v5145_v37 }
0x2c04   :  { %v5188_v48 = vadd.f32 1e-05, %v5176_v2 }
0x2c05   :  { %v5187_v16 = vadd.f32 1e-05, %v5175_v3  ;;  %v5154_v35 = vpop.xlane.xlu0 %5153 }
0x2c06   :  { %7577 = vrsqrt.f32 %v5188_v48  ;;  %v5178_v60 = vmul.f32 0.03125, %v5154_v35  ;;  %v5151_v41 = vpop.xlane.xlu1 %5150 }
0x2c07   :  { %7579 = vrsqrt.f32 %v5187_v16  ;;  %v5177_v5 = vmul.f32 0.03125, %v5151_v41 }
0x2c08   :  { %v5190_v49 = vadd.f32 1e-05, %v5178_v60 }
0x2c09   :  { %v7574_v54 = vpop.eup %7573  ;;  %v5189_v4 = vadd.f32 1e-05, %v5177_v5  ;;  %v5160_v9 = vpop.xlane.xlu0 %5159 }
0x2c0a   :  { %v7576_v62 = vpop.eup %7575  ;;  %v5210_v58 = vmul.f32 %v7574_v54, %v8728_v25  ;;  %7581 = vrsqrt.f32 %v5190_v49  ;;  %v5180_v15 = vmul.f32 0.03125, %v5160_v9  ;;  %v5157_v7 = vpop.xlane.xlu1 %5156 }
0x2c0b   :  { %7583 = vrsqrt.f32 %v5189_v4  ;;  %v5179_v23 = vmul.f32 0.03125, %v5157_v7  ;;  %v5209_v10 = vmul.f32 %v7576_v62, %v8730_v0 }
0x2c0c   :  { %v5223_v26 = vmul.f32 %v8795_v34, %v5210_v58  ;;  %v5192_v30 = vadd.f32 1e-05, %v5180_v15 }
0x2c0d   :  { %v5191_v56 = vadd.f32 1e-05, %v5179_v23  ;;  %v5166_v31 = vpop.xlane.xlu0 %5165  ;;  %v5222_v22 = vmul.f32 %v8795_v34, %v5209_v10 }
0x2c0e   :  { %v5236_v24 = vadd.f32 %v8798_v13, %v5223_v26  ;;  %7585 = vrsqrt.f32 %v5192_v30  ;;  %v5182_v25 = vmul.f32 0.03125, %v5166_v31  ;;  %v5163_v43 = vpop.xlane.xlu1 %5162 }
0x2c0f   :  { %7587 = vrsqrt.f32 %v5191_v56  ;;  %v5181_v40 = vmul.f32 0.03125, %v5163_v43  ;;  %v5235_v44 = vadd.f32 %v8798_v13, %v5222_v22 }
0x2c10   :  { %v7578_v14 = vpop.eup %7577  ;;  %v5194_v0 = vadd.f32 1e-05, %v5182_v25  ;;  %v5248_v27 = vmax.f32 %v5236_v24, 0.0 }
0x2c11   :  { %v7580_v33 = vpop.eup %7579  ;;  %v5193_v42 = vadd.f32 1e-05, %v5181_v40  ;;  %v5172_v63 = vpop.xlane.xlu0 %5171  ;;  %v5247_v11 = vmax.f32 %v5235_v44, 0.0  ;;  %v5212_v17 = vmul.f32 %v7578_v14, %v8738_v39 }
0x2c12   :  { %7589 = vrsqrt.f32 %v5194_v0  ;;  %v5184_v19 = vmul.f32 0.03125, %v5172_v63  ;;  %v5169_v36 = vpop.xlane.xlu1 %5168  ;;  %v5211_v28 = vmul.f32 %v7580_v33, %v8740_v47  ;;  %v5263_v63 = vld [vmem:[#allocation12 + $0x13b0] ss:$0 sm:$0xff] }
0x2c13   :  { %7591 = vrsqrt.f32 %v5193_v42  ;;  %v5183_v6 = vmul.f32 0.03125, %v5169_v36  ;;  %6848 = vmatprep.mubr.msk.f32.mxu1 %vm196_vm4, %v5247_v11  ;;  %v5225_v57 = vmul.f32 %v8795_v34, %v5212_v17  ;;  %v5439_v42 = vld [vmem:[#allocation12 + $0x1438] sm:$0xff] }
0x2c14   :  { %v7582_v59 = vpop.eup %7581  ;;  %v5196_v32 = vadd.f32 1e-05, %v5184_v19  ;;  %6849 = vmatmul.mubr.msk.f32.vlgmr.msra.gmra.mrb[60].mxu1 %vm196_vm4, %v5248_v27  ;;  %v5224_v2 = vmul.f32 %v8795_v34, %v5211_v28 }
0x2c15   :  { %v7584_v39 = vpop.eup %7583  ;;  %v5195_v37 = vadd.f32 1e-05, %v5183_v6  ;;  %v5238_v3 = vadd.f32 %v8798_v13, %v5225_v57  ;;  %v5214_v48 = vmul.f32 %v7582_v59, %v8746_v50  ;;  %7330 = vmatpush3.bf16.msra.mxu1 %v8792_v45 }
0x2c16   :  { %7593 = vrsqrt.f32 %v5196_v32  ;;  %v5237_v47 = vadd.f32 %v8798_v13, %v5224_v2  ;;  %v5213_v16 = vmul.f32 %v7584_v39, %v8749_v51  ;;  %7332 = vmatprep.subr.bf16.mxu1 %v7331_v46 }
0x2c17   :  { %7595 = vrsqrt.f32 %v5195_v37  ;;  %v5227_v35 = vmul.f32 %v8795_v34, %v5214_v48  ;;  %v5250_v54 = vmax.f32 %v5238_v3, 0.0 }
0x2c18   :  { %v7586_v60 = vpop.eup %7585  ;;  %v5249_v41 = vmax.f32 %v5237_v47, 0.0  ;;  %v5226_v5 = vmul.f32 %v8795_v34, %v5213_v16 }
0x2c19   :  { %v7588_v49 = vpop.eup %7587  ;;  %v5240_v4 = vadd.f32 %v8798_v13, %v5227_v35  ;;  %v5216_v50 = vmul.f32 %v7586_v60, %v8756_v8  ;;  %7334 = vmatpush3.bf16.msra.mxu1 %v7331_v46 }
0x2c1a   :  { %6851 = vmatprep.mubr.msk.f32.mxu1 %vm196_vm4, %v5249_v41  ;;  %v5239_v45 = vadd.f32 %v8798_v13, %v5226_v5  ;;  %v5215_v51 = vmul.f32 %v7588_v49, %v8759_v21  ;;  %6874 = vmatprep.subr.mxu1 %v5439_v42  ;;  %v5740_v49 = vld [vmem:[#allocation12 + $0x1440] ss:$8 sm:$0x7] }
0x2c1b   :  { %6852 = vmatmul.mubr.msk.f32.gmra.mrb[62].mxu1 %vm196_vm4, %v5250_v54  ;;  %v5229_v9 = vmul.f32 %v8795_v34, %v5216_v50  ;;  %v5252_v23 = vmax.f32 %v5240_v4, 0.0 }
0x2c1c   :  { %v7590_v62 = vpop.eup %7589  ;;  %v5251_v58 = vmax.f32 %v5239_v45, 0.0  ;;  %v5228_v15 = vmul.f32 %v8795_v34, %v5215_v51 }
0x2c1d   :  { %v7592_v7 = vpop.eup %7591  ;;  %v5242_v10 = vadd.f32 %v8798_v13, %v5229_v9  ;;  %v5218_v8 = vmul.f32 %v7590_v62, %v8767_v55  ;;  %6875 = vmatpush3.msra.mxu1 %v5439_v42 }
0x2c1e   :  { %6854 = vmatprep.mubr.msk.f32.mxu1 %vm196_vm4, %v5251_v58  ;;  %v5241_v26 = vadd.f32 %v8798_v13, %v5228_v15  ;;  %v5217_v21 = vmul.f32 %v7592_v7, %v8771_v52  ;;  %v7837_v15 = vmov 0  }
0x2c1f   :  { %6855 = vmatmul.mubr.msk.f32.gmra.mrb[64].mxu1 %vm196_vm4, %v5252_v23  ;;  %v5231_v30 = vmul.f32 %v8795_v34, %v5218_v8  ;;  %v5254_v43 = vmax.f32 %v5242_v10, 0.0 }
0x2c20   :  { %v7594_v56 = vpop.eup %7593  ;;  %v5253_v31 = vmax.f32 %v5241_v26, 0.0  ;;  %v5230_v22 = vmul.f32 %v8795_v34, %v5217_v21 }
0x2c21   :  { %v7596_v24 = vpop.eup %7595  ;;  %v5220_v25 = vmul.f32 %v7594_v56, %v8779_v53  ;;  %v5244_v55 = vadd.f32 %v8798_v13, %v5231_v30 }
0x2c22   :  { %v5219_v12 = vmul.f32 %v7596_v24, %v8783_v61  ;;  %6857 = vmatprep.mubr.msk.f32.mxu1 %vm196_vm4, %v5253_v31  ;;  %v5243_v52 = vadd.f32 %v8798_v13, %v5230_v22 }
0x2c23   :  { %6858 = vmatmul.mubr.msk.f32.gmra.mrb[66].mxu1 %vm196_vm4, %v5254_v43  ;;  %v5233_v38 = vmul.f32 %v8795_v34, %v5220_v25  ;;  %v5256_v14 = vmax.f32 %v5244_v55, 0.0 }
0x2c24   :  { %v5255_v40 = vmax.f32 %v5243_v52, 0.0  ;;  %v5232_v44 = vmul.f32 %v8795_v34, %v5219_v12 }
0x2c25   :  { %v5246_v0 = vadd.f32 %v8798_v13, %v5233_v38 }
0x2c26   :  { %6860 = vmatprep.mubr.msk.f32.mxu1 %vm196_vm4, %v5255_v40  ;;  %v5245_v53 = vadd.f32 %v8798_v13, %v5232_v44 }
0x2c27   :  { %6861 = vmatmul.mubr.msk.f32.gmra.mrb[68].mxu1 %vm196_vm4, %v5256_v14  ;;  %v5258_v33 = vmax.f32 %v5246_v0, 0.0 }
0x2c28   :  { %v5257_v61 = vmax.f32 %v5245_v53, 0.0 }
0x2c2a   :  { %6863 = vmatprep.mubr.msk.f32.mxu1 %vm196_vm4, %v5257_v61 }
0x2c2b   :  { %6864 = vmatmul.mubr.msk.f32.gmra.mrb[70].mxu1 %vm196_vm4, %v5258_v33  ;;  %vm5741_vm4 = vcmp.gt.f32.partialorder %v5740_v49, 0.5 }
0x2c2c   :  { %v5814_v7 = vsel %vm5741_vm4, 1, %v7837_v15 }
0x2c2d   :  { %v5818_v26 = vrot.slane %v5814_v7, %v7983_v18  ;;  %v5826_v21 = vrot.slane %v5814_v7, %v8226_v29  ;;  %v5822_v30 = vrot.slane %v5814_v7, %v7986_v20 }
0x2c2f   :  { %vm8898_vm7 = vcmp.eq.s32.totalorder %v5818_v26, 1  ;;  %vm8902_vm8 = vcmp.eq.s32.totalorder %v5826_v21, 1  ;;  %vm8906_vm9 = vcmp.eq.s32.totalorder %v5822_v30, 1 }
0x2ce7   :  { %v6850_v34 = vpop.f32.mrb[60].mxu1 }
0x2ce8   :  { %v5366_v11 = vpop.f32.mrb[61].mxu1  ;;  %v5372_v46 = vadd.f32 %v6850_v34, %v5263_v63 }
0x2ce9   :  { %v5367_v17 = vadd.f32 %v5366_v11, %v5263_v63 }
0x2ceb   :  { %6062 = vmatmul.mubr.msk.f32.vlgmr.msra.gmra.mrb[62].mxu0 %vm5440_vm6, %v5367_v17  ;;  %6876 = vmatprep.mubr.msk.f32.mxu1 %vm5440_vm6, %v5367_v17 }
0x2cec   :  { %6877 = vmatmul.mubr.msk.f32.vlgmr.msra.gmra.mrb[72].mxu1 %vm5440_vm6, %v5372_v46  ;;  %5547 = vmatprep.mubr.f32.mxu0 %v7822_v1 }
0x2cee   :  { %v6853_v13 = vpop.f32.mrb[62].mxu1 }
0x2cef   :  { %v5376_v27 = vpop.f32.mrb[63].mxu1  ;;  %6063 = vmatmul.mubr.msk.f32.gmra.mrb[64].mxu0 %vm5440_vm6, %v5372_v46  ;;  %v5382_v36 = vadd.f32 %v6853_v13, %v5263_v63 }
0x2cf0   :  { %v5377_v19 = vadd.f32 %v5376_v27, %v5263_v63  ;;  %5553 = vmatprep.mubr.f32.mxu0 %v7822_v1 }
0x2cf2   :  { %v6856_v28 = vpop.f32.mrb[64].mxu1  ;;  %6879 = vmatprep.mubr.msk.f32.mxu1 %vm5440_vm6, %v5377_v19 }
0x2cf3   :  { %v5386_v6 = vpop.f32.mrb[65].mxu1  ;;  %6064 = vmatmul.mubr.msk.f32.gmra.mrb[66].mxu0 %vm5440_vm6, %v5377_v19  ;;  %6880 = vmatmul.mubr.msk.f32.gmra.mrb[74].mxu1 %vm5440_vm6, %v5382_v36  ;;  %v5392_v59 = vadd.f32 %v6856_v28, %v5263_v63 }
0x2cf4   :  { %v5387_v57 = vadd.f32 %v5386_v6, %v5263_v63  ;;  %5559 = vmatprep.mubr.f32.mxu0 %v7822_v1 }
0x2cf6   :  { %v6859_v32 = vpop.f32.mrb[66].mxu1  ;;  %6882 = vmatprep.mubr.msk.f32.mxu1 %vm5440_vm6, %v5387_v57 }
0x2cf7   :  { %v5396_v2 = vpop.f32.mrb[67].mxu1  ;;  %6065 = vmatmul.mubr.msk.f32.gmra.mrb[68].mxu0 %vm5440_vm6, %v5382_v36  ;;  %6883 = vmatmul.mubr.msk.f32.gmra.mrb[76].mxu1 %vm5440_vm6, %v5392_v59  ;;  %v5402_v37 = vadd.f32 %v6859_v32, %v5263_v63 }
0x2cf8   :  { %v5397_v39 = vadd.f32 %v5396_v2, %v5263_v63  ;;  %5565 = vmatprep.mubr.f32.mxu0 %v7822_v1 }
0x2cfa   :  { %v6862_v3 = vpop.f32.mrb[68].mxu1  ;;  %6885 = vmatprep.mubr.msk.f32.mxu1 %vm5440_vm6, %v5397_v39 }
0x2cfb   :  { %v5406_v48 = vpop.f32.mrb[69].mxu1  ;;  %6066 = vmatmul.mubr.msk.f32.gmra.mrb[70].mxu0 %vm5440_vm6, %v5387_v57  ;;  %6886 = vmatmul.mubr.msk.f32.gmra.mrb[78].mxu1 %vm5440_vm6, %v5402_v37  ;;  %v5412_v16 = vadd.f32 %v6862_v3, %v5263_v63 }
0x2cfc   :  { %v5407_v47 = vadd.f32 %v5406_v48, %v5263_v63  ;;  %5571 = vmatprep.mubr.f32.mxu0 %v7822_v1 }
0x2cfe   :  { %v6865_v35 = vpop.f32.mrb[70].mxu1  ;;  %6888 = vmatprep.mubr.msk.f32.mxu1 %vm5440_vm6, %v5407_v47 }
0x2cff   :  { %v5416_v60 = vpop.f32.mrb[71].mxu1  ;;  %6067 = vmatmul.mubr.msk.f32.gmra.mrb[72].mxu0 %vm5440_vm6, %v5392_v59  ;;  %6889 = vmatmul.mubr.msk.f32.gmra.mrb[80].mxu1 %vm5440_vm6, %v5412_v16  ;;  %v5422_v5 = vadd.f32 %v6865_v35, %v5263_v63 }
0x2d00   :  { %v5417_v41 = vadd.f32 %v5416_v60, %v5263_v63  ;;  %5577 = vmatprep.mubr.f32.mxu0 %v7822_v1 }
0x2d02   :  { %6891 = vmatprep.mubr.msk.f32.mxu1 %vm5440_vm6, %v5417_v41 }
0x2d03   :  { %6068 = vmatmul.mubr.msk.f32.gmra.mrb[74].mxu0 %vm5440_vm6, %v5397_v39  ;;  %6892 = vmatmul.mubr.msk.f32.gmra.mrb[82].mxu1 %vm5440_vm6, %v5422_v5 }
0x2d04   :  { %5583 = vmatprep.mubr.f32.mxu0 %v7822_v1 }
0x2d07   :  { %6069 = vmatmul.mubr.msk.f32.gmra.mrb[76].mxu0 %vm5440_vm6, %v5402_v37 }
0x2d08   :  { %5589 = vmatprep.mubr.f32.mxu0 %v7822_v1 }
0x2d0b   :  { %6070 = vmatmul.mubr.msk.f32.gmra.mrb[78].mxu0 %vm5440_vm6, %v5407_v47 }
0x2d0c   :  { %5595 = vmatprep.mubr.f32.mxu0 %v7822_v1 }
0x2d0f   :  { %6071 = vmatmul.mubr.msk.f32.gmra.mrb[80].mxu0 %vm5440_vm6, %v5412_v16 }
0x2d10   :  { %5601 = vmatprep.mubr.f32.mxu0 %v7822_v1 }
0x2d13   :  { %6072 = vmatmul.mubr.msk.f32.gmra.mrb[82].mxu0 %vm5440_vm6, %v5417_v41 }
0x2d14   :  { %5607 = vmatprep.mubr.f32.mxu0 %v7822_v1 }
0x2d17   :  { %6073 = vmatmul.mubr.msk.f32.gmra.mrb[84].mxu0 %vm5440_vm6, %v5422_v5 }
0x2dbe   :  { %v5543_v54 = vpop.f32.mrb[62].mxu0 }
0x2dbf   :  { %v5742_v4 = vmul.f32 1.442695, %v5543_v54  ;;  %v5545_v50 = vpop.f32.mrb[63].mxu0  ;;  %v6878_v45 = vpop.f32.mrb[72].mxu1 }
0x2dc0   :  { %v5744_v51 = vmul.f32 1.442695, %v5545_v50  ;;  %v5752_v9 = vmul.f32 1.442695, %v6878_v45  ;;  %v5680_v62 = vpop.f32.mrb[73].mxu1 }
0x2dc1   :  { %7597 = vpow2.f32 %v5742_v4  ;;  %v5746_v58 = vmul.f32 1.442695, %v5680_v62 }
0x2dc2   :  { %7599 = vpow2.f32 %v5744_v51  ;;  %v5549_v23 = vpop.f32.mrb[64].mxu0 }
0x2dc3   :  { %7601 = vpow2.f32 %v5752_v9  ;;  %v5748_v10 = vmul.f32 1.442695, %v5549_v23  ;;  %v5551_v1 = vpop.f32.mrb[65].mxu0 }
0x2dc4   :  { %7603 = vpow2.f32 %v5746_v58  ;;  %v5750_v8 = vmul.f32 1.442695, %v5551_v1 }
0x2dc5   :  { %7605 = vpow2.f32 %v5748_v10 }
0x2dc6   :  { %7607 = vpow2.f32 %v5750_v8  ;;  %v8886_v56 = vpop.f32.mrb[66].mxu0  ;;  %v8888_v31 = vpop.f32.mrb[74].mxu1 }
0x2dc7   :  { %v5754_v22 = vmul.f32 1.442695, %v8886_v56  ;;  %v5764_v24 = vmul.f32 1.442695, %v8888_v31  ;;  %v8892_v25 = vpop.f32.mrb[67].mxu0  ;;  %v8894_v43 = vpop.f32.mrb[75].mxu1 }
0x2dc8   :  { %v5756_v18 = vmul.f32 1.442695, %v8892_v25  ;;  %v5758_v55 = vmul.f32 1.442695, %v8894_v43 }
0x2dc9   :  { %7609 = vpow2.f32 %v5754_v22 }
0x2dca   :  { %7611 = vpow2.f32 %v5764_v24  ;;  %v8910_v52 = vpop.f32.mrb[68].mxu0  ;;  %v8912_v38 = vpop.f32.mrb[76].mxu1 }
0x2dcb   :  { %v7598_v40 = vpop.eup %7597  ;;  %7613 = vpow2.f32 %v5756_v18  ;;  %v5760_v44 = vmul.f32 1.442695, %v8910_v52  ;;  %v5776_v14 = vmul.f32 1.442695, %v8912_v38  ;;  %v8916_v0 = vpop.f32.mrb[69].mxu0 }
0x2dcc   :  { %v8918_v53 = vpop.f32.mrb[77].mxu1  ;;  %v7600_v61 = vpop.eup %7599  ;;  %v5830_v33 = vsel %vm8898_vm7, %v7598_v40, %v5543_v54  ;;  %7615 = vpow2.f32 %v5758_v55  ;;  %v5762_v42 = vmul.f32 1.442695, %v8916_v0 }
0x2dcd   :  { %v5770_v63 = vmul.f32 1.442695, %v8918_v53  ;;  %v7602_v34 = vpop.eup %7601  ;;  %5866 = vst [vmem:[#allocation13] sm:$0xff] %v5830_v33  ;;  %v5831_v11 = vsel %vm8906_vm9, %v7600_v61, %v5545_v50  ;;  %7617 = vpow2.f32 %v5760_v44 }
0x2dce   :  { %v7604_v17 = vpop.eup %7603  ;;  %5867 = vst [vmem:[#allocation13 + $0x8] sm:$0xff] %v5831_v11  ;;  %v5835_v46 = vsel %vm8902_vm8, %v7602_v34, %v6878_v45  ;;  %7619 = vpow2.f32 %v5776_v14  ;;  %v8928_v13 = vpop.f32.mrb[70].mxu0 }
0x2dcf   :  { %v8930_v27 = vpop.f32.mrb[78].mxu1  ;;  %v7606_v19 = vpop.eup %7605  ;;  %5871 = vst [vmem:[#allocation13 + $0x28] sm:$0xff] %v5835_v46  ;;  %v5832_v36 = vsel %vm8902_vm8, %v7604_v17, %v5680_v62  ;;  %7621 = vpow2.f32 %v5762_v42  ;;  %v5766_v28 = vmul.f32 1.442695, %v8928_v13 }
0x2dd0   :  { %v5788_v6 = vmul.f32 1.442695, %v8930_v27  ;;  %v8936_v57 = vpop.f32.mrb[71].mxu0  ;;  %v8938_v59 = vpop.f32.mrb[79].mxu1  ;;  %5868 = vst [vmem:[#allocation13 + $0x10] sm:$0xff] %v5832_v36  ;;  %v5833_v2 = vsel %vm8898_vm7, %v7606_v19, %v5549_v23  ;;  %7623 = vpow2.f32 %v5770_v63 }
0x2dd1   :  { %v7608_v32 = vpop.eup %7607  ;;  %v5768_v39 = vmul.f32 1.442695, %v8936_v57  ;;  %v5782_v37 = vmul.f32 1.442695, %v8938_v59  ;;  %5869 = vst [vmem:[#allocation13 + $0x18] sm:$0xff] %v5833_v2  ;;  %7625 = vpow2.f32 %v5766_v28 }
0x2dd2   :  { %v5834_v3 = vsel %vm8906_vm9, %v7608_v32, %v5551_v1  ;;  %7627 = vpow2.f32 %v5788_v6  ;;  %v8946_v48 = vpop.f32.mrb[72].mxu0  ;;  %v8948_v47 = vpop.f32.mrb[80].mxu1 }
0x2dd3   :  { %5870 = vst [vmem:[#allocation13 + $0x20] sm:$0xff] %v5834_v3  ;;  %v7610_v16 = vpop.eup %7609  ;;  %7629 = vpow2.f32 %v5768_v39  ;;  %v5772_v35 = vmul.f32 1.442695, %v8946_v48  ;;  %v5800_v60 = vmul.f32 1.442695, %v8948_v47  ;;  %v8952_v41 = vpop.f32.mrb[73].mxu0 }
0x2dd4   :  { %v8954_v5 = vpop.f32.mrb[81].mxu1  ;;  %v7612_v49 = vpop.eup %7611  ;;  %v5836_v54 = vsel %vm8898_vm7, %v7610_v16, %v8886_v56  ;;  %7631 = vpow2.f32 %v5782_v37  ;;  %v5774_v4 = vmul.f32 1.442695, %v8952_v41 }
0x2dd5   :  { %v5794_v50 = vmul.f32 1.442695, %v8954_v5  ;;  %v7614_v45 = vpop.eup %7613  ;;  %5872 = vst [vmem:[#allocation13 + $0x30] sm:$0xff] %v5836_v54  ;;  %v5841_v51 = vsel %vm8902_vm8, %v7612_v49, %v8888_v31  ;;  %7633 = vpow2.f32 %v5772_v35 }
0x2dd6   :  { %v7616_v9 = vpop.eup %7615  ;;  %5877 = vst [vmem:[#allocation13 + $0x58] sm:$0xff] %v5841_v51  ;;  %v5837_v62 = vsel %vm8906_vm9, %v7614_v45, %v8892_v25  ;;  %7635 = vpow2.f32 %v5800_v60  ;;  %v8967_v58 = vpop.f32.mrb[74].mxu0 }
0x2dd7   :  { %v8969_v15 = vpop.f32.mrb[82].mxu1  ;;  %v7618_v7 = vpop.eup %7617  ;;  %5873 = vst [vmem:[#allocation13 + $0x38] sm:$0xff] %v5837_v62  ;;  %v5838_v23 = vsel %vm8902_vm8, %v7616_v9, %v8894_v43  ;;  %7637 = vpow2.f32 %v5774_v4  ;;  %v5778_v10 = vmul.f32 1.442695, %v8967_v58 }
0x2dd8   :  { %v5812_v1 = vmul.f32 1.442695, %v8969_v15  ;;  %v8976_v8 = vpop.f32.mrb[75].mxu0  ;;  %v8978_v26 = vpop.f32.mrb[83].mxu1  ;;  %5874 = vst [vmem:[#allocation13 + $0x40] sm:$0xff] %v5838_v23  ;;  %v5839_v30 = vsel %vm8898_vm7, %v7618_v7, %v8910_v52  ;;  %7639 = vpow2.f32 %v5794_v50 }
0x2dd9   :  { %v7620_v21 = vpop.eup %7619  ;;  %v5780_v56 = vmul.f32 1.442695, %v8976_v8  ;;  %v5806_v31 = vmul.f32 1.442695, %v8978_v26  ;;  %5875 = vst [vmem:[#allocation13 + $0x48] sm:$0xff] %v5839_v30  ;;  %7641 = vpow2.f32 %v5778_v10 }
0x2dda   :  { %v7622_v22 = vpop.eup %7621  ;;  %v5847_v24 = vsel %vm8902_vm8, %v7620_v21, %v8912_v38  ;;  %7643 = vpow2.f32 %v5812_v1  ;;  %v8991_v18 = vpop.f32.mrb[76].mxu0 }
0x2ddb   :  { %v7624_v25 = vpop.eup %7623  ;;  %5883 = vst [vmem:[#allocation13 + $0x88] sm:$0xff] %v5847_v24  ;;  %v5840_v43 = vsel %vm8906_vm9, %v7622_v22, %v8916_v0  ;;  %7645 = vpow2.f32 %v5780_v56  ;;  %v5784_v40 = vmul.f32 1.442695, %v8991_v18  ;;  %v8997_v38 = vpop.f32.mrb[77].mxu0 }
0x2ddc   :  { %v7626_v55 = vpop.eup %7625  ;;  %5876 = vst [vmem:[#allocation13 + $0x50] sm:$0xff] %v5840_v43  ;;  %v5844_v52 = vsel %vm8902_vm8, %v7624_v25, %v8918_v53  ;;  %7647 = vpow2.f32 %v5806_v31  ;;  %v5786_v0 = vmul.f32 1.442695, %v8997_v38 }
0x2ddd   :  { %v7628_v44 = vpop.eup %7627  ;;  %5880 = vst [vmem:[#allocation13 + $0x70] sm:$0xff] %v5844_v52  ;;  %v5842_v14 = vsel %vm8898_vm7, %v7626_v55, %v8928_v13  ;;  %7649 = vpow2.f32 %v5784_v40 }
0x2dde   :  { %v7630_v61 = vpop.eup %7629  ;;  %5878 = vst [vmem:[#allocation13 + $0x60] sm:$0xff] %v5842_v14  ;;  %v5853_v53 = vsel %vm8902_vm8, %v7628_v44, %v8930_v27  ;;  %7651 = vpow2.f32 %v5786_v0  ;;  %v5591_v63 = vpop.f32.mrb[78].mxu0 }
0x2ddf   :  { %v7632_v33 = vpop.eup %7631  ;;  %5889 = vst [vmem:[#allocation13 + $0xb8] sm:$0xff] %v5853_v53  ;;  %v5843_v42 = vsel %vm8906_vm9, %v7630_v61, %v8936_v57  ;;  %v5790_v17 = vmul.f32 1.442695, %v5591_v63  ;;  %v5593_v46 = vpop.f32.mrb[79].mxu0 }
0x2de0   :  { %v7634_v34 = vpop.eup %7633  ;;  %5879 = vst [vmem:[#allocation13 + $0x68] sm:$0xff] %v5843_v42  ;;  %v5850_v11 = vsel %vm8902_vm8, %v7632_v33, %v8938_v59  ;;  %v5792_v19 = vmul.f32 1.442695, %v5593_v46 }
0x2de1   :  { %v7636_v13 = vpop.eup %7635  ;;  %5886 = vst [vmem:[#allocation13 + $0xa0] sm:$0xff] %v5850_v11  ;;  %v5845_v27 = vsel %vm8898_vm7, %v7634_v34, %v8946_v48  ;;  %7653 = vpow2.f32 %v5790_v17 }
0x2de2   :  { %v7638_v36 = vpop.eup %7637  ;;  %5881 = vst [vmem:[#allocation13 + $0x78] sm:$0xff] %v5845_v27  ;;  %v5859_v28 = vsel %vm8902_vm8, %v7636_v13, %v8948_v47  ;;  %7655 = vpow2.f32 %v5792_v19  ;;  %v5597_v59 = vpop.f32.mrb[80].mxu0 }
0x2de3   :  { %v7640_v6 = vpop.eup %7639  ;;  %5895 = vst [vmem:[#allocation13 + $0xe8] sm:$0xff] %v5859_v28  ;;  %v5846_v57 = vsel %vm8906_vm9, %v7638_v36, %v8952_v41  ;;  %v5796_v39 = vmul.f32 1.442695, %v5597_v59  ;;  %v5599_v37 = vpop.f32.mrb[81].mxu0 }
0x2de4   :  { %v7642_v32 = vpop.eup %7641  ;;  %5882 = vst [vmem:[#allocation13 + $0x80] sm:$0xff] %v5846_v57  ;;  %v5856_v2 = vsel %vm8902_vm8, %v7640_v6, %v8954_v5  ;;  %v5798_v47 = vmul.f32 1.442695, %v5599_v37 }
0x2de5   :  { %v7644_v3 = vpop.eup %7643  ;;  %5892 = vst [vmem:[#allocation13 + $0xd0] sm:$0xff] %v5856_v2  ;;  %v5848_v48 = vsel %vm8898_vm7, %v7642_v32, %v8967_v58  ;;  %7657 = vpow2.f32 %v5796_v39 }
0x2de6   :  { %v7646_v16 = vpop.eup %7645  ;;  %5884 = vst [vmem:[#allocation13 + $0x90] sm:$0xff] %v5848_v48  ;;  %v5865_v35 = vsel %vm8902_vm8, %v7644_v3, %v8969_v15  ;;  %7659 = vpow2.f32 %v5798_v47  ;;  %v5603_v5 = vpop.f32.mrb[82].mxu0 }
0x2de7   :  { %v7648_v60 = vpop.eup %7647  ;;  %5901 = vst [vmem:[#allocation13 + $0x118] sm:$0xff] %v5865_v35  ;;  %v5849_v41 = vsel %vm8906_vm9, %v7646_v16, %v8976_v8  ;;  %v5802_v4 = vmul.f32 1.442695, %v5603_v5  ;;  %v5605_v50 = vpop.f32.mrb[83].mxu0 }
0x2de8   :  { %v7650_v49 = vpop.eup %7649  ;;  %5885 = vst [vmem:[#allocation13 + $0x98] sm:$0xff] %v5849_v41  ;;  %v5862_v54 = vsel %vm8902_vm8, %v7648_v60, %v8978_v26  ;;  %v5804_v9 = vmul.f32 1.442695, %v5605_v50 }
0x2de9   :  { %v7652_v45 = vpop.eup %7651  ;;  %5898 = vst [vmem:[#allocation13 + $0x100] sm:$0xff] %v5862_v54  ;;  %v5851_v51 = vsel %vm8898_vm7, %v7650_v49, %v8991_v18  ;;  %7661 = vpow2.f32 %v5802_v4 }
0x2dea   :  { %5887 = vst [vmem:[#allocation13 + $0xa8] sm:$0xff] %v5851_v51  ;;  %v5852_v62 = vsel %vm8906_vm9, %v7652_v45, %v8997_v38  ;;  %7663 = vpow2.f32 %v5804_v9  ;;  %v5609_v58 = vpop.f32.mrb[84].mxu0 }
0x2deb   :  { %5888 = vst [vmem:[#allocation13 + $0xb0] sm:$0xff] %v5852_v62  ;;  %v7654_v20 = vpop.eup %7653  ;;  %v5808_v15 = vmul.f32 1.442695, %v5609_v58  ;;  %v5611_v7 = vpop.f32.mrb[85].mxu0 }
0x2dec   :  { %v7656_v23 = vpop.eup %7655  ;;  %v5854_v10 = vsel %vm8898_vm7, %v7654_v20, %v5591_v63  ;;  %v5810_v1 = vmul.f32 1.442695, %v5611_v7 }
0x2ded   :  { %5890 = vst [vmem:[#allocation13 + $0xc0] sm:$0xff] %v5854_v10  ;;  %v5855_v8 = vsel %vm8906_vm9, %v7656_v23, %v5593_v46  ;;  %7665 = vpow2.f32 %v5808_v15 }
0x2dee   :  { %5891 = vst [vmem:[#allocation13 + $0xc8] sm:$0xff] %v5855_v8  ;;  %7667 = vpow2.f32 %v5810_v1 }
0x2def   :  { %v7658_v26 = vpop.eup %7657 }
0x2df0   :  { %v7660_v21 = vpop.eup %7659  ;;  %v5857_v30 = vsel %vm8898_vm7, %v7658_v26, %v5597_v59 }
0x2df1   :  { %5893 = vst [vmem:[#allocation13 + $0xd8] sm:$0xff] %v5857_v30  ;;  %v5858_v56 = vsel %vm8906_vm9, %v7660_v21, %v5599_v37 }
0x2df2   :  { %5894 = vst [vmem:[#allocation13 + $0xe0] sm:$0xff] %v5858_v56 }
0x2df3   :  { %v7662_v31 = vpop.eup %7661 }
0x2df4   :  { %v7664_v22 = vpop.eup %7663  ;;  %v5860_v24 = vsel %vm8898_vm7, %v7662_v31, %v5603_v5 }
0x2df5   :  { %5896 = vst [vmem:[#allocation13 + $0xf0] sm:$0xff] %v5860_v24  ;;  %v5861_v25 = vsel %vm8906_vm9, %v7664_v22, %v5605_v50 }
0x2df6   :  { %5897 = vst [vmem:[#allocation13 + $0xf8] sm:$0xff] %v5861_v25 }
0x2df7   :  { %v7666_v43 = vpop.eup %7665 }
0x2df8   :  { %v7668_v18 = vpop.eup %7667  ;;  %v5863_v55 = vsel %vm8898_vm7, %v7666_v43, %v5609_v58 }
0x2df9   :  { %5899 = vst [vmem:[#allocation13 + $0x108] sm:$0xff] %v5863_v55  ;;  %v5864_v52 = vsel %vm8906_vm9, %v7668_v18, %v5611_v7 }
0x2dfa   :  { %5900 = vst [vmem:[#allocation13 + $0x110] sm:$0xff] %v5864_v52 }
0x2dfb   :  { %7792 = shalt.err (!%p7789_p2)
}
0x2dfc   :  { %s7793_s26 = scalar_lea.hbm %s9079_s6, 4608 }
0x2dfd   :  { %p7794_p3 = scmp.ne.s32.totalorder %s9079_s6, %s7793_s26  ;;  %p7797_p4 = scmp.lt.u32.totalorder %s7793_s26, %s9079_s6 }
0x2dff   :  { %p7799_p5 = pnand %p7797_p4, %p7794_p3 }
0x2e01   :  { %7802 = shalt.err (!%p7799_p5)
}
0x2e02   :  { %5915 = dma.vmem_to_hbm [thread:$0]  %s5910_s22, 4608, %s9079_s6, [#allocation6], %s7818_s2, %s7818_s2, %s7819_s30  }
0x2e03   :  { %7809 = dma.done.wait [#allocation6], 4608  }
0x2e04   :  { %7810 = vsyncadd [#allocation6], 4294962688 }
0x2e05   :  { %5921 = vsyncpa [#allocation5], 1 }
0x2e06   :  { %5922 = vsyncpa [#allocation8], 1 }
0x2e07   :  { %5923 = vsyncpa [#allocation11], 1 }
0x2e08   :  { %5924 = vsyncpa [#allocation6], 1 }

</bundles_post_ra>
